<compile_context>
chip_gen: v7x
topology: tpu7x:2x2x1
jax: 0.10.0
libtpu: 0.0.40
codegen_flags: <defaults>
</compile_context>

<pallas_src>
import jax
import jax.numpy as jnp
from jax.experimental import pallas as pl
from jax.experimental.pallas import tpu as pltpu

D = 100      # nn.Linear(100, 100)
OUT = 10     # nn.Linear(P * 100, 10)
P = 256      # original module uses 5000 parallel layers (see NOTE above)
PT = 64      # parallel layers folded into one grid step (chunk)
NSPLIT = 2   # outer "parallel" grid axis (megacore split on v7x)


# ----------------------------- fused kernel ---------------------------------
def _fused_kernel(x_ref, wi_ref, bi_ref, bo_ref, wp_ref, wo_ref, out_ref,
                  y_ref, acc_ref):
    s = pl.program_id(0)   # megacore split (parallel)
    c = pl.program_id(1)   # weight chunk within this split (reduction axis)

    @pl.when(c == 0)
    def _init():
        # Input Linear(D, D) in f32, rounded once to bf16 for the MXU.
        y = (jnp.dot(x_ref[...], wi_ref[...],
                     preferred_element_type=jnp.float32) + bi_ref[...])
        y_ref[...] = y.astype(y_ref.dtype)
        # Accumulator starts at the folded output bias on split 0 only, so the
        # wrapper reduction over splits needs no extra bias add.
        acc_ref[...] = jnp.where(
            s == 0,
            jnp.broadcast_to(bo_ref[...], acc_ref.shape),
            jnp.zeros_like(acc_ref))

    # PT parallel Linear(D, D) layers fused into one wide GEMM: [B,D]@[D,PT*D]
    o = jnp.dot(y_ref[...], wp_ref[...], preferred_element_type=jnp.float32)
    # Matching chunk of the output Linear: [B, PT*D] @ [PT*D, OUT]
    acc_ref[...] += jnp.dot(o.astype(wo_ref.dtype), wo_ref[...],
                            preferred_element_type=jnp.float32)

    @pl.when(c == pl.num_programs(1) - 1)
    def _finalize():
        out_ref[...] = acc_ref[...][None, :, :].astype(out_ref.dtype)


# ------------------------- one-time weight prep ------------------------------
def prepare_params(params, *, pt=PT, nsplit=NSPLIT):
    """Hoist all re-layouts / casts / bias folding out of the per-call path."""
    wi, bi, wp, bp, wo, bo = params
    p, d = wp.shape[0], wp.shape[2]
    out_f = wo.shape[0]
    assert p % pt == 0 and (p // pt) % nsplit == 0

    wi_t = jnp.transpose(wi)                                  # [D_in, D_out] f32
    bi_r = bi.reshape(1, d)                                   # [1, D]        f32

    # Parallel layers: torch [P, out, in] -> [in, P*out], streamed in bf16.
    wp_flat = jnp.transpose(wp, (2, 0, 1)).reshape(d, p * d).astype(jnp.bfloat16)
    # Output layer: torch [OUT, P*D] -> [P*D, OUT], streamed in bf16.
    wo_t = jnp.transpose(wo)                                  # [P*D, OUT] f32
    wo_flat = wo_t.astype(jnp.bfloat16)

    # Fold parallel-layer biases into an effective output bias (linear net).
    bo_eff = (bo + bp.reshape(1, p * d) @ wo_t).reshape(1, out_f)   # [1, OUT] f32

    return wi_t, bi_r, wp_flat, wo_flat, bo_eff


# ------------------------------- forward -------------------------------------
def parallel_net_forward(x, prepped, *, pt=PT, nsplit=NSPLIT):
    wi_t, bi_r, wp_flat, wo_flat, bo_eff = prepped
    b, d = x.shape
    pd = wp_flat.shape[1]
    out_f = wo_flat.shape[1]
    p = pd // d
    n_chunks = p // pt
    inner = n_chunks // nsplit                                # chunks per split

    flops = 2 * b * d * d + 2 * b * p * d * d + 2 * b * p * d * out_f
    bytes_accessed = (wp_flat.size + wo_flat.size) * 2 + x.size * 4 \
        + (wi_t.size + bi_r.size + bo_eff.size) * 4 + nsplit * b * out_f * 4

    partials = pl.pallas_call(
        _fused_kernel,
        out_shape=jax.ShapeDtypeStruct((nsplit, b, out_f), jnp.float32),
        grid=(nsplit, inner),
        in_specs=[
            pl.BlockSpec((b, d), lambda s, c: (0, 0)),                   # x  (resident)
            pl.BlockSpec((d, d), lambda s, c: (0, 0)),                   # Wi (resident)
            pl.BlockSpec((1, d), lambda s, c: (0, 0)),                   # bi (resident)
            pl.BlockSpec((1, out_f), lambda s, c: (0, 0)),               # folded bo
            pl.BlockSpec((d, pt * d), lambda s, c: (0, s * inner + c)),  # Wp chunk
            pl.BlockSpec((pt * d, out_f), lambda s, c: (s * inner + c, 0)),  # Wo chunk
        ],
        out_specs=pl.BlockSpec((1, b, out_f), lambda s, c: (s, 0, 0)),
        scratch_shapes=[
            pltpu.VMEM((b, d), jnp.bfloat16),      # y = input-linear output (MXU dtype)
            pltpu.VMEM((b, out_f), jnp.float32),   # per-core accumulator
        ],
        compiler_params=pltpu.CompilerParams(
            dimension_semantics=("parallel", "arbitrary")),
        cost_estimate=pl.CostEstimate(flops=flops, transcendentals=0,
                                      bytes_accessed=bytes_accessed),
    )(x, wi_t, bi_r, bo_eff, wp_flat, wo_flat)

    # Combine the per-split partial sums (bias already folded in on split 0).
    return partials.sum(axis=0)


# ------------------------------ reference ------------------------------------
def reference(x, params):
    wi, bi, wp, bp, wo, bo = params
    y = x @ wi.T + bi
    outs = jnp.einsum('bi,pji->bpj', y, wp) + bp[None]        # [B, P, D]
    cat = outs.reshape(x.shape[0], P * D)
    return cat @ wo.T + bo


def init_params(key):
    ks = jax.random.split(key, 6)
    s_d = 1.0 / jnp.sqrt(D)
    s_o = 1.0 / jnp.sqrt(P * D)
    wi = jax.random.uniform(ks[0], (D, D), jnp.float32, -s_d, s_d)
    bi = jax.random.uniform(ks[1], (D,), jnp.float32, -s_d, s_d)
    wp = jax.random.uniform(ks[2], (P, D, D), jnp.float32, -s_d, s_d)
    bp = jax.random.uniform(ks[3], (P, D), jnp.float32, -s_d, s_d)
    wo = jax.random.uniform(ks[4], (OUT, P * D), jnp.float32, -s_o, s_o)
    bo = jax.random.uniform(ks[5], (OUT,), jnp.float32, -s_o, s_o)
    return wi, bi, wp, bp, wo, bo


if __name__ == "__main__":
    key = jax.random.PRNGKey(0)
    kx, kp = jax.random.split(key)
    B = 2
    x = jax.random.normal(kx, (B, D), jnp.float32)
    params = init_params(kp)

    prepped = jax.block_until_ready(prepare_params(params))   # one-time prep
    fwd = jax.jit(parallel_net_forward)

    out = jax.block_until_ready(fwd(x, prepped))
    ref = jax.block_until_ready(reference(x, params))

    assert out.shape == (B, OUT), out.shape
    # bf16 weight streaming -> slightly looser tolerance than pure-f32 math.
    assert jnp.allclose(out, ref, rtol=2e-2, atol=2e-2), (
        float(jnp.max(jnp.abs(out - ref))))
    print("KERNEL_OK")
</pallas_src>

<mosaic_0001>
module attributes {stable_mosaic.version = 11 : i64} {
  func.func @_fused_kernel(%arg0: i32, %arg1: i32, %arg2: memref<2x100xf32, #tpu.memory_space<vmem>>, %arg3: memref<100x100xf32, #tpu.memory_space<vmem>>, %arg4: memref<1x100xf32, #tpu.memory_space<vmem>>, %arg5: memref<1x10xf32, #tpu.memory_space<vmem>>, %arg6: memref<100x6400xbf16, #tpu.memory_space<vmem>>, %arg7: memref<6400x10xbf16, #tpu.memory_space<vmem>>, %arg8: memref<1x2x10xf32, #tpu.memory_space<vmem>>, %arg9: memref<2x100xbf16, #tpu.memory_space<vmem>>, %arg10: memref<2x10xf32, #tpu.memory_space<vmem>>) attributes {dimension_semantics = [#tpu.dimension_semantics<parallel>, #tpu.dimension_semantics<arbitrary>], iteration_bounds = array<i64: 2, 2>, scalar_prefetch = 0 : i64, scratch_operands = 2 : i64, tpu.core_type = #tpu.core_type<tc>, window_params = [{pipeline_mode = #tpu.pipeline_mode<synchronous>, transform_indices = @transform_0, window_bounds = array<i64: 2, 100>}, {pipeline_mode = #tpu.pipeline_mode<synchronous>, transform_indices = @transform_1, window_bounds = array<i64: 100, 100>}, {pipeline_mode = #tpu.pipeline_mode<synchronous>, transform_indices = @transform_2, window_bounds = array<i64: 1, 100>}, {pipeline_mode = #tpu.pipeline_mode<synchronous>, transform_indices = @transform_3, window_bounds = array<i64: 1, 10>}, {transform_indices = @transform_4, window_bounds = array<i64: 100, 6400>}, {transform_indices = @transform_5, window_bounds = array<i64: 6400, 10>}, {transform_indices = @transform_6, window_bounds = array<i64: 1, 2, 10>}]} {
    %c0_i32 = arith.constant 0 : i32
    %0 = arith.cmpi eq, %arg1, %c0_i32 : i32
    %1 = arith.extui %0 : i1 to i32
    %c0_i32_0 = arith.constant 0 : i32
    %2 = arith.cmpi ne, %1, %c0_i32_0 : i32
    scf.if %2 {
      %c0_12 = arith.constant 0 : index
      %c0_13 = arith.constant 0 : index
      %15 = vector.load %arg2[%c0_12, %c0_13] : memref<2x100xf32, #tpu.memory_space<vmem>>, vector<2x100xf32>
      %c0_14 = arith.constant 0 : index
      %c0_15 = arith.constant 0 : index
      %16 = vector.load %arg3[%c0_14, %c0_15] : memref<100x100xf32, #tpu.memory_space<vmem>>, vector<100x100xf32>
      %cst_16 = arith.constant dense<0.000000e+00> : vector<2x100xf32>
      %17 = tpu.matmul %15, %16, %cst_16 {dimension_numbers = #tpu.dot_dimension_numbers<[1], [0], [0], [1], [0, 0, 1, 1], [], []>} : vector<2x100xf32>, vector<100x100xf32>, vector<2x100xf32> -> vector<2x100xf32>
      %c0_17 = arith.constant 0 : index
      %c0_18 = arith.constant 0 : index
      %18 = vector.load %arg4[%c0_17, %c0_18] : memref<1x100xf32, #tpu.memory_space<vmem>>, vector<1x100xf32>
      %19 = vector.broadcast %18 : vector<1x100xf32> to vector<2x100xf32>
      %20 = arith.addf %17, %19 : vector<2x100xf32>
      %21 = arith.truncf %20 : vector<2x100xf32> to vector<2x100xbf16>
      %c0_19 = arith.constant 0 : index
      %c0_20 = arith.constant 0 : index
      %22 = vector.load %arg9[%c0_19, %c0_20] : memref<2x100xbf16, #tpu.memory_space<vmem>>, vector<2x100xbf16>
      tpu.vector_store %arg9[%c0_19, %c0_20], %21 {strides = array<i32>} : memref<2x100xbf16, #tpu.memory_space<vmem>>, vector<2x100xbf16>,
      %c0_i32_21 = arith.constant 0 : i32
      %23 = arith.cmpi eq, %arg0, %c0_i32_21 : i32
      %c0_22 = arith.constant 0 : index
      %c0_23 = arith.constant 0 : index
      %24 = vector.load %arg5[%c0_22, %c0_23] : memref<1x10xf32, #tpu.memory_space<vmem>>, vector<1x10xf32>
      %25 = vector.shape_cast %24 : vector<1x10xf32> to vector<1x10xf32>
      %26 = vector.broadcast %25 : vector<1x10xf32> to vector<2x10xf32>
      %cst_24 = arith.constant 0.000000e+00 : f32
      %27 = vector.broadcast %cst_24 : f32 to vector<2x10xf32>
      %28 = arith.select %23, %26, %27 : vector<2x10xf32>
      %c0_25 = arith.constant 0 : index
      %c0_26 = arith.constant 0 : index
      %29 = vector.load %arg10[%c0_25, %c0_26] : memref<2x10xf32, #tpu.memory_space<vmem>>, vector<2x10xf32>
      tpu.vector_store %arg10[%c0_25, %c0_26], %28 {strides = array<i32>} : memref<2x10xf32, #tpu.memory_space<vmem>>, vector<2x10xf32>,
    } else {
    }
    %c0 = arith.constant 0 : index
    %c0_1 = arith.constant 0 : index
    %3 = vector.load %arg9[%c0, %c0_1] : memref<2x100xbf16, #tpu.memory_space<vmem>>, vector<2x100xbf16>
    %c0_2 = arith.constant 0 : index
    %c0_3 = arith.constant 0 : index
    %4 = vector.load %arg6[%c0_2, %c0_3] : memref<100x6400xbf16, #tpu.memory_space<vmem>>, vector<100x6400xbf16>
    %cst = arith.constant dense<0.000000e+00> : vector<2x6400xf32>
    %5 = tpu.matmul %3, %4, %cst {dimension_numbers = #tpu.dot_dimension_numbers<[1], [0], [0], [1], [0, 0, 1, 1], [], []>} : vector<2x100xbf16>, vector<100x6400xbf16>, vector<2x6400xf32> -> vector<2x6400xf32>
    %c0_4 = arith.constant 0 : index
    %c0_5 = arith.constant 0 : index
    %6 = vector.load %arg10[%c0_4, %c0_5] : memref<2x10xf32, #tpu.memory_space<vmem>>, vector<2x10xf32>
    %7 = arith.truncf %5 : vector<2x6400xf32> to vector<2x6400xbf16>
    %c0_6 = arith.constant 0 : index
    %c0_7 = arith.constant 0 : index
    %8 = vector.load %arg7[%c0_6, %c0_7] : memref<6400x10xbf16, #tpu.memory_space<vmem>>, vector<6400x10xbf16>
    %cst_8 = arith.constant dense<0.000000e+00> : vector<2x10xf32>
    %9 = tpu.matmul %7, %8, %cst_8 {dimension_numbers = #tpu.dot_dimension_numbers<[1], [0], [0], [1], [0, 0, 1, 1], [], []>} : vector<2x6400xbf16>, vector<6400x10xbf16>, vector<2x10xf32> -> vector<2x10xf32>
    %10 = arith.addf %6, %9 : vector<2x10xf32>
    %c0_9 = arith.constant 0 : index
    %c0_10 = arith.constant 0 : index
    %11 = vector.load %arg10[%c0_9, %c0_10] : memref<2x10xf32, #tpu.memory_space<vmem>>, vector<2x10xf32>
    tpu.vector_store %arg10[%c0_9, %c0_10], %10 {strides = array<i32>} : memref<2x10xf32, #tpu.memory_space<vmem>>, vector<2x10xf32>,
    %c1_i32 = arith.constant 1 : i32
    %12 = arith.cmpi eq, %arg1, %c1_i32 : i32
    %13 = arith.extui %12 : i1 to i32
    %c0_i32_11 = arith.constant 0 : i32
    %14 = arith.cmpi ne, %13, %c0_i32_11 : i32
    scf.if %14 {
      %c0_12 = arith.constant 0 : index
      %c0_13 = arith.constant 0 : index
      %15 = vector.load %arg10[%c0_12, %c0_13] : memref<2x10xf32, #tpu.memory_space<vmem>>, vector<2x10xf32>
      %16 = vector.shape_cast %15 : vector<2x10xf32> to vector<1x2x10xf32>
      %c0_14 = arith.constant 0 : index
      %c0_15 = arith.constant 0 : index
      %c0_16 = arith.constant 0 : index
      %17 = vector.load %arg8[%c0_14, %c0_15, %c0_16] : memref<1x2x10xf32, #tpu.memory_space<vmem>>, vector<1x2x10xf32>
      tpu.vector_store %arg8[%c0_14, %c0_15, %c0_16], %16 {strides = array<i32>} : memref<1x2x10xf32, #tpu.memory_space<vmem>>, vector<1x2x10xf32>,
    } else {
    }
    return
  }
  func.func @transform_0(%arg0: i32, %arg1: i32) -> (i32, i32) {
    %c0_i32 = arith.constant 0 : i32
    %c0_i32_0 = arith.constant 0 : i32
    %c0_i32_1 = arith.constant 0 : i32
    return %c0_i32, %c0_i32_0 : i32, i32
  }
  func.func @transform_1(%arg0: i32, %arg1: i32) -> (i32, i32) {
    %c0_i32 = arith.constant 0 : i32
    %c0_i32_0 = arith.constant 0 : i32
    %c0_i32_1 = arith.constant 0 : i32
    return %c0_i32, %c0_i32_0 : i32, i32
  }
  func.func @transform_2(%arg0: i32, %arg1: i32) -> (i32, i32) {
    %c0_i32 = arith.constant 0 : i32
    %c0_i32_0 = arith.constant 0 : i32
    %c0_i32_1 = arith.constant 0 : i32
    return %c0_i32, %c0_i32_0 : i32, i32
  }
  func.func @transform_3(%arg0: i32, %arg1: i32) -> (i32, i32) {
    %c0_i32 = arith.constant 0 : i32
    %c0_i32_0 = arith.constant 0 : i32
    %c0_i32_1 = arith.constant 0 : i32
    return %c0_i32, %c0_i32_0 : i32, i32
  }
  func.func @transform_4(%arg0: i32, %arg1: i32) -> (i32, i32) {
    %c2_i32 = arith.constant 2 : i32
    %0 = arith.muli %arg0, %c2_i32 : i32
    %1 = arith.addi %0, %arg1 : i32
    %c0_i32 = arith.constant 0 : i32
    %c0_i32_0 = arith.constant 0 : i32
    return %c0_i32, %1 : i32, i32
  }
  func.func @transform_5(%arg0: i32, %arg1: i32) -> (i32, i32) {
    %c2_i32 = arith.constant 2 : i32
    %0 = arith.muli %arg0, %c2_i32 : i32
    %1 = arith.addi %0, %arg1 : i32
    %c0_i32 = arith.constant 0 : i32
    %c0_i32_0 = arith.constant 0 : i32
    return %1, %c0_i32 : i32, i32
  }
  func.func @transform_6(%arg0: i32, %arg1: i32) -> (i32, i32, i32) {
    %c0_i32 = arith.constant 0 : i32
    %c0_i32_0 = arith.constant 0 : i32
    %c0_i32_1 = arith.constant 0 : i32
    return %arg0, %c0_i32, %c0_i32_0 : i32, i32, i32
  }
}

</mosaic_0001>

<bundles_post_ra>
// kernel: parallel_net_forward.1
= control target key start
LH: loop header
LB: loop body
LE: loop exit
PB: predicated region body
PF: predicated region fallthrough
CT: control target
= control target key end

     0   :  { %s11067_s21 = smov 0   ;;  %s11069_s22 = smov 0   ;;  %s12942_s0 = inlined_call_operand.vmem [shape: f32[2,100], index: 0, kind: input, shape index: {}]   ;;  %s12943_s1 = inlined_call_operand.vmem [shape: f32[100,100], index: 1, kind: input, shape index: {}]   ;;  %s12944_s2 = inlined_call_operand.vmem [shape: f32[1,100], index: 2, kind: input, shape index: {}]   ;;  %s12945_s3 = inlined_call_operand.vmem [shape: f32[1,10], index: 3, kind: input, shape index: {}]   ;;  %s12946_s4 = inlined_call_operand.vmem [shape: bf16[100,25600], index: 4, kind: input, shape index: {}]   ;;  %s12947_s5 = inlined_call_operand.vmem [shape: bf16[25600,10], index: 5, kind: input, shape index: {}]   ;;  %s12948_s6 = inlined_call_operand.vmem [shape: f32[2,2,10], index: 6, kind: output, shape index: {}]  }
   0x1   :  { %s11071_s23 = smov 0   ;;  %s11073_s24 = smov 0  }
   0x2   :  { %s11075_s25 = smov 0   ;;  %s11077_s26 = smov 0  }
   0x3   :  { %s11079_s27 = smov 0  }
   0x4 LB: > { %s25_s28 = sadd.s32 1, %s11018_s25  ;;  %s28_s29 = sadd.s32 1, %s11022_s26  ;;  %s11026_s27 = sphi %s11079_s27, %s16_s27   ;;  %s11022_s26 = sphi %s11077_s26, %s12954_s26   ;;  %s11018_s25 = sphi %s11075_s25, %s12953_s25   ;;  %s11014_s24 = sphi %s11073_s24, %s12952_s24   ;;  %s11010_s23 = sphi %s11071_s23, %s12951_s23   ;;  %s11006_s22 = sphi %s11069_s22, %s12950_s22   ;;  %s11002_s21 = sphi %s11067_s21, %s12949_s21  }
   0x5   : > { %p26_p0 = scmp.ge.s32.totalorder %s25_s28, 2  ;;  %p130_p1 = scmp.ne.s32.totalorder %s11006_s22, %s11002_s21 }
   0x6   : > { %p131_p2 = scmp.eq.s32.totalorder %s11026_s27, 0  ;;  %s8573_s30 = sshll.u32 %s11022_s26, 1 }
   0x7   : > { %s12956_s28 = smov (%p26_p0, %s25_s28), 0  ;;  %s12958_s29 = smov (!%p26_p0, %s28_s29), %s11022_s26 }
   0x8   : > { %p30_p3 = scmp.ge.s32.totalorder %s12958_s29, 2  ;;  %p132_p4 = por %p131_p2, %p130_p1 }
   0x9   : > { %s117_s7 = sadd.s32 %s11018_s25, %s8573_s30  ;;  %s123_s11 = sadd.s32 1, %s11006_s22 }
   0xa   : > { %s12960_s29 = smov (%p30_p3, %s12958_s29), 0  ;;  %p8578_p6 = scmp.ge.s32.totalorder %s11026_s27, 4 }
   0xb   : > { %s8574_s8 = sshll.u32 %s12960_s29, 1 }
   0xc   : > { %s119_s9 = sadd.s32 %s8574_s8, %s12956_s28  ;;  %224 = sbr.rel (%p8578_p6) target bundleno = 187 (0xbb), region = 32 }
   0xd   : > { %s120_s10 = ssub.s32 %s117_s7, %s119_s9 }
   0xe   : > { %p121_p5 = scmp.eq.s32.totalorder %s120_s10, 0 }
  0x10   : > { %s11118_s12 = scalar_select %p121_p5, %s11006_s22, %s123_s11  }
  0x13   : > { %227 = sbr.rel (!%p132_p4) target bundleno = 187 (0xbb), region = 36  ;;  %s229_s13 = sand.u32 (%p132_p4), 1, %s11006_s22  }
  0x14   : > { %s9393_s14 = smul.u32 (%p132_p4), 200, %s117_s7 }
  0x15   : > { %s10005_s15 = smul.u32 (%p132_p4), 2600, %s229_s13 }
  0x16   : > { %s11125_s18 = scalar_lea.vmem (%p132_p4), %s12946_s4, %s9393_s14 }
  0x17   : > { %v249_v0 = vld [vmem:[%s11125_s18] sm:$0xff] (%p132_p4)  ;;  %v251_v1 = vld [vmem:[%s11125_s18 + $0x8] sm:$0xff] (%p132_p4)  ;;  %v253_v2 = vld [vmem:[%s11125_s18 + $0x10] sm:$0xff] (%p132_p4)  ;;  %s11130_s19 = scalar_lea.vmem (%p132_p4), [#allocation4], %s10005_s15 }
  0x18   : > { %250 = vst [vmem:[%s11130_s19] sm:$0xff] (%p132_p4), %v249_v0  ;;  %252 = vst [vmem:[%s11130_s19 + $0x8] sm:$0xff] (%p132_p4), %v251_v1  ;;  %v255_v3 = vld [vmem:[%s11125_s18 + $0x18] sm:$0xff] (%p132_p4)  ;;  %v257_v4 = vld [vmem:[%s11125_s18 + $0x20] sm:$0xff] (%p132_p4) }
  0x19   : > { %254 = vst [vmem:[%s11130_s19 + $0x10] sm:$0xff] (%p132_p4), %v253_v2  ;;  %v259_v5 = vld [vmem:[%s11125_s18 + $0x28] sm:$0xff] (%p132_p4)  ;;  %256 = vst [vmem:[%s11130_s19 + $0x18] sm:$0xff] (%p132_p4), %v255_v3  ;;  %v261_v6 = vld [vmem:[%s11125_s18 + $0x30] sm:$0xff] (%p132_p4) }
  0x1a   : > { %258 = vst [vmem:[%s11130_s19 + $0x20] sm:$0xff] %v257_v4  ;;  %260 = vst [vmem:[%s11130_s19 + $0x28] sm:$0xff] %v259_v5  ;;  %v263_v7 = vld [vmem:[%s11125_s18 + $0x38] sm:$0xff]  ;;  %v265_v8 = vld [vmem:[%s11125_s18 + $0x40] sm:$0xff] }
  0x1b   : > { %262 = vst [vmem:[%s11130_s19 + $0x30] sm:$0xff] %v261_v6  ;;  %264 = vst [vmem:[%s11130_s19 + $0x38] sm:$0xff] %v263_v7  ;;  %v267_v9 = vld [vmem:[%s11125_s18 + $0x48] sm:$0xff]  ;;  %v269_v10 = vld [vmem:[%s11125_s18 + $0x50] sm:$0xff] }
  0x1c   : > { %266 = vst [vmem:[%s11130_s19 + $0x40] sm:$0xff] %v265_v8  ;;  %v271_v11 = vld [vmem:[%s11125_s18 + $0x58] sm:$0xff]  ;;  %268 = vst [vmem:[%s11130_s19 + $0x48] sm:$0xff] %v267_v9  ;;  %v273_v12 = vld [vmem:[%s11125_s18 + $0x60] sm:$0xff] }
  0x1d   : > { %270 = vst [vmem:[%s11130_s19 + $0x50] sm:$0xff] %v269_v10  ;;  %272 = vst [vmem:[%s11130_s19 + $0x58] sm:$0xff] %v271_v11  ;;  %v275_v13 = vld [vmem:[%s11125_s18 + $0x68] sm:$0xff]  ;;  %v277_v14 = vld [vmem:[%s11125_s18 + $0x70] sm:$0xff] }
  0x1e   : > { %274 = vst [vmem:[%s11130_s19 + $0x60] sm:$0xff] %v273_v12  ;;  %276 = vst [vmem:[%s11130_s19 + $0x68] sm:$0xff] %v275_v13  ;;  %v279_v15 = vld [vmem:[%s11125_s18 + $0x78] sm:$0xff]  ;;  %v281_v16 = vld [vmem:[%s11125_s18 + $0x80] sm:$0xff] }
  0x1f   : > { %278 = vst [vmem:[%s11130_s19 + $0x70] sm:$0xff] %v277_v14  ;;  %v283_v17 = vld [vmem:[%s11125_s18 + $0x88] sm:$0xff]  ;;  %280 = vst [vmem:[%s11130_s19 + $0x78] sm:$0xff] %v279_v15  ;;  %v285_v18 = vld [vmem:[%s11125_s18 + $0x90] sm:$0xff] }
  0x20   : > { %282 = vst [vmem:[%s11130_s19 + $0x80] sm:$0xff] %v281_v16  ;;  %284 = vst [vmem:[%s11130_s19 + $0x88] sm:$0xff] %v283_v17  ;;  %v287_v19 = vld [vmem:[%s11125_s18 + $0x98] sm:$0xff]  ;;  %v289_v20 = vld [vmem:[%s11125_s18 + $0xa0] sm:$0xff] }
  0x21   : > { %286 = vst [vmem:[%s11130_s19 + $0x90] sm:$0xff] %v285_v18  ;;  %288 = vst [vmem:[%s11130_s19 + $0x98] sm:$0xff] %v287_v19  ;;  %v291_v21 = vld [vmem:[%s11125_s18 + $0xa8] sm:$0xff]  ;;  %v293_v22 = vld [vmem:[%s11125_s18 + $0xb0] sm:$0xff] }
  0x22   : > { %290 = vst [vmem:[%s11130_s19 + $0xa0] sm:$0xff] %v289_v20  ;;  %v295_v23 = vld [vmem:[%s11125_s18 + $0xb8] sm:$0xff]  ;;  %292 = vst [vmem:[%s11130_s19 + $0xa8] sm:$0xff] %v291_v21  ;;  %v297_v24 = vld [vmem:[%s11125_s18 + $0xc0] sm:$0xff] }
  0x23   : > { %294 = vst [vmem:[%s11130_s19 + $0xb0] sm:$0xff] %v293_v22  ;;  %296 = vst [vmem:[%s11130_s19 + $0xb8] sm:$0xff] %v295_v23  ;;  %v299_v25 = vld [vmem:[%s11125_s18 + $0x320] sm:$0xff]  ;;  %v301_v26 = vld [vmem:[%s11125_s18 + $0x328] sm:$0xff] }
  0x24   : > { %298 = vst [vmem:[%s11130_s19 + $0xc0] sm:$0xff] %v297_v24  ;;  %300 = vst [vmem:[%s11130_s19 + $0xc8] sm:$0xff] %v299_v25  ;;  %v303_v27 = vld [vmem:[%s11125_s18 + $0x330] sm:$0xff]  ;;  %v305_v28 = vld [vmem:[%s11125_s18 + $0x338] sm:$0xff] }
  0x25   : > { %302 = vst [vmem:[%s11130_s19 + $0xd0] sm:$0xff] %v301_v26  ;;  %v307_v29 = vld [vmem:[%s11125_s18 + $0x340] sm:$0xff]  ;;  %304 = vst [vmem:[%s11130_s19 + $0xd8] sm:$0xff] %v303_v27  ;;  %v309_v30 = vld [vmem:[%s11125_s18 + $0x348] sm:$0xff] }
  0x26   : > { %306 = vst [vmem:[%s11130_s19 + $0xe0] sm:$0xff] %v305_v28  ;;  %308 = vst [vmem:[%s11130_s19 + $0xe8] sm:$0xff] %v307_v29  ;;  %v311_v31 = vld [vmem:[%s11125_s18 + $0x350] sm:$0xff]  ;;  %v313_v32 = vld [vmem:[%s11125_s18 + $0x358] sm:$0xff] }
  0x27   : > { %310 = vst [vmem:[%s11130_s19 + $0xf0] sm:$0xff] %v309_v30  ;;  %312 = vst [vmem:[%s11130_s19 + $0xf8] sm:$0xff] %v311_v31  ;;  %v315_v33 = vld [vmem:[%s11125_s18 + $0x360] sm:$0xff]  ;;  %v317_v34 = vld [vmem:[%s11125_s18 + $0x368] sm:$0xff] }
  0x28   : > { %314 = vst [vmem:[%s11130_s19 + $0x100] sm:$0xff] %v313_v32  ;;  %v319_v35 = vld [vmem:[%s11125_s18 + $0x370] sm:$0xff]  ;;  %316 = vst [vmem:[%s11130_s19 + $0x108] sm:$0xff] %v315_v33  ;;  %v321_v36 = vld [vmem:[%s11125_s18 + $0x378] sm:$0xff] }
  0x29   : > { %318 = vst [vmem:[%s11130_s19 + $0x110] sm:$0xff] %v317_v34  ;;  %320 = vst [vmem:[%s11130_s19 + $0x118] sm:$0xff] %v319_v35  ;;  %v323_v37 = vld [vmem:[%s11125_s18 + $0x380] sm:$0xff]  ;;  %v325_v38 = vld [vmem:[%s11125_s18 + $0x388] sm:$0xff] }
  0x2a   : > { %322 = vst [vmem:[%s11130_s19 + $0x120] sm:$0xff] %v321_v36  ;;  %324 = vst [vmem:[%s11130_s19 + $0x128] sm:$0xff] %v323_v37  ;;  %v327_v39 = vld [vmem:[%s11125_s18 + $0x390] sm:$0xff]  ;;  %v329_v40 = vld [vmem:[%s11125_s18 + $0x398] sm:$0xff] }
  0x2b   : > { %326 = vst [vmem:[%s11130_s19 + $0x130] sm:$0xff] %v325_v38  ;;  %v331_v41 = vld [vmem:[%s11125_s18 + $0x3a0] sm:$0xff]  ;;  %328 = vst [vmem:[%s11130_s19 + $0x138] sm:$0xff] %v327_v39  ;;  %v333_v42 = vld [vmem:[%s11125_s18 + $0x3a8] sm:$0xff] }
  0x2c   : > { %330 = vst [vmem:[%s11130_s19 + $0x140] sm:$0xff] %v329_v40  ;;  %332 = vst [vmem:[%s11130_s19 + $0x148] sm:$0xff] %v331_v41  ;;  %v335_v43 = vld [vmem:[%s11125_s18 + $0x3b0] sm:$0xff]  ;;  %v337_v44 = vld [vmem:[%s11125_s18 + $0x3b8] sm:$0xff] }
  0x2d   : > { %334 = vst [vmem:[%s11130_s19 + $0x150] sm:$0xff] %v333_v42  ;;  %336 = vst [vmem:[%s11130_s19 + $0x158] sm:$0xff] %v335_v43  ;;  %v339_v45 = vld [vmem:[%s11125_s18 + $0x3c0] sm:$0xff]  ;;  %v341_v46 = vld [vmem:[%s11125_s18 + $0x3c8] sm:$0xff] }
  0x2e   : > { %338 = vst [vmem:[%s11130_s19 + $0x160] sm:$0xff] %v337_v44  ;;  %v343_v47 = vld [vmem:[%s11125_s18 + $0x3d0] sm:$0xff]  ;;  %340 = vst [vmem:[%s11130_s19 + $0x168] sm:$0xff] %v339_v45  ;;  %v345_v48 = vld [vmem:[%s11125_s18 + $0x3d8] sm:$0xff] }
  0x2f   : > { %342 = vst [vmem:[%s11130_s19 + $0x170] sm:$0xff] %v341_v46  ;;  %344 = vst [vmem:[%s11130_s19 + $0x178] sm:$0xff] %v343_v47  ;;  %v347_v49 = vld [vmem:[%s11125_s18 + $0x3e0] sm:$0xff]  ;;  %v351_v51 = vld [vmem:[%s11125_s18 + $0x648] sm:$0xff] }
  0x30   : > { %v349_v50 = vld [vmem:[%s11125_s18 + $0x640] sm:$0xff]  ;;  %346 = vst [vmem:[%s11130_s19 + $0x180] sm:$0xff] %v345_v48  ;;  %348 = vst [vmem:[%s11130_s19 + $0x188] sm:$0xff] %v347_v49  ;;  %v353_v52 = vld [vmem:[%s11125_s18 + $0x650] sm:$0xff] }
  0x31   : > { %350 = vst [vmem:[%s11130_s19 + $0x190] sm:$0xff] %v349_v50  ;;  %v355_v53 = vld [vmem:[%s11125_s18 + $0x658] sm:$0xff]  ;;  %352 = vst [vmem:[%s11130_s19 + $0x198] sm:$0xff] %v351_v51  ;;  %v357_v54 = vld [vmem:[%s11125_s18 + $0x660] sm:$0xff] }
  0x32   : > { %354 = vst [vmem:[%s11130_s19 + $0x1a0] sm:$0xff] %v353_v52  ;;  %356 = vst [vmem:[%s11130_s19 + $0x1a8] sm:$0xff] %v355_v53  ;;  %v359_v55 = vld [vmem:[%s11125_s18 + $0x668] sm:$0xff]  ;;  %v361_v56 = vld [vmem:[%s11125_s18 + $0x670] sm:$0xff] }
  0x33   : > { %358 = vst [vmem:[%s11130_s19 + $0x1b0] sm:$0xff] %v357_v54  ;;  %360 = vst [vmem:[%s11130_s19 + $0x1b8] sm:$0xff] %v359_v55  ;;  %v363_v57 = vld [vmem:[%s11125_s18 + $0x678] sm:$0xff]  ;;  %v365_v58 = vld [vmem:[%s11125_s18 + $0x680] sm:$0xff] }
  0x34   : > { %362 = vst [vmem:[%s11130_s19 + $0x1c0] sm:$0xff] %v361_v56  ;;  %v367_v59 = vld [vmem:[%s11125_s18 + $0x688] sm:$0xff]  ;;  %364 = vst [vmem:[%s11130_s19 + $0x1c8] sm:$0xff] %v363_v57  ;;  %v369_v60 = vld [vmem:[%s11125_s18 + $0x690] sm:$0xff] }
  0x35   : > { %366 = vst [vmem:[%s11130_s19 + $0x1d0] sm:$0xff] %v365_v58  ;;  %368 = vst [vmem:[%s11130_s19 + $0x1d8] sm:$0xff] %v367_v59  ;;  %v371_v61 = vld [vmem:[%s11125_s18 + $0x698] sm:$0xff]  ;;  %v373_v62 = vld [vmem:[%s11125_s18 + $0x6a0] sm:$0xff] }
  0x36   : > { %370 = vst [vmem:[%s11130_s19 + $0x1e0] sm:$0xff] %v369_v60  ;;  %372 = vst [vmem:[%s11130_s19 + $0x1e8] sm:$0xff] %v371_v61  ;;  %v375_v63 = vld [vmem:[%s11125_s18 + $0x6a8] sm:$0xff]  ;;  %v377_v0 = vld [vmem:[%s11125_s18 + $0x6b0] sm:$0xff] }
  0x37   : > { %374 = vst [vmem:[%s11130_s19 + $0x1f0] sm:$0xff] %v373_v62  ;;  %v379_v1 = vld [vmem:[%s11125_s18 + $0x6b8] sm:$0xff]  ;;  %376 = vst [vmem:[%s11130_s19 + $0x1f8] sm:$0xff] %v375_v63  ;;  %v381_v2 = vld [vmem:[%s11125_s18 + $0x6c0] sm:$0xff] }
  0x38   : > { %378 = vst [vmem:[%s11130_s19 + $0x200] sm:$0xff] %v377_v0  ;;  %380 = vst [vmem:[%s11130_s19 + $0x208] sm:$0xff] %v379_v1  ;;  %v383_v3 = vld [vmem:[%s11125_s18 + $0x6c8] sm:$0xff]  ;;  %v385_v4 = vld [vmem:[%s11125_s18 + $0x6d0] sm:$0xff] }
  0x39   : > { %382 = vst [vmem:[%s11130_s19 + $0x210] sm:$0xff] %v381_v2  ;;  %384 = vst [vmem:[%s11130_s19 + $0x218] sm:$0xff] %v383_v3  ;;  %v387_v5 = vld [vmem:[%s11125_s18 + $0x6d8] sm:$0xff]  ;;  %v389_v6 = vld [vmem:[%s11125_s18 + $0x6e0] sm:$0xff] }
  0x3a   : > { %386 = vst [vmem:[%s11130_s19 + $0x220] sm:$0xff] %v385_v4  ;;  %v391_v7 = vld [vmem:[%s11125_s18 + $0x6e8] sm:$0xff]  ;;  %388 = vst [vmem:[%s11130_s19 + $0x228] sm:$0xff] %v387_v5  ;;  %v393_v8 = vld [vmem:[%s11125_s18 + $0x6f0] sm:$0xff] }
  0x3b   : > { %390 = vst [vmem:[%s11130_s19 + $0x230] sm:$0xff] %v389_v6  ;;  %392 = vst [vmem:[%s11130_s19 + $0x238] sm:$0xff] %v391_v7  ;;  %v395_v9 = vld [vmem:[%s11125_s18 + $0x6f8] sm:$0xff]  ;;  %v397_v10 = vld [vmem:[%s11125_s18 + $0x700] sm:$0xff] }
  0x3c   : > { %394 = vst [vmem:[%s11130_s19 + $0x240] sm:$0xff] %v393_v8  ;;  %396 = vst [vmem:[%s11130_s19 + $0x248] sm:$0xff] %v395_v9  ;;  %v399_v11 = vld [vmem:[%s11125_s18 + $0x960] sm:$0xff]  ;;  %v401_v12 = vld [vmem:[%s11125_s18 + $0x968] sm:$0xff] }
  0x3d   : > { %398 = vst [vmem:[%s11130_s19 + $0x250] sm:$0xff] %v397_v10  ;;  %v403_v13 = vld [vmem:[%s11125_s18 + $0x970] sm:$0xff]  ;;  %400 = vst [vmem:[%s11130_s19 + $0x258] sm:$0xff] %v399_v11  ;;  %v405_v14 = vld [vmem:[%s11125_s18 + $0x978] sm:$0xff] }
  0x3e   : > { %402 = vst [vmem:[%s11130_s19 + $0x260] sm:$0xff] %v401_v12  ;;  %404 = vst [vmem:[%s11130_s19 + $0x268] sm:$0xff] %v403_v13  ;;  %v407_v15 = vld [vmem:[%s11125_s18 + $0x980] sm:$0xff]  ;;  %v409_v16 = vld [vmem:[%s11125_s18 + $0x988] sm:$0xff] }
  0x3f   : > { %406 = vst [vmem:[%s11130_s19 + $0x270] sm:$0xff] %v405_v14  ;;  %408 = vst [vmem:[%s11130_s19 + $0x278] sm:$0xff] %v407_v15  ;;  %v411_v17 = vld [vmem:[%s11125_s18 + $0x990] sm:$0xff]  ;;  %v413_v18 = vld [vmem:[%s11125_s18 + $0x998] sm:$0xff] }
  0x40   : > { %410 = vst [vmem:[%s11130_s19 + $0x280] sm:$0xff] %v409_v16  ;;  %v415_v19 = vld [vmem:[%s11125_s18 + $0x9a0] sm:$0xff]  ;;  %412 = vst [vmem:[%s11130_s19 + $0x288] sm:$0xff] %v411_v17  ;;  %v417_v20 = vld [vmem:[%s11125_s18 + $0x9a8] sm:$0xff] }
  0x41   : > { %414 = vst [vmem:[%s11130_s19 + $0x290] sm:$0xff] %v413_v18  ;;  %416 = vst [vmem:[%s11130_s19 + $0x298] sm:$0xff] %v415_v19  ;;  %v419_v21 = vld [vmem:[%s11125_s18 + $0x9b0] sm:$0xff]  ;;  %v421_v22 = vld [vmem:[%s11125_s18 + $0x9b8] sm:$0xff] }
  0x42   : > { %418 = vst [vmem:[%s11130_s19 + $0x2a0] sm:$0xff] %v417_v20  ;;  %420 = vst [vmem:[%s11130_s19 + $0x2a8] sm:$0xff] %v419_v21  ;;  %v423_v23 = vld [vmem:[%s11125_s18 + $0x9c0] sm:$0xff]  ;;  %v425_v24 = vld [vmem:[%s11125_s18 + $0x9c8] sm:$0xff] }
  0x43   : > { %422 = vst [vmem:[%s11130_s19 + $0x2b0] sm:$0xff] %v421_v22  ;;  %v427_v25 = vld [vmem:[%s11125_s18 + $0x9d0] sm:$0xff]  ;;  %424 = vst [vmem:[%s11130_s19 + $0x2b8] sm:$0xff] %v423_v23  ;;  %v429_v26 = vld [vmem:[%s11125_s18 + $0x9d8] sm:$0xff] }
  0x44   : > { %426 = vst [vmem:[%s11130_s19 + $0x2c0] sm:$0xff] %v425_v24  ;;  %428 = vst [vmem:[%s11130_s19 + $0x2c8] sm:$0xff] %v427_v25  ;;  %v431_v27 = vld [vmem:[%s11125_s18 + $0x9e0] sm:$0xff]  ;;  %v433_v28 = vld [vmem:[%s11125_s18 + $0x9e8] sm:$0xff] }
  0x45   : > { %430 = vst [vmem:[%s11130_s19 + $0x2d0] sm:$0xff] %v429_v26  ;;  %432 = vst [vmem:[%s11130_s19 + $0x2d8] sm:$0xff] %v431_v27  ;;  %v435_v29 = vld [vmem:[%s11125_s18 + $0x9f0] sm:$0xff]  ;;  %v437_v30 = vld [vmem:[%s11125_s18 + $0x9f8] sm:$0xff] }
  0x46   : > { %434 = vst [vmem:[%s11130_s19 + $0x2e0] sm:$0xff] %v433_v28  ;;  %v439_v31 = vld [vmem:[%s11125_s18 + $0xa00] sm:$0xff]  ;;  %436 = vst [vmem:[%s11130_s19 + $0x2e8] sm:$0xff] %v435_v29  ;;  %v441_v32 = vld [vmem:[%s11125_s18 + $0xa08] sm:$0xff] }
  0x47   : > { %438 = vst [vmem:[%s11130_s19 + $0x2f0] sm:$0xff] %v437_v30  ;;  %440 = vst [vmem:[%s11130_s19 + $0x2f8] sm:$0xff] %v439_v31  ;;  %v443_v33 = vld [vmem:[%s11125_s18 + $0xa10] sm:$0xff]  ;;  %v445_v34 = vld [vmem:[%s11125_s18 + $0xa18] sm:$0xff] }
  0x48   : > { %442 = vst [vmem:[%s11130_s19 + $0x300] sm:$0xff] %v441_v32  ;;  %444 = vst [vmem:[%s11130_s19 + $0x308] sm:$0xff] %v443_v33  ;;  %v447_v35 = vld [vmem:[%s11125_s18 + $0xa20] sm:$0xff]  ;;  %v451_v37 = vld [vmem:[%s11125_s18 + $0xc88] sm:$0xff] }
  0x49   : > { %446 = vst [vmem:[%s11130_s19 + $0x310] sm:$0xff] %v445_v34  ;;  %v449_v36 = vld [vmem:[%s11125_s18 + $0xc80] sm:$0xff]  ;;  %448 = vst [vmem:[%s11130_s19 + $0x318] sm:$0xff] %v447_v35  ;;  %v453_v38 = vld [vmem:[%s11125_s18 + $0xc90] sm:$0xff] }
  0x4a   : > { %450 = vst [vmem:[%s11130_s19 + $0x320] sm:$0xff] %v449_v36  ;;  %452 = vst [vmem:[%s11130_s19 + $0x328] sm:$0xff] %v451_v37  ;;  %v455_v39 = vld [vmem:[%s11125_s18 + $0xc98] sm:$0xff]  ;;  %v457_v40 = vld [vmem:[%s11125_s18 + $0xca0] sm:$0xff] }
  0x4b   : > { %454 = vst [vmem:[%s11130_s19 + $0x330] sm:$0xff] %v453_v38  ;;  %456 = vst [vmem:[%s11130_s19 + $0x338] sm:$0xff] %v455_v39  ;;  %v459_v41 = vld [vmem:[%s11125_s18 + $0xca8] sm:$0xff]  ;;  %v461_v42 = vld [vmem:[%s11125_s18 + $0xcb0] sm:$0xff] }
  0x4c   : > { %458 = vst [vmem:[%s11130_s19 + $0x340] sm:$0xff] %v457_v40  ;;  %v463_v43 = vld [vmem:[%s11125_s18 + $0xcb8] sm:$0xff]  ;;  %460 = vst [vmem:[%s11130_s19 + $0x348] sm:$0xff] %v459_v41  ;;  %v465_v44 = vld [vmem:[%s11125_s18 + $0xcc0] sm:$0xff] }
  0x4d   : > { %462 = vst [vmem:[%s11130_s19 + $0x350] sm:$0xff] %v461_v42  ;;  %464 = vst [vmem:[%s11130_s19 + $0x358] sm:$0xff] %v463_v43  ;;  %v467_v45 = vld [vmem:[%s11125_s18 + $0xcc8] sm:$0xff]  ;;  %v469_v46 = vld [vmem:[%s11125_s18 + $0xcd0] sm:$0xff] }
  0x4e   : > { %466 = vst [vmem:[%s11130_s19 + $0x360] sm:$0xff] %v465_v44  ;;  %468 = vst [vmem:[%s11130_s19 + $0x368] sm:$0xff] %v467_v45  ;;  %v471_v47 = vld [vmem:[%s11125_s18 + $0xcd8] sm:$0xff]  ;;  %v473_v48 = vld [vmem:[%s11125_s18 + $0xce0] sm:$0xff] }
  0x4f   : > { %470 = vst [vmem:[%s11130_s19 + $0x370] sm:$0xff] %v469_v46  ;;  %v475_v49 = vld [vmem:[%s11125_s18 + $0xce8] sm:$0xff]  ;;  %472 = vst [vmem:[%s11130_s19 + $0x378] sm:$0xff] %v471_v47  ;;  %v477_v50 = vld [vmem:[%s11125_s18 + $0xcf0] sm:$0xff] }
  0x50   : > { %474 = vst [vmem:[%s11130_s19 + $0x380] sm:$0xff] %v473_v48  ;;  %476 = vst [vmem:[%s11130_s19 + $0x388] sm:$0xff] %v475_v49  ;;  %v479_v51 = vld [vmem:[%s11125_s18 + $0xcf8] sm:$0xff]  ;;  %v481_v52 = vld [vmem:[%s11125_s18 + $0xd00] sm:$0xff] }
  0x51   : > { %478 = vst [vmem:[%s11130_s19 + $0x390] sm:$0xff] %v477_v50  ;;  %480 = vst [vmem:[%s11130_s19 + $0x398] sm:$0xff] %v479_v51  ;;  %v483_v53 = vld [vmem:[%s11125_s18 + $0xd08] sm:$0xff]  ;;  %v485_v54 = vld [vmem:[%s11125_s18 + $0xd10] sm:$0xff] }
  0x52   : > { %482 = vst [vmem:[%s11130_s19 + $0x3a0] sm:$0xff] %v481_v52  ;;  %v487_v55 = vld [vmem:[%s11125_s18 + $0xd18] sm:$0xff]  ;;  %484 = vst [vmem:[%s11130_s19 + $0x3a8] sm:$0xff] %v483_v53  ;;  %v489_v56 = vld [vmem:[%s11125_s18 + $0xd20] sm:$0xff] }
  0x53   : > { %486 = vst [vmem:[%s11130_s19 + $0x3b0] sm:$0xff] %v485_v54  ;;  %488 = vst [vmem:[%s11130_s19 + $0x3b8] sm:$0xff] %v487_v55  ;;  %v491_v57 = vld [vmem:[%s11125_s18 + $0xd28] sm:$0xff]  ;;  %v493_v58 = vld [vmem:[%s11125_s18 + $0xd30] sm:$0xff] }
  0x54   : > { %490 = vst [vmem:[%s11130_s19 + $0x3c0] sm:$0xff] %v489_v56  ;;  %492 = vst [vmem:[%s11130_s19 + $0x3c8] sm:$0xff] %v491_v57  ;;  %v495_v59 = vld [vmem:[%s11125_s18 + $0xd38] sm:$0xff]  ;;  %v497_v60 = vld [vmem:[%s11125_s18 + $0xd40] sm:$0xff] }
  0x55   : > { %494 = vst [vmem:[%s11130_s19 + $0x3d0] sm:$0xff] %v493_v58  ;;  %v499_v61 = vld [vmem:[%s11125_s18 + $0xfa0] sm:$0xff]  ;;  %496 = vst [vmem:[%s11130_s19 + $0x3d8] sm:$0xff] %v495_v59  ;;  %v501_v62 = vld [vmem:[%s11125_s18 + $0xfa8] sm:$0xff] }
  0x56   : > { %498 = vst [vmem:[%s11130_s19 + $0x3e0] sm:$0xff] %v497_v60  ;;  %500 = vst [vmem:[%s11130_s19 + $0x3e8] sm:$0xff] %v499_v61  ;;  %v503_v63 = vld [vmem:[%s11125_s18 + $0xfb0] sm:$0xff]  ;;  %v505_v0 = vld [vmem:[%s11125_s18 + $0xfb8] sm:$0xff] }
  0x57   : > { %502 = vst [vmem:[%s11130_s19 + $0x3f0] sm:$0xff] %v501_v62  ;;  %504 = vst [vmem:[%s11130_s19 + $0x3f8] sm:$0xff] %v503_v63  ;;  %v507_v1 = vld [vmem:[%s11125_s18 + $0xfc0] sm:$0xff]  ;;  %v509_v2 = vld [vmem:[%s11125_s18 + $0xfc8] sm:$0xff] }
  0x58   : > { %506 = vst [vmem:[%s11130_s19 + $0x400] sm:$0xff] %v505_v0  ;;  %v511_v3 = vld [vmem:[%s11125_s18 + $0xfd0] sm:$0xff]  ;;  %508 = vst [vmem:[%s11130_s19 + $0x408] sm:$0xff] %v507_v1  ;;  %v513_v4 = vld [vmem:[%s11125_s18 + $0xfd8] sm:$0xff] }
  0x59   : > { %510 = vst [vmem:[%s11130_s19 + $0x410] sm:$0xff] %v509_v2  ;;  %512 = vst [vmem:[%s11130_s19 + $0x418] sm:$0xff] %v511_v3  ;;  %v515_v5 = vld [vmem:[%s11125_s18 + $0xfe0] sm:$0xff]  ;;  %v517_v6 = vld [vmem:[%s11125_s18 + $0xfe8] sm:$0xff] }
  0x5a   : > { %514 = vst [vmem:[%s11130_s19 + $0x420] sm:$0xff] %v513_v4  ;;  %516 = vst [vmem:[%s11130_s19 + $0x428] sm:$0xff] %v515_v5  ;;  %v519_v7 = vld [vmem:[%s11125_s18 + $0xff0] sm:$0xff]  ;;  %v521_v8 = vld [vmem:[%s11125_s18 + $0xff8] sm:$0xff] }
  0x5b   : > { %518 = vst [vmem:[%s11130_s19 + $0x430] sm:$0xff] %v517_v6  ;;  %v523_v9 = vld [vmem:[%s11125_s18 + $0x1000] sm:$0xff]  ;;  %520 = vst [vmem:[%s11130_s19 + $0x438] sm:$0xff] %v519_v7  ;;  %v525_v10 = vld [vmem:[%s11125_s18 + $0x1008] sm:$0xff] }
  0x5c   : > { %522 = vst [vmem:[%s11130_s19 + $0x440] sm:$0xff] %v521_v8  ;;  %524 = vst [vmem:[%s11130_s19 + $0x448] sm:$0xff] %v523_v9  ;;  %v527_v11 = vld [vmem:[%s11125_s18 + $0x1010] sm:$0xff]  ;;  %v529_v12 = vld [vmem:[%s11125_s18 + $0x1018] sm:$0xff] }
  0x5d   : > { %526 = vst [vmem:[%s11130_s19 + $0x450] sm:$0xff] %v525_v10  ;;  %528 = vst [vmem:[%s11130_s19 + $0x458] sm:$0xff] %v527_v11  ;;  %v531_v13 = vld [vmem:[%s11125_s18 + $0x1020] sm:$0xff]  ;;  %v533_v14 = vld [vmem:[%s11125_s18 + $0x1028] sm:$0xff] }
  0x5e   : > { %530 = vst [vmem:[%s11130_s19 + $0x460] sm:$0xff] %v529_v12  ;;  %v535_v15 = vld [vmem:[%s11125_s18 + $0x1030] sm:$0xff]  ;;  %532 = vst [vmem:[%s11130_s19 + $0x468] sm:$0xff] %v531_v13  ;;  %v537_v16 = vld [vmem:[%s11125_s18 + $0x1038] sm:$0xff] }
  0x5f   : > { %534 = vst [vmem:[%s11130_s19 + $0x470] sm:$0xff] %v533_v14  ;;  %536 = vst [vmem:[%s11130_s19 + $0x478] sm:$0xff] %v535_v15  ;;  %v539_v17 = vld [vmem:[%s11125_s18 + $0x1040] sm:$0xff]  ;;  %v541_v18 = vld [vmem:[%s11125_s18 + $0x1048] sm:$0xff] }
  0x60   : > { %538 = vst [vmem:[%s11130_s19 + $0x480] sm:$0xff] %v537_v16  ;;  %540 = vst [vmem:[%s11130_s19 + $0x488] sm:$0xff] %v539_v17  ;;  %v543_v19 = vld [vmem:[%s11125_s18 + $0x1050] sm:$0xff]  ;;  %v545_v20 = vld [vmem:[%s11125_s18 + $0x1058] sm:$0xff] }
  0x61   : > { %542 = vst [vmem:[%s11130_s19 + $0x490] sm:$0xff] %v541_v18  ;;  %v547_v21 = vld [vmem:[%s11125_s18 + $0x1060] sm:$0xff]  ;;  %544 = vst [vmem:[%s11130_s19 + $0x498] sm:$0xff] %v543_v19  ;;  %v551_v23 = vld [vmem:[%s11125_s18 + $0x12c8] sm:$0xff] }
  0x62   : > { %546 = vst [vmem:[%s11130_s19 + $0x4a0] sm:$0xff] %v545_v20  ;;  %548 = vst [vmem:[%s11130_s19 + $0x4a8] sm:$0xff] %v547_v21  ;;  %v549_v22 = vld [vmem:[%s11125_s18 + $0x12c0] sm:$0xff]  ;;  %v553_v24 = vld [vmem:[%s11125_s18 + $0x12d0] sm:$0xff] }
  0x63   : > { %550 = vst [vmem:[%s11130_s19 + $0x4b0] sm:$0xff] %v549_v22  ;;  %552 = vst [vmem:[%s11130_s19 + $0x4b8] sm:$0xff] %v551_v23  ;;  %v555_v25 = vld [vmem:[%s11125_s18 + $0x12d8] sm:$0xff]  ;;  %v557_v26 = vld [vmem:[%s11125_s18 + $0x12e0] sm:$0xff] }
  0x64   : > { %554 = vst [vmem:[%s11130_s19 + $0x4c0] sm:$0xff] %v553_v24  ;;  %v559_v27 = vld [vmem:[%s11125_s18 + $0x12e8] sm:$0xff]  ;;  %556 = vst [vmem:[%s11130_s19 + $0x4c8] sm:$0xff] %v555_v25  ;;  %v561_v28 = vld [vmem:[%s11125_s18 + $0x12f0] sm:$0xff] }
  0x65   : > { %558 = vst [vmem:[%s11130_s19 + $0x4d0] sm:$0xff] %v557_v26  ;;  %560 = vst [vmem:[%s11130_s19 + $0x4d8] sm:$0xff] %v559_v27  ;;  %v563_v29 = vld [vmem:[%s11125_s18 + $0x12f8] sm:$0xff]  ;;  %v565_v30 = vld [vmem:[%s11125_s18 + $0x1300] sm:$0xff] }
  0x66   : > { %562 = vst [vmem:[%s11130_s19 + $0x4e0] sm:$0xff] %v561_v28  ;;  %564 = vst [vmem:[%s11130_s19 + $0x4e8] sm:$0xff] %v563_v29  ;;  %v567_v31 = vld [vmem:[%s11125_s18 + $0x1308] sm:$0xff]  ;;  %v569_v32 = vld [vmem:[%s11125_s18 + $0x1310] sm:$0xff] }
  0x67   : > { %566 = vst [vmem:[%s11130_s19 + $0x4f0] sm:$0xff] %v565_v30  ;;  %v571_v33 = vld [vmem:[%s11125_s18 + $0x1318] sm:$0xff]  ;;  %568 = vst [vmem:[%s11130_s19 + $0x4f8] sm:$0xff] %v567_v31  ;;  %v573_v34 = vld [vmem:[%s11125_s18 + $0x1320] sm:$0xff] }
  0x68   : > { %570 = vst [vmem:[%s11130_s19 + $0x500] sm:$0xff] %v569_v32  ;;  %572 = vst [vmem:[%s11130_s19 + $0x508] sm:$0xff] %v571_v33  ;;  %v575_v35 = vld [vmem:[%s11125_s18 + $0x1328] sm:$0xff]  ;;  %v577_v36 = vld [vmem:[%s11125_s18 + $0x1330] sm:$0xff] }
  0x69   : > { %574 = vst [vmem:[%s11130_s19 + $0x510] sm:$0xff] %v573_v34  ;;  %576 = vst [vmem:[%s11130_s19 + $0x518] sm:$0xff] %v575_v35  ;;  %v579_v37 = vld [vmem:[%s11125_s18 + $0x1338] sm:$0xff]  ;;  %v581_v38 = vld [vmem:[%s11125_s18 + $0x1340] sm:$0xff] }
  0x6a   : > { %578 = vst [vmem:[%s11130_s19 + $0x520] sm:$0xff] %v577_v36  ;;  %v583_v39 = vld [vmem:[%s11125_s18 + $0x1348] sm:$0xff]  ;;  %580 = vst [vmem:[%s11130_s19 + $0x528] sm:$0xff] %v579_v37  ;;  %v585_v40 = vld [vmem:[%s11125_s18 + $0x1350] sm:$0xff] }
  0x6b   : > { %582 = vst [vmem:[%s11130_s19 + $0x530] sm:$0xff] %v581_v38  ;;  %584 = vst [vmem:[%s11130_s19 + $0x538] sm:$0xff] %v583_v39  ;;  %v587_v41 = vld [vmem:[%s11125_s18 + $0x1358] sm:$0xff]  ;;  %v589_v42 = vld [vmem:[%s11125_s18 + $0x1360] sm:$0xff] }
  0x6c   : > { %586 = vst [vmem:[%s11130_s19 + $0x540] sm:$0xff] %v585_v40  ;;  %588 = vst [vmem:[%s11130_s19 + $0x548] sm:$0xff] %v587_v41  ;;  %v591_v43 = vld [vmem:[%s11125_s18 + $0x1368] sm:$0xff]  ;;  %v593_v44 = vld [vmem:[%s11125_s18 + $0x1370] sm:$0xff] }
  0x6d   : > { %590 = vst [vmem:[%s11130_s19 + $0x550] sm:$0xff] %v589_v42  ;;  %v595_v45 = vld [vmem:[%s11125_s18 + $0x1378] sm:$0xff]  ;;  %592 = vst [vmem:[%s11130_s19 + $0x558] sm:$0xff] %v591_v43  ;;  %v597_v46 = vld [vmem:[%s11125_s18 + $0x1380] sm:$0xff] }
  0x6e   : > { %594 = vst [vmem:[%s11130_s19 + $0x560] sm:$0xff] %v593_v44  ;;  %596 = vst [vmem:[%s11130_s19 + $0x568] sm:$0xff] %v595_v45  ;;  %v599_v47 = vld [vmem:[%s11125_s18 + $0x15e0] sm:$0xff]  ;;  %v601_v48 = vld [vmem:[%s11125_s18 + $0x15e8] sm:$0xff] }
  0x6f   : > { %598 = vst [vmem:[%s11130_s19 + $0x570] sm:$0xff] %v597_v46  ;;  %600 = vst [vmem:[%s11130_s19 + $0x578] sm:$0xff] %v599_v47  ;;  %v603_v49 = vld [vmem:[%s11125_s18 + $0x15f0] sm:$0xff]  ;;  %v605_v50 = vld [vmem:[%s11125_s18 + $0x15f8] sm:$0xff] }
  0x70   : > { %602 = vst [vmem:[%s11130_s19 + $0x580] sm:$0xff] %v601_v48  ;;  %v607_v51 = vld [vmem:[%s11125_s18 + $0x1600] sm:$0xff]  ;;  %604 = vst [vmem:[%s11130_s19 + $0x588] sm:$0xff] %v603_v49  ;;  %v609_v52 = vld [vmem:[%s11125_s18 + $0x1608] sm:$0xff] }
  0x71   : > { %606 = vst [vmem:[%s11130_s19 + $0x590] sm:$0xff] %v605_v50  ;;  %608 = vst [vmem:[%s11130_s19 + $0x598] sm:$0xff] %v607_v51  ;;  %v611_v53 = vld [vmem:[%s11125_s18 + $0x1610] sm:$0xff]  ;;  %v613_v54 = vld [vmem:[%s11125_s18 + $0x1618] sm:$0xff] }
  0x72   : > { %610 = vst [vmem:[%s11130_s19 + $0x5a0] sm:$0xff] %v609_v52  ;;  %612 = vst [vmem:[%s11130_s19 + $0x5a8] sm:$0xff] %v611_v53  ;;  %v615_v55 = vld [vmem:[%s11125_s18 + $0x1620] sm:$0xff]  ;;  %v617_v56 = vld [vmem:[%s11125_s18 + $0x1628] sm:$0xff] }
  0x73   : > { %614 = vst [vmem:[%s11130_s19 + $0x5b0] sm:$0xff] %v613_v54  ;;  %v619_v57 = vld [vmem:[%s11125_s18 + $0x1630] sm:$0xff]  ;;  %616 = vst [vmem:[%s11130_s19 + $0x5b8] sm:$0xff] %v615_v55  ;;  %v621_v58 = vld [vmem:[%s11125_s18 + $0x1638] sm:$0xff] }
  0x74   : > { %618 = vst [vmem:[%s11130_s19 + $0x5c0] sm:$0xff] %v617_v56  ;;  %620 = vst [vmem:[%s11130_s19 + $0x5c8] sm:$0xff] %v619_v57  ;;  %v623_v59 = vld [vmem:[%s11125_s18 + $0x1640] sm:$0xff]  ;;  %v625_v60 = vld [vmem:[%s11125_s18 + $0x1648] sm:$0xff] }
  0x75   : > { %622 = vst [vmem:[%s11130_s19 + $0x5d0] sm:$0xff] %v621_v58  ;;  %624 = vst [vmem:[%s11130_s19 + $0x5d8] sm:$0xff] %v623_v59  ;;  %v627_v61 = vld [vmem:[%s11125_s18 + $0x1650] sm:$0xff]  ;;  %v629_v62 = vld [vmem:[%s11125_s18 + $0x1658] sm:$0xff] }
  0x76   : > { %626 = vst [vmem:[%s11130_s19 + $0x5e0] sm:$0xff] %v625_v60  ;;  %v631_v63 = vld [vmem:[%s11125_s18 + $0x1660] sm:$0xff]  ;;  %628 = vst [vmem:[%s11130_s19 + $0x5e8] sm:$0xff] %v627_v61  ;;  %v633_v0 = vld [vmem:[%s11125_s18 + $0x1668] sm:$0xff] }
  0x77   : > { %630 = vst [vmem:[%s11130_s19 + $0x5f0] sm:$0xff] %v629_v62  ;;  %632 = vst [vmem:[%s11130_s19 + $0x5f8] sm:$0xff] %v631_v63  ;;  %v635_v1 = vld [vmem:[%s11125_s18 + $0x1670] sm:$0xff]  ;;  %v637_v2 = vld [vmem:[%s11125_s18 + $0x1678] sm:$0xff] }
  0x78   : > { %634 = vst [vmem:[%s11130_s19 + $0x600] sm:$0xff] %v633_v0  ;;  %636 = vst [vmem:[%s11130_s19 + $0x608] sm:$0xff] %v635_v1  ;;  %v639_v3 = vld [vmem:[%s11125_s18 + $0x1680] sm:$0xff]  ;;  %v641_v4 = vld [vmem:[%s11125_s18 + $0x1688] sm:$0xff] }
  0x79   : > { %638 = vst [vmem:[%s11130_s19 + $0x610] sm:$0xff] %v637_v2  ;;  %v643_v5 = vld [vmem:[%s11125_s18 + $0x1690] sm:$0xff]  ;;  %640 = vst [vmem:[%s11130_s19 + $0x618] sm:$0xff] %v639_v3  ;;  %v645_v6 = vld [vmem:[%s11125_s18 + $0x1698] sm:$0xff] }
  0x7a   : > { %642 = vst [vmem:[%s11130_s19 + $0x620] sm:$0xff] %v641_v4  ;;  %644 = vst [vmem:[%s11130_s19 + $0x628] sm:$0xff] %v643_v5  ;;  %v647_v7 = vld [vmem:[%s11125_s18 + $0x16a0] sm:$0xff]  ;;  %v651_v9 = vld [vmem:[%s11125_s18 + $0x1908] sm:$0xff] }
  0x7b   : > { %v649_v8 = vld [vmem:[%s11125_s18 + $0x1900] sm:$0xff]  ;;  %646 = vst [vmem:[%s11130_s19 + $0x630] sm:$0xff] %v645_v6  ;;  %648 = vst [vmem:[%s11130_s19 + $0x638] sm:$0xff] %v647_v7  ;;  %v653_v10 = vld [vmem:[%s11125_s18 + $0x1910] sm:$0xff] }
  0x7c   : > { %650 = vst [vmem:[%s11130_s19 + $0x640] sm:$0xff] %v649_v8  ;;  %v655_v11 = vld [vmem:[%s11125_s18 + $0x1918] sm:$0xff]  ;;  %652 = vst [vmem:[%s11130_s19 + $0x648] sm:$0xff] %v651_v9  ;;  %v657_v12 = vld [vmem:[%s11125_s18 + $0x1920] sm:$0xff] }
  0x7d   : > { %654 = vst [vmem:[%s11130_s19 + $0x650] sm:$0xff] %v653_v10  ;;  %656 = vst [vmem:[%s11130_s19 + $0x658] sm:$0xff] %v655_v11  ;;  %v659_v13 = vld [vmem:[%s11125_s18 + $0x1928] sm:$0xff]  ;;  %v661_v14 = vld [vmem:[%s11125_s18 + $0x1930] sm:$0xff] }
  0x7e   : > { %658 = vst [vmem:[%s11130_s19 + $0x660] sm:$0xff] %v657_v12  ;;  %660 = vst [vmem:[%s11130_s19 + $0x668] sm:$0xff] %v659_v13  ;;  %v663_v15 = vld [vmem:[%s11125_s18 + $0x1938] sm:$0xff]  ;;  %v665_v16 = vld [vmem:[%s11125_s18 + $0x1940] sm:$0xff] }
  0x7f   : > { %662 = vst [vmem:[%s11130_s19 + $0x670] sm:$0xff] %v661_v14  ;;  %v667_v17 = vld [vmem:[%s11125_s18 + $0x1948] sm:$0xff]  ;;  %664 = vst [vmem:[%s11130_s19 + $0x678] sm:$0xff] %v663_v15  ;;  %v669_v18 = vld [vmem:[%s11125_s18 + $0x1950] sm:$0xff] }
  0x80   : > { %666 = vst [vmem:[%s11130_s19 + $0x680] sm:$0xff] %v665_v16  ;;  %668 = vst [vmem:[%s11130_s19 + $0x688] sm:$0xff] %v667_v17  ;;  %v671_v19 = vld [vmem:[%s11125_s18 + $0x1958] sm:$0xff]  ;;  %v673_v20 = vld [vmem:[%s11125_s18 + $0x1960] sm:$0xff] }
  0x81   : > { %670 = vst [vmem:[%s11130_s19 + $0x690] sm:$0xff] %v669_v18  ;;  %672 = vst [vmem:[%s11130_s19 + $0x698] sm:$0xff] %v671_v19  ;;  %v675_v21 = vld [vmem:[%s11125_s18 + $0x1968] sm:$0xff]  ;;  %v677_v22 = vld [vmem:[%s11125_s18 + $0x1970] sm:$0xff] }
  0x82   : > { %674 = vst [vmem:[%s11130_s19 + $0x6a0] sm:$0xff] %v673_v20  ;;  %v679_v23 = vld [vmem:[%s11125_s18 + $0x1978] sm:$0xff]  ;;  %676 = vst [vmem:[%s11130_s19 + $0x6a8] sm:$0xff] %v675_v21  ;;  %v681_v24 = vld [vmem:[%s11125_s18 + $0x1980] sm:$0xff] }
  0x83   : > { %678 = vst [vmem:[%s11130_s19 + $0x6b0] sm:$0xff] %v677_v22  ;;  %680 = vst [vmem:[%s11130_s19 + $0x6b8] sm:$0xff] %v679_v23  ;;  %v683_v25 = vld [vmem:[%s11125_s18 + $0x1988] sm:$0xff]  ;;  %v685_v26 = vld [vmem:[%s11125_s18 + $0x1990] sm:$0xff] }
  0x84   : > { %682 = vst [vmem:[%s11130_s19 + $0x6c0] sm:$0xff] %v681_v24  ;;  %684 = vst [vmem:[%s11130_s19 + $0x6c8] sm:$0xff] %v683_v25  ;;  %v687_v27 = vld [vmem:[%s11125_s18 + $0x1998] sm:$0xff]  ;;  %v689_v28 = vld [vmem:[%s11125_s18 + $0x19a0] sm:$0xff] }
  0x85   : > { %686 = vst [vmem:[%s11130_s19 + $0x6d0] sm:$0xff] %v685_v26  ;;  %v691_v29 = vld [vmem:[%s11125_s18 + $0x19a8] sm:$0xff]  ;;  %688 = vst [vmem:[%s11130_s19 + $0x6d8] sm:$0xff] %v687_v27  ;;  %v693_v30 = vld [vmem:[%s11125_s18 + $0x19b0] sm:$0xff] }
  0x86   : > { %690 = vst [vmem:[%s11130_s19 + $0x6e0] sm:$0xff] %v689_v28  ;;  %692 = vst [vmem:[%s11130_s19 + $0x6e8] sm:$0xff] %v691_v29  ;;  %v695_v31 = vld [vmem:[%s11125_s18 + $0x19b8] sm:$0xff]  ;;  %v697_v32 = vld [vmem:[%s11125_s18 + $0x19c0] sm:$0xff] }
  0x87   : > { %694 = vst [vmem:[%s11130_s19 + $0x6f0] sm:$0xff] %v693_v30  ;;  %696 = vst [vmem:[%s11130_s19 + $0x6f8] sm:$0xff] %v695_v31  ;;  %v699_v33 = vld [vmem:[%s11125_s18 + $0x1c20] sm:$0xff]  ;;  %v701_v34 = vld [vmem:[%s11125_s18 + $0x1c28] sm:$0xff] }
  0x88   : > { %698 = vst [vmem:[%s11130_s19 + $0x700] sm:$0xff] %v697_v32  ;;  %v703_v35 = vld [vmem:[%s11125_s18 + $0x1c30] sm:$0xff]  ;;  %700 = vst [vmem:[%s11130_s19 + $0x708] sm:$0xff] %v699_v33  ;;  %v705_v36 = vld [vmem:[%s11125_s18 + $0x1c38] sm:$0xff] }
  0x89   : > { %702 = vst [vmem:[%s11130_s19 + $0x710] sm:$0xff] %v701_v34  ;;  %704 = vst [vmem:[%s11130_s19 + $0x718] sm:$0xff] %v703_v35  ;;  %v707_v37 = vld [vmem:[%s11125_s18 + $0x1c40] sm:$0xff]  ;;  %v709_v38 = vld [vmem:[%s11125_s18 + $0x1c48] sm:$0xff] }
  0x8a   : > { %706 = vst [vmem:[%s11130_s19 + $0x720] sm:$0xff] %v705_v36  ;;  %708 = vst [vmem:[%s11130_s19 + $0x728] sm:$0xff] %v707_v37  ;;  %v711_v39 = vld [vmem:[%s11125_s18 + $0x1c50] sm:$0xff]  ;;  %v713_v40 = vld [vmem:[%s11125_s18 + $0x1c58] sm:$0xff] }
  0x8b   : > { %710 = vst [vmem:[%s11130_s19 + $0x730] sm:$0xff] %v709_v38  ;;  %v715_v41 = vld [vmem:[%s11125_s18 + $0x1c60] sm:$0xff]  ;;  %712 = vst [vmem:[%s11130_s19 + $0x738] sm:$0xff] %v711_v39  ;;  %v717_v42 = vld [vmem:[%s11125_s18 + $0x1c68] sm:$0xff] }
  0x8c   : > { %714 = vst [vmem:[%s11130_s19 + $0x740] sm:$0xff] %v713_v40  ;;  %716 = vst [vmem:[%s11130_s19 + $0x748] sm:$0xff] %v715_v41  ;;  %v719_v43 = vld [vmem:[%s11125_s18 + $0x1c70] sm:$0xff]  ;;  %v721_v44 = vld [vmem:[%s11125_s18 + $0x1c78] sm:$0xff] }
  0x8d   : > { %718 = vst [vmem:[%s11130_s19 + $0x750] sm:$0xff] %v717_v42  ;;  %720 = vst [vmem:[%s11130_s19 + $0x758] sm:$0xff] %v719_v43  ;;  %v723_v45 = vld [vmem:[%s11125_s18 + $0x1c80] sm:$0xff]  ;;  %v725_v46 = vld [vmem:[%s11125_s18 + $0x1c88] sm:$0xff] }
  0x8e   : > { %722 = vst [vmem:[%s11130_s19 + $0x760] sm:$0xff] %v721_v44  ;;  %v727_v47 = vld [vmem:[%s11125_s18 + $0x1c90] sm:$0xff]  ;;  %724 = vst [vmem:[%s11130_s19 + $0x768] sm:$0xff] %v723_v45  ;;  %v729_v48 = vld [vmem:[%s11125_s18 + $0x1c98] sm:$0xff] }
  0x8f   : > { %726 = vst [vmem:[%s11130_s19 + $0x770] sm:$0xff] %v725_v46  ;;  %728 = vst [vmem:[%s11130_s19 + $0x778] sm:$0xff] %v727_v47  ;;  %v731_v49 = vld [vmem:[%s11125_s18 + $0x1ca0] sm:$0xff]  ;;  %v733_v50 = vld [vmem:[%s11125_s18 + $0x1ca8] sm:$0xff] }
  0x90   : > { %730 = vst [vmem:[%s11130_s19 + $0x780] sm:$0xff] %v729_v48  ;;  %732 = vst [vmem:[%s11130_s19 + $0x788] sm:$0xff] %v731_v49  ;;  %v735_v51 = vld [vmem:[%s11125_s18 + $0x1cb0] sm:$0xff]  ;;  %v737_v52 = vld [vmem:[%s11125_s18 + $0x1cb8] sm:$0xff] }
  0x91   : > { %734 = vst [vmem:[%s11130_s19 + $0x790] sm:$0xff] %v733_v50  ;;  %v739_v53 = vld [vmem:[%s11125_s18 + $0x1cc0] sm:$0xff]  ;;  %736 = vst [vmem:[%s11130_s19 + $0x798] sm:$0xff] %v735_v51  ;;  %v741_v54 = vld [vmem:[%s11125_s18 + $0x1cc8] sm:$0xff] }
  0x92   : > { %738 = vst [vmem:[%s11130_s19 + $0x7a0] sm:$0xff] %v737_v52  ;;  %740 = vst [vmem:[%s11130_s19 + $0x7a8] sm:$0xff] %v739_v53  ;;  %v743_v55 = vld [vmem:[%s11125_s18 + $0x1cd0] sm:$0xff]  ;;  %v745_v56 = vld [vmem:[%s11125_s18 + $0x1cd8] sm:$0xff] }
  0x93   : > { %742 = vst [vmem:[%s11130_s19 + $0x7b0] sm:$0xff] %v741_v54  ;;  %744 = vst [vmem:[%s11130_s19 + $0x7b8] sm:$0xff] %v743_v55  ;;  %v747_v57 = vld [vmem:[%s11125_s18 + $0x1ce0] sm:$0xff]  ;;  %v751_v59 = vld [vmem:[%s11125_s18 + $0x1f48] sm:$0xff] }
  0x94   : > { %746 = vst [vmem:[%s11130_s19 + $0x7c0] sm:$0xff] %v745_v56  ;;  %v749_v58 = vld [vmem:[%s11125_s18 + $0x1f40] sm:$0xff]  ;;  %748 = vst [vmem:[%s11130_s19 + $0x7c8] sm:$0xff] %v747_v57  ;;  %v753_v60 = vld [vmem:[%s11125_s18 + $0x1f50] sm:$0xff] }
  0x95   : > { %750 = vst [vmem:[%s11130_s19 + $0x7d0] sm:$0xff] %v749_v58  ;;  %752 = vst [vmem:[%s11130_s19 + $0x7d8] sm:$0xff] %v751_v59  ;;  %v755_v61 = vld [vmem:[%s11125_s18 + $0x1f58] sm:$0xff]  ;;  %v757_v62 = vld [vmem:[%s11125_s18 + $0x1f60] sm:$0xff] }
  0x96   : > { %754 = vst [vmem:[%s11130_s19 + $0x7e0] sm:$0xff] %v753_v60  ;;  %756 = vst [vmem:[%s11130_s19 + $0x7e8] sm:$0xff] %v755_v61  ;;  %v759_v63 = vld [vmem:[%s11125_s18 + $0x1f68] sm:$0xff]  ;;  %v761_v0 = vld [vmem:[%s11125_s18 + $0x1f70] sm:$0xff] }
  0x97   : > { %758 = vst [vmem:[%s11130_s19 + $0x7f0] sm:$0xff] %v757_v62  ;;  %v763_v1 = vld [vmem:[%s11125_s18 + $0x1f78] sm:$0xff]  ;;  %760 = vst [vmem:[%s11130_s19 + $0x7f8] sm:$0xff] %v759_v63  ;;  %v765_v2 = vld [vmem:[%s11125_s18 + $0x1f80] sm:$0xff] }
  0x98   : > { %762 = vst [vmem:[%s11130_s19 + $0x800] sm:$0xff] %v761_v0  ;;  %764 = vst [vmem:[%s11130_s19 + $0x808] sm:$0xff] %v763_v1  ;;  %v767_v3 = vld [vmem:[%s11125_s18 + $0x1f88] sm:$0xff]  ;;  %v769_v4 = vld [vmem:[%s11125_s18 + $0x1f90] sm:$0xff] }
  0x99   : > { %766 = vst [vmem:[%s11130_s19 + $0x810] sm:$0xff] %v765_v2  ;;  %768 = vst [vmem:[%s11130_s19 + $0x818] sm:$0xff] %v767_v3  ;;  %v771_v5 = vld [vmem:[%s11125_s18 + $0x1f98] sm:$0xff]  ;;  %v773_v6 = vld [vmem:[%s11125_s18 + $0x1fa0] sm:$0xff] }
  0x9a   : > { %770 = vst [vmem:[%s11130_s19 + $0x820] sm:$0xff] %v769_v4  ;;  %v775_v7 = vld [vmem:[%s11125_s18 + $0x1fa8] sm:$0xff]  ;;  %772 = vst [vmem:[%s11130_s19 + $0x828] sm:$0xff] %v771_v5  ;;  %v777_v8 = vld [vmem:[%s11125_s18 + $0x1fb0] sm:$0xff] }
  0x9b   : > { %774 = vst [vmem:[%s11130_s19 + $0x830] sm:$0xff] %v773_v6  ;;  %776 = vst [vmem:[%s11130_s19 + $0x838] sm:$0xff] %v775_v7  ;;  %v779_v9 = vld [vmem:[%s11125_s18 + $0x1fb8] sm:$0xff]  ;;  %v781_v10 = vld [vmem:[%s11125_s18 + $0x1fc0] sm:$0xff] }
  0x9c   : > { %778 = vst [vmem:[%s11130_s19 + $0x840] sm:$0xff] %v777_v8  ;;  %780 = vst [vmem:[%s11130_s19 + $0x848] sm:$0xff] %v779_v9  ;;  %v783_v11 = vld [vmem:[%s11125_s18 + $0x1fc8] sm:$0xff]  ;;  %v785_v12 = vld [vmem:[%s11125_s18 + $0x1fd0] sm:$0xff] }
  0x9d   : > { %782 = vst [vmem:[%s11130_s19 + $0x850] sm:$0xff] %v781_v10  ;;  %v787_v13 = vld [vmem:[%s11125_s18 + $0x1fd8] sm:$0xff]  ;;  %784 = vst [vmem:[%s11130_s19 + $0x858] sm:$0xff] %v783_v11  ;;  %v789_v14 = vld [vmem:[%s11125_s18 + $0x1fe0] sm:$0xff] }
  0x9e   : > { %786 = vst [vmem:[%s11130_s19 + $0x860] sm:$0xff] %v785_v12  ;;  %788 = vst [vmem:[%s11130_s19 + $0x868] sm:$0xff] %v787_v13  ;;  %v791_v15 = vld [vmem:[%s11125_s18 + $0x1fe8] sm:$0xff]  ;;  %v793_v16 = vld [vmem:[%s11125_s18 + $0x1ff0] sm:$0xff] }
  0x9f   : > { %790 = vst [vmem:[%s11130_s19 + $0x870] sm:$0xff] %v789_v14  ;;  %792 = vst [vmem:[%s11130_s19 + $0x878] sm:$0xff] %v791_v15  ;;  %v795_v17 = vld [vmem:[%s11125_s18 + $0x1ff8] sm:$0xff]  ;;  %v797_v18 = vld [vmem:[%s11125_s18 + $0x2000] sm:$0xff] }
  0xa0   : > { %794 = vst [vmem:[%s11130_s19 + $0x880] sm:$0xff] %v793_v16  ;;  %v799_v19 = vld [vmem:[%s11125_s18 + $0x2260] sm:$0xff]  ;;  %796 = vst [vmem:[%s11130_s19 + $0x888] sm:$0xff] %v795_v17  ;;  %v801_v20 = vld [vmem:[%s11125_s18 + $0x2268] sm:$0xff] }
  0xa1   : > { %798 = vst [vmem:[%s11130_s19 + $0x890] sm:$0xff] %v797_v18  ;;  %800 = vst [vmem:[%s11130_s19 + $0x898] sm:$0xff] %v799_v19  ;;  %v803_v21 = vld [vmem:[%s11125_s18 + $0x2270] sm:$0xff]  ;;  %v805_v22 = vld [vmem:[%s11125_s18 + $0x2278] sm:$0xff] }
  0xa2   : > { %802 = vst [vmem:[%s11130_s19 + $0x8a0] sm:$0xff] %v801_v20  ;;  %804 = vst [vmem:[%s11130_s19 + $0x8a8] sm:$0xff] %v803_v21  ;;  %v807_v23 = vld [vmem:[%s11125_s18 + $0x2280] sm:$0xff]  ;;  %v809_v24 = vld [vmem:[%s11125_s18 + $0x2288] sm:$0xff] }
  0xa3   : > { %806 = vst [vmem:[%s11130_s19 + $0x8b0] sm:$0xff] %v805_v22  ;;  %v811_v25 = vld [vmem:[%s11125_s18 + $0x2290] sm:$0xff]  ;;  %808 = vst [vmem:[%s11130_s19 + $0x8b8] sm:$0xff] %v807_v23  ;;  %v813_v26 = vld [vmem:[%s11125_s18 + $0x2298] sm:$0xff] }
  0xa4   : > { %810 = vst [vmem:[%s11130_s19 + $0x8c0] sm:$0xff] %v809_v24  ;;  %812 = vst [vmem:[%s11130_s19 + $0x8c8] sm:$0xff] %v811_v25  ;;  %v815_v27 = vld [vmem:[%s11125_s18 + $0x22a0] sm:$0xff]  ;;  %v817_v28 = vld [vmem:[%s11125_s18 + $0x22a8] sm:$0xff] }
  0xa5   : > { %814 = vst [vmem:[%s11130_s19 + $0x8d0] sm:$0xff] %v813_v26  ;;  %816 = vst [vmem:[%s11130_s19 + $0x8d8] sm:$0xff] %v815_v27  ;;  %v819_v29 = vld [vmem:[%s11125_s18 + $0x22b0] sm:$0xff]  ;;  %v821_v30 = vld [vmem:[%s11125_s18 + $0x22b8] sm:$0xff] }
  0xa6   : > { %818 = vst [vmem:[%s11130_s19 + $0x8e0] sm:$0xff] %v817_v28  ;;  %v823_v31 = vld [vmem:[%s11125_s18 + $0x22c0] sm:$0xff]  ;;  %820 = vst [vmem:[%s11130_s19 + $0x8e8] sm:$0xff] %v819_v29  ;;  %v825_v32 = vld [vmem:[%s11125_s18 + $0x22c8] sm:$0xff] }
  0xa7   : > { %822 = vst [vmem:[%s11130_s19 + $0x8f0] sm:$0xff] %v821_v30  ;;  %824 = vst [vmem:[%s11130_s19 + $0x8f8] sm:$0xff] %v823_v31  ;;  %v827_v33 = vld [vmem:[%s11125_s18 + $0x22d0] sm:$0xff]  ;;  %v829_v34 = vld [vmem:[%s11125_s18 + $0x22d8] sm:$0xff] }
  0xa8   : > { %826 = vst [vmem:[%s11130_s19 + $0x900] sm:$0xff] %v825_v32  ;;  %828 = vst [vmem:[%s11130_s19 + $0x908] sm:$0xff] %v827_v33  ;;  %v831_v35 = vld [vmem:[%s11125_s18 + $0x22e0] sm:$0xff]  ;;  %v833_v36 = vld [vmem:[%s11125_s18 + $0x22e8] sm:$0xff] }
  0xa9   : > { %830 = vst [vmem:[%s11130_s19 + $0x910] sm:$0xff] %v829_v34  ;;  %v835_v37 = vld [vmem:[%s11125_s18 + $0x22f0] sm:$0xff]  ;;  %832 = vst [vmem:[%s11130_s19 + $0x918] sm:$0xff] %v831_v35  ;;  %v837_v38 = vld [vmem:[%s11125_s18 + $0x22f8] sm:$0xff] }
  0xaa   : > { %834 = vst [vmem:[%s11130_s19 + $0x920] sm:$0xff] %v833_v36  ;;  %836 = vst [vmem:[%s11130_s19 + $0x928] sm:$0xff] %v835_v37  ;;  %v839_v39 = vld [vmem:[%s11125_s18 + $0x2300] sm:$0xff]  ;;  %v841_v40 = vld [vmem:[%s11125_s18 + $0x2308] sm:$0xff] }
  0xab   : > { %838 = vst [vmem:[%s11130_s19 + $0x930] sm:$0xff] %v837_v38  ;;  %840 = vst [vmem:[%s11130_s19 + $0x938] sm:$0xff] %v839_v39  ;;  %v843_v41 = vld [vmem:[%s11125_s18 + $0x2310] sm:$0xff]  ;;  %v845_v42 = vld [vmem:[%s11125_s18 + $0x2318] sm:$0xff] }
  0xac   : > { %842 = vst [vmem:[%s11130_s19 + $0x940] sm:$0xff] %v841_v40  ;;  %v847_v43 = vld [vmem:[%s11125_s18 + $0x2320] sm:$0xff]  ;;  %844 = vst [vmem:[%s11130_s19 + $0x948] sm:$0xff] %v843_v41  ;;  %v851_v45 = vld [vmem:[%s11125_s18 + $0x2588] sm:$0xff] }
  0xad   : > { %846 = vst [vmem:[%s11130_s19 + $0x950] sm:$0xff] %v845_v42  ;;  %848 = vst [vmem:[%s11130_s19 + $0x958] sm:$0xff] %v847_v43  ;;  %v849_v44 = vld [vmem:[%s11125_s18 + $0x2580] sm:$0xff]  ;;  %v853_v46 = vld [vmem:[%s11125_s18 + $0x2590] sm:$0xff] }
  0xae   : > { %850 = vst [vmem:[%s11130_s19 + $0x960] sm:$0xff] %v849_v44  ;;  %852 = vst [vmem:[%s11130_s19 + $0x968] sm:$0xff] %v851_v45  ;;  %v855_v47 = vld [vmem:[%s11125_s18 + $0x2598] sm:$0xff]  ;;  %v857_v48 = vld [vmem:[%s11125_s18 + $0x25a0] sm:$0xff] }
  0xaf   : > { %854 = vst [vmem:[%s11130_s19 + $0x970] sm:$0xff] %v853_v46  ;;  %v859_v49 = vld [vmem:[%s11125_s18 + $0x25a8] sm:$0xff]  ;;  %856 = vst [vmem:[%s11130_s19 + $0x978] sm:$0xff] %v855_v47  ;;  %v861_v50 = vld [vmem:[%s11125_s18 + $0x25b0] sm:$0xff] }
  0xb0   : > { %858 = vst [vmem:[%s11130_s19 + $0x980] sm:$0xff] %v857_v48  ;;  %860 = vst [vmem:[%s11130_s19 + $0x988] sm:$0xff] %v859_v49  ;;  %v863_v51 = vld [vmem:[%s11125_s18 + $0x25b8] sm:$0xff]  ;;  %v865_v52 = vld [vmem:[%s11125_s18 + $0x25c0] sm:$0xff] }
  0xb1   : > { %862 = vst [vmem:[%s11130_s19 + $0x990] sm:$0xff] %v861_v50  ;;  %864 = vst [vmem:[%s11130_s19 + $0x998] sm:$0xff] %v863_v51  ;;  %v867_v53 = vld [vmem:[%s11125_s18 + $0x25c8] sm:$0xff]  ;;  %v869_v54 = vld [vmem:[%s11125_s18 + $0x25d0] sm:$0xff] }
  0xb2   : > { %866 = vst [vmem:[%s11130_s19 + $0x9a0] sm:$0xff] %v865_v52  ;;  %v871_v55 = vld [vmem:[%s11125_s18 + $0x25d8] sm:$0xff]  ;;  %868 = vst [vmem:[%s11130_s19 + $0x9a8] sm:$0xff] %v867_v53  ;;  %v873_v56 = vld [vmem:[%s11125_s18 + $0x25e0] sm:$0xff] }
  0xb3   : > { %870 = vst [vmem:[%s11130_s19 + $0x9b0] sm:$0xff] %v869_v54  ;;  %872 = vst [vmem:[%s11130_s19 + $0x9b8] sm:$0xff] %v871_v55  ;;  %v875_v57 = vld [vmem:[%s11125_s18 + $0x25e8] sm:$0xff]  ;;  %v877_v58 = vld [vmem:[%s11125_s18 + $0x25f0] sm:$0xff] }
  0xb4   : > { %874 = vst [vmem:[%s11130_s19 + $0x9c0] sm:$0xff] %v873_v56  ;;  %876 = vst [vmem:[%s11130_s19 + $0x9c8] sm:$0xff] %v875_v57  ;;  %v879_v59 = vld [vmem:[%s11125_s18 + $0x25f8] sm:$0xff]  ;;  %v881_v60 = vld [vmem:[%s11125_s18 + $0x2600] sm:$0xff] }
  0xb5   : > { %878 = vst [vmem:[%s11130_s19 + $0x9d0] sm:$0xff] %v877_v58  ;;  %v883_v61 = vld [vmem:[%s11125_s18 + $0x2608] sm:$0xff]  ;;  %880 = vst [vmem:[%s11130_s19 + $0x9d8] sm:$0xff] %v879_v59  ;;  %v885_v62 = vld [vmem:[%s11125_s18 + $0x2610] sm:$0xff] }
  0xb6   : > { %882 = vst [vmem:[%s11130_s19 + $0x9e0] sm:$0xff] %v881_v60  ;;  %884 = vst [vmem:[%s11130_s19 + $0x9e8] sm:$0xff] %v883_v61  ;;  %v887_v63 = vld [vmem:[%s11125_s18 + $0x2618] sm:$0xff]  ;;  %v889_v0 = vld [vmem:[%s11125_s18 + $0x2620] sm:$0xff] }
  0xb7   : > { %886 = vst [vmem:[%s11130_s19 + $0x9f0] sm:$0xff] %v885_v62  ;;  %888 = vst [vmem:[%s11130_s19 + $0x9f8] sm:$0xff] %v887_v63  ;;  %v891_v1 = vld [vmem:[%s11125_s18 + $0x2628] sm:$0xff]  ;;  %v893_v2 = vld [vmem:[%s11125_s18 + $0x2630] sm:$0xff] }
  0xb8   : > { %890 = vst [vmem:[%s11130_s19 + $0xa00] sm:$0xff] %v889_v0  ;;  %v895_v3 = vld [vmem:[%s11125_s18 + $0x2638] sm:$0xff]  ;;  %892 = vst [vmem:[%s11130_s19 + $0xa08] sm:$0xff] %v891_v1  ;;  %v897_v4 = vld [vmem:[%s11125_s18 + $0x2640] sm:$0xff] }
  0xb9   : > { %894 = vst [vmem:[%s11130_s19 + $0xa10] sm:$0xff] %v893_v2  ;;  %896 = vst [vmem:[%s11130_s19 + $0xa18] sm:$0xff] %v895_v3 }
  0xba   : > { %898 = vst [vmem:[%s11130_s19 + $0xa20] sm:$0xff] %v897_v4 }
  0xbb PF: > { %p8581_p7 = scmp.ge.s32.totalorder %s11026_s27, 1  ;;  %p916_p8 = scmp.lt.s32.totalorder %s11026_s27, 5 }
  0xbd   : > { %p917_p9 = pnand %p8581_p7, %p916_p8 }
  0xbe   : > { %s923_s20 = sand.u32 (!%p917_p9), 1, %s11002_s21   ;;  %s8582_s30 = sshll.u32 (!%p917_p9), %s11014_s24, 1 }
  0xbf   : > { %920 = sbr.rel (%p917_p9) target bundleno = 1427 (0x593), region = 63  ;;  %s962_s8 = sadd.s32 (!%p917_p9), %s11010_s23, %s8582_s30 }
  0xc0   : > { %s10006_s7 = smul.u32 (!%p917_p9), 2600, %s923_s20  ;;  %p971_p10 = scmp.lt.s32.totalorder (!%p917_p9), %s11014_s24, 1 }
  0xc1   : > { %s963_s9 = smul.u32 (!%p917_p9), 800, %s962_s8  ;;  %p8585_p12 = scmp.ne.s32.totalorder (!%p917_p9), %s11010_s23, 0 }
  0xc2   : > { %s11796_s21 = scalar_lea.vmem (!%p917_p9), [#allocation4], %s10006_s7 }
  0xc3   : > { %p964_p11 = scmp.lt.s32.totalorder (!%p917_p9), %s963_s9, 3199 }
  0xc6   : > { %s972_s10 = scalar_select %p971_p10, %s11014_s24, 1 }
  0xc7   : > { %s12962_s9 = smov (!%p964_p11, %s963_s9), 3199  ;;  %979 = sbr.rel (%p8585_p12) target bundleno = 445 (0x1bd), region = 71 }
  0xc8   : > { %s8584_s11 = sshll.u32 %s972_s10, 1  ;;  %s8583_s13 = sshll.u32 %s12962_s9, 2  ;;  %v981_v5 = vld [vmem:[%s12943_s1] sm:$0xff] (!%p8585_p12)  ;;  %v982_v6 = vld [vmem:[%s12943_s1 + $0x8] sm:$0xff] (!%p8585_p12)  ;;  %v983_v7 = vld [vmem:[%s12943_s1 + $0x10] sm:$0xff] (!%p8585_p12)  ;;  %v11028_v8 = vmov (!%p8585_p12), 0.0|0.0  }
  0xc9   : > { %s11789_s16 = scalar_lea.vmem %s12948_s6, %s8584_s11  ;;  %s11794_s19 = scalar_lea.vmem %s12947_s5, %s8583_s13  ;;  %9987 = vmatprep.subr.bf16.mxu0 (!%p8585_p12), %v11028_v8  ;;  %v9988_v9 = vpack.c.bf16 (!%p8585_p12), %v982_v6, %v981_v5  ;;  %v984_v10 = vld [vmem:[%s12943_s1 + $0x18] sm:$0xff] (!%p8585_p12)  ;;  %vm11029_vm0 = vmmov (!%p8585_p12), 0   ;;  %v11030_v11 = vmov (!%p8585_p12), 0.0   ;;  %v985_v13 = vld [vmem:[%s12943_s1 + $0x20] sm:$0xff] (!%p8585_p12)  ;;  %v986_v14 = vld [vmem:[%s12943_s1 + $0x28] sm:$0xff] (!%p8585_p12)  ;;  %vm1005_vm1 = vcmask (!%p8585_p12), 1043456  }
  0xca   : > { %9984 = vmatprep.mubr.msk.f32.mxu0 (!%p8585_p12), %vm11029_vm0, %v11030_v11  ;;  %v9991_v12 = vpack.c.bf16 (!%p8585_p12), %v984_v10, %v983_v7  ;;  %v9994_v15 = vpack.c.bf16 (!%p8585_p12), %v986_v14, %v985_v13  ;;  %v987_v16 = vld [vmem:[%s12943_s1 + $0x30] sm:$0xff] (!%p8585_p12)  ;;  %v988_v17 = vld [vmem:[%s12943_s1 + $0x38] sm:$0xff] (!%p8585_p12)  ;;  %v989_v19 = vld [vmem:[%s12943_s1 + $0x40] sm:$0xff] (!%p8585_p12)  ;;  %vm1001_vm2 = vcmask (!%p8585_p12), 818176   ;;  %p1082_p13 = scmp.eq.s32.totalorder (!%p8585_p12), %s11014_s24, 0  ;;  %vm1094_vm3 = vcmask (!%p8585_p12), 74752  }
  0xcb   : > { %9989 = vmatpush3.bf16.msra.mxu0 (!%p8585_p12), %v9988_v9  ;;  %v9997_v18 = vpack.c.bf16 (!%p8585_p12), %v988_v17, %v987_v16  ;;  %v990_v20 = vld [vmem:[%s12943_s1 + $0x48] sm:$0xff] (!%p8585_p12)  ;;  %v991_v22 = vld [vmem:[%s12943_s1 + $0x50] sm:$0xff] (!%p8585_p12)  ;;  %v992_v23 = vld [vmem:[%s12943_s1 + $0x58] sm:$0xff] (!%p8585_p12)  ;;  %vm1080_vm4 = vcmask (!%p8585_p12), 811008  }
  0xcc   : > { %9990 = vmatprep.subr.bf16.mxu0 (!%p8585_p12), %v11028_v8  ;;  %v10000_v21 = vpack.c.bf16 (!%p8585_p12), %v990_v20, %v989_v19  ;;  %v10003_v24 = vpack.c.bf16 (!%p8585_p12), %v992_v23, %v991_v22  ;;  %v993_v25 = vld [vmem:[%s12943_s1 + $0x60] sm:$0xf] (!%p8585_p12) }
  0xcd   : > { %v980_v26 = vld [vmem:[%s12942_s0] sm:$0x3] (!%p8585_p12) }
  0xce   : > { %s10068_s10 = scalar_select %p1082_p13, 255, 0  ;;  %v8586_v28 = vld [vmem:[%s12944_s2] ss:$0 sm:$0xff] }
  0xcf   : > { %9992 = vmatpush3.bf16.msra.mxu0 %v9991_v12 }
  0xd0   : > { %9993 = vmatprep.subr.bf16.mxu0 %v11028_v8  ;;  %v10069_v27 = vld [vmem:[%s12945_s3] ss:$0 sm:%s10068_s10] }
  0xd1   : > { %1095 = vst.msk [vmem:[#allocation3] sm:$0x3] %vm1094_vm3, %v10069_v27 }
  0xd3   : > { %9995 = vmatpush3.bf16.msra.mxu0 %v9994_v15 }
  0xd4   : > { %9996 = vmatprep.subr.bf16.mxu0 %v11028_v8 }
  0xd7   : > { %9998 = vmatpush3.bf16.msra.mxu0 %v9997_v18 }
  0xd8   : > { %9999 = vmatprep.subr.bf16.mxu0 %v11028_v8 }
  0xdb   : > { %10001 = vmatpush3.bf16.msra.mxu0 %v10000_v21 }
  0xdc   : > { %10002 = vmatprep.subr.bf16.mxu0 %v11028_v8 }
  0xdf   : > { %10004 = vmatpush3.bf16.msra.mxu0 %v10003_v24 }
  0xe0   : > { %9982 = vmatprep.subr.mxu0 %v11030_v11 }
  0xe3   : > { %9983 = vmatpush3.msk.msra.mxu0 %vm1005_vm1, %v993_v25 }
  0xe4   : > { %9985 = vmatmul.mubr.msk.f32.vlgmr.msra.gmra.mrb[0].mxu0 %vm1001_vm2, %v980_v26 }
 0x1b7   : > { %v1075_v29 = vpop.f32.mrb[0].mxu0 }
 0x1b8   : > { %v1076_v30 = vadd.f32 %v8586_v28, %v1075_v29  ;;  %v9986_v31 = vpop.f32.mrb[1].mxu0 }
 0x1ba   : > { %v1079_v32 = vpack.c.bf16 %v1076_v30, %v1076_v30 }
 0x1bc   : > { %1081 = vst.msk [vmem:[#allocation2] sm:$0x1] %vm1080_vm4, %v1079_v32 }
 0x1bd PF: > { %v10070_v33 = vld [vmem:[%s11796_s21 + $0x4] ss:$200 sps:$4 sm:$0xff]   ;;  %v11031_v35 = vmov 0   ;;  %v10074_v36 = vld [vmem:[%s11796_s21] ss:$200 sps:$4 sm:$0xff]   ;;  %vm3051_vm5 = vcmask 1041408  }
 0x1be   : > { %v10072_v34 = vld [vmem:[%s11796_s21 + $0xc] ss:$200 sps:$4 sm:$0xff]   ;;  %3234 = vmatprep.mubr.bf16.mxu0 %v11031_v35  ;;  %3275 = vmatprep.mubr.bf16.mxu1 %v11031_v35  ;;  %v10075_v37 = vld [vmem:[%s11796_s21 + $0x8] ss:$200 sps:$4 sm:$0xff]   ;;  %v10078_v39 = vld [vmem:[%s11796_s21 + $0x19c] ss:$200 sps:$4 sm:$0xff]  }
 0x1bf   : > { %3202 = vmatprep.subr.bf16.mxu0 %v10070_v33  ;;  %3243 = vmatprep.subr.bf16.mxu1 %v10072_v34  ;;  %v10076_v38 = vld [vmem:[%s11796_s21 + $0x194] ss:$200 sps:$4 sm:$0xff]   ;;  %v10080_v40 = vld [vmem:[%s11796_s21 + $0x190] ss:$200 sps:$4 sm:$0xff]   ;;  %v10082_v42 = vld [vmem:[%s11796_s21 + $0x324] ss:$200 sps:$4 sm:$0xff]  }
 0x1c0   : > { %3203 = vmatpush1.bf16.msra.mxu0 %v10074_v36  ;;  %3244 = vmatpush1.bf16.msra.mxu1 %v10075_v37  ;;  %v10081_v41 = vld [vmem:[%s11796_s21 + $0x198] ss:$200 sps:$4 sm:$0xff]   ;;  %v10084_v43 = vld [vmem:[%s11796_s21 + $0x32c] ss:$200 sps:$4 sm:$0xff]   ;;  %v10087_v45 = vld [vmem:[%s11796_s21 + $0x328] ss:$200 sps:$4 sm:$0xff]  }
 0x1c1   : > { %3204 = vmatprep.subr.bf16.mxu0 %v10076_v38  ;;  %3245 = vmatprep.subr.bf16.mxu1 %v10078_v39  ;;  %v10086_v44 = vld [vmem:[%s11796_s21 + $0x320] ss:$200 sps:$4 sm:$0xff]   ;;  %v10088_v46 = vld [vmem:[%s11796_s21 + $0x4b4] ss:$200 sps:$4 sm:$0xff]   ;;  %v10092_v48 = vld [vmem:[%s11796_s21 + $0x4b0] ss:$200 sps:$4 sm:$0xff]  }
 0x1c2   : > { %v10090_v47 = vld [vmem:[%s11796_s21 + $0x4bc] ss:$200 sps:$4 sm:$0xff]   ;;  %v10093_v49 = vld [vmem:[%s11796_s21 + $0x4b8] ss:$200 sps:$4 sm:$0xff]   ;;  %v10096_v51 = vld [vmem:[%s11796_s21 + $0x64c] ss:$200 sps:$4 sm:$0xff]  }
 0x1c3   : > { %v10094_v50 = vld [vmem:[%s11796_s21 + $0x644] ss:$200 sps:$4 sm:$0xff]   ;;  %v10098_v52 = vld [vmem:[%s11796_s21 + $0x640] ss:$200 sps:$4 sm:$0xff]   ;;  %v10100_v54 = vld [vmem:[%s11796_s21 + $0x7d4] ss:$200 sps:$4 sm:$0xff]  }
 0x1c4   : > { %3205 = vmatpush1.bf16.msra.mxu0 %v10080_v40  ;;  %3246 = vmatpush1.bf16.msra.mxu1 %v10081_v41  ;;  %v10099_v53 = vld [vmem:[%s11796_s21 + $0x648] ss:$200 sps:$4 sm:$0xff]   ;;  %v10102_v55 = vld [vmem:[%s11796_s21 + $0x7dc] ss:$200 sps:$4 sm:$0xff]   ;;  %v10105_v59 = vld [vmem:[%s11796_s21 + $0x7d8] ss:$200 sps:$4 sm:$0xff]  }
 0x1c5   : > { %3206 = vmatprep.subr.bf16.mxu0 %v10082_v42  ;;  %3247 = vmatprep.subr.bf16.mxu1 %v10084_v43  ;;  %v1397_v56 = vld [vmem:[%s11796_s21 + $0x960] sm:$0x33]  ;;  %v1398_v57 = vld [vmem:[%s11796_s21 + $0x968] sm:$0x33]  ;;  %v10104_v58 = vld [vmem:[%s11796_s21 + $0x7d0] ss:$200 sps:$4 sm:$0xff]  }
 0x1c6   : > { %v8891_v60 = vcombine.high %v1397_v56, %v1397_v56  ;;  %v8893_v61 = vcombine.high %v1398_v57, %v1398_v57  ;;  %v8890_v62 = vcombine.low %v1397_v56, %v1397_v56  ;;  %v8892_v63 = vcombine.low %v1398_v57, %v1398_v57  ;;  %v10112_v0 = vld [vmem:[%s11796_s21 + $0x14] ss:$200 sps:$4 sm:$0xff]   ;;  %v10110_v5 = vld [vmem:[%s11796_s21 + $0x10] ss:$200 sps:$4 sm:$0xff]   ;;  %v10118_v7 = vld [vmem:[%s11796_s21 + $0x1a4] ss:$200 sps:$4 sm:$0xff]  }
 0x1c7   : > { %v10115_v3 = vld [vmem:[%s11796_s21 + $0x1c] ss:$200 sps:$4 sm:$0xff]   ;;  %vm3047_vm6 = vcmask 818176   ;;  %v10113_v6 = vld [vmem:[%s11796_s21 + $0x18] ss:$200 sps:$4 sm:$0xff]   ;;  %vm8479_vm7 = vcmask 74752  }
 0x1c8   : > { %3207 = vmatpush1.bf16.msra.mxu0 %v10086_v44  ;;  %3248 = vmatpush1.bf16.msra.mxu1 %v10087_v45  ;;  %v3053_v1 = vsel %vm3051_vm5, %v8890_v62, 0  ;;  %v3059_v2 = vsel %vm3051_vm5, %v8892_v63, 0  ;;  %v11882_v4 = vld [vmem:[#allocation2] sm:$0x1]  ;;  %v10116_v9 = vld [vmem:[%s11796_s21 + $0x1a0] ss:$200 sps:$4 sm:$0xff]  }
 0x1c9   : > { %3208 = vmatprep.subr.bf16.mxu0 %v10088_v46  ;;  %3249 = vmatprep.subr.bf16.mxu1 %v10090_v47  ;;  %v10121_v8 = vld [vmem:[%s11796_s21 + $0x1ac] ss:$200 sps:$4 sm:$0xff]   ;;  %v10119_v10 = vld [vmem:[%s11796_s21 + $0x1a8] ss:$200 sps:$4 sm:$0xff]   ;;  %v10127_v12 = vld [vmem:[%s11796_s21 + $0x33c] ss:$200 sps:$4 sm:$0xff]  }
 0x1ca   : > { %v10124_v11 = vld [vmem:[%s11796_s21 + $0x334] ss:$200 sps:$4 sm:$0xff]   ;;  %v10122_v13 = vld [vmem:[%s11796_s21 + $0x330] ss:$200 sps:$4 sm:$0xff]   ;;  %v10130_v15 = vld [vmem:[%s11796_s21 + $0x4c4] ss:$200 sps:$4 sm:$0xff]  }
 0x1cb   : > { %v10125_v14 = vld [vmem:[%s11796_s21 + $0x338] ss:$200 sps:$4 sm:$0xff]   ;;  %v10133_v16 = vld [vmem:[%s11796_s21 + $0x4cc] ss:$200 sps:$4 sm:$0xff]   ;;  %v10131_v18 = vld [vmem:[%s11796_s21 + $0x4c8] ss:$200 sps:$4 sm:$0xff]  }
 0x1cc   : > { %3209 = vmatpush1.bf16.msra.mxu0 %v10092_v48  ;;  %3250 = vmatpush1.bf16.msra.mxu1 %v10093_v49  ;;  %v10128_v17 = vld [vmem:[%s11796_s21 + $0x4c0] ss:$200 sps:$4 sm:$0xff]   ;;  %v10136_v19 = vld [vmem:[%s11796_s21 + $0x654] ss:$200 sps:$4 sm:$0xff]   ;;  %v10134_v21 = vld [vmem:[%s11796_s21 + $0x650] ss:$200 sps:$4 sm:$0xff]  }
 0x1cd   : > { %3210 = vmatprep.subr.bf16.mxu0 %v10094_v50  ;;  %3251 = vmatprep.subr.bf16.mxu1 %v10096_v51  ;;  %v10139_v20 = vld [vmem:[%s11796_s21 + $0x65c] ss:$200 sps:$4 sm:$0xff]   ;;  %v10137_v22 = vld [vmem:[%s11796_s21 + $0x658] ss:$200 sps:$4 sm:$0xff]   ;;  %v10145_v24 = vld [vmem:[%s11796_s21 + $0x7ec] ss:$200 sps:$4 sm:$0xff]  }
 0x1ce   : > { %v10142_v23 = vld [vmem:[%s11796_s21 + $0x7e4] ss:$200 sps:$4 sm:$0xff]   ;;  %v1399_v25 = vld [vmem:[%s11796_s21 + $0x970] sm:$0x33]  ;;  %v1400_v26 = vld [vmem:[%s11796_s21 + $0x978] sm:$0x33] }
 0x1cf   : > { %v10140_v27 = vld [vmem:[%s11796_s21 + $0x7e0] ss:$200 sps:$4 sm:$0xff]   ;;  %v8895_v29 = vcombine.high %v1399_v25, %v1399_v25  ;;  %v8897_v30 = vcombine.high %v1400_v26, %v1400_v26  ;;  %v8894_v31 = vcombine.low %v1399_v25, %v1399_v25  ;;  %v8896_v32 = vcombine.low %v1400_v26, %v1400_v26  ;;  %v10152_v33 = vld [vmem:[%s11796_s21 + $0x24] ss:$200 sps:$4 sm:$0xff]   ;;  %v10158_v40 = vld [vmem:[%s11796_s21 + $0x1b4] ss:$200 sps:$4 sm:$0xff]  }
 0x1d0   : > { %3211 = vmatpush1.bf16.msra.mxu0 %v10098_v52  ;;  %3252 = vmatpush1.bf16.msra.mxu1 %v10099_v53  ;;  %v10143_v28 = vld [vmem:[%s11796_s21 + $0x7e8] ss:$200 sps:$4 sm:$0xff]   ;;  %v10155_v37 = vld [vmem:[%s11796_s21 + $0x2c] ss:$200 sps:$4 sm:$0xff]   ;;  %v10161_v41 = vld [vmem:[%s11796_s21 + $0x1bc] ss:$200 sps:$4 sm:$0xff]  }
 0x1d1   : > { %3212 = vmatprep.subr.bf16.mxu0 %v10100_v54  ;;  %3253 = vmatprep.subr.bf16.mxu1 %v10102_v55  ;;  %v3065_v34 = vsel %vm3051_vm5, %v8894_v31, 0  ;;  %v3071_v36 = vsel %vm3051_vm5, %v8896_v32, 0  ;;  %v10150_v38 = vld [vmem:[%s11796_s21 + $0x20] ss:$200 sps:$4 sm:$0xff]   ;;  %v10156_v42 = vld [vmem:[%s11796_s21 + $0x1b0] ss:$200 sps:$4 sm:$0xff]  }
 0x1d2   : > { %v10153_v39 = vld [vmem:[%s11796_s21 + $0x28] ss:$200 sps:$4 sm:$0xff]   ;;  %v10159_v43 = vld [vmem:[%s11796_s21 + $0x1b8] ss:$200 sps:$4 sm:$0xff]   ;;  %v10164_v44 = vld [vmem:[%s11796_s21 + $0x344] ss:$200 sps:$4 sm:$0xff]  }
 0x1d3   : > { %v10167_v45 = vld [vmem:[%s11796_s21 + $0x34c] ss:$200 sps:$4 sm:$0xff]   ;;  %v10162_v46 = vld [vmem:[%s11796_s21 + $0x340] ss:$200 sps:$4 sm:$0xff]   ;;  %v10173_v49 = vld [vmem:[%s11796_s21 + $0x4dc] ss:$200 sps:$4 sm:$0xff]  }
 0x1d4   : > { %3213 = vmatpush1.bf16.msra.mxu0 %v10104_v58  ;;  %3254 = vmatpush1.bf16.msra.mxu1 %v10105_v59  ;;  %v10165_v47 = vld [vmem:[%s11796_s21 + $0x348] ss:$200 sps:$4 sm:$0xff]   ;;  %v10170_v48 = vld [vmem:[%s11796_s21 + $0x4d4] ss:$200 sps:$4 sm:$0xff]   ;;  %v10171_v51 = vld [vmem:[%s11796_s21 + $0x4d8] ss:$200 sps:$4 sm:$0xff]  }
 0x1d5   : > { %8940 = vmatprep.subr.msk.bf16.mxu0 %vm3051_vm5, %v8891_v60  ;;  %8942 = vmatprep.subr.msk.bf16.mxu1 %vm3051_vm5, %v8893_v61  ;;  %v10168_v50 = vld [vmem:[%s11796_s21 + $0x4d0] ss:$200 sps:$4 sm:$0xff]   ;;  %v10176_v52 = vld [vmem:[%s11796_s21 + $0x664] ss:$200 sps:$4 sm:$0xff]   ;;  %v10174_v54 = vld [vmem:[%s11796_s21 + $0x660] ss:$200 sps:$4 sm:$0xff]  }
 0x1d6   : > { %v10179_v53 = vld [vmem:[%s11796_s21 + $0x66c] ss:$200 sps:$4 sm:$0xff]   ;;  %v10177_v55 = vld [vmem:[%s11796_s21 + $0x668] ss:$200 sps:$4 sm:$0xff]   ;;  %v10185_v57 = vld [vmem:[%s11796_s21 + $0x7fc] ss:$200 sps:$4 sm:$0xff]  }
 0x1d7   : > { %v10182_v56 = vld [vmem:[%s11796_s21 + $0x7f4] ss:$200 sps:$4 sm:$0xff]   ;;  %v1401_v58 = vld [vmem:[%s11796_s21 + $0x980] sm:$0x33]  ;;  %v1402_v59 = vld [vmem:[%s11796_s21 + $0x988] sm:$0x33] }
 0x1d8   : > { %3215 = vmatpush1.bf16.msra.mxu0 %v3053_v1  ;;  %3256 = vmatpush1.bf16.msra.mxu1 %v3059_v2  ;;  %v10180_v60 = vld [vmem:[%s11796_s21 + $0x7f0] ss:$200 sps:$4 sm:$0xff]   ;;  %v8899_v62 = vcombine.high %v1401_v58, %v1401_v58  ;;  %v8901_v63 = vcombine.high %v1402_v59, %v1402_v59  ;;  %v8900_v1 = vcombine.low %v1402_v59, %v1402_v59  ;;  %v10192_v2 = vld [vmem:[%s11796_s21 + $0x34] ss:$200 sps:$4 sm:$0xff]   ;;  %v10222_v25 = vld [vmem:[%s11796_s21 + $0x804] ss:$200 sps:$4 sm:$0xff]  }
 0x1d9   : > { %3284 = vmatprep.subr.bf16.mxu0 %v10112_v0  ;;  %3325 = vmatprep.subr.bf16.mxu1 %v10115_v3  ;;  %v10183_v61 = vld [vmem:[%s11796_s21 + $0x7f8] ss:$200 sps:$4 sm:$0xff]   ;;  %v8898_v0 = vcombine.low %v1401_v58, %v1401_v58  ;;  %v10225_v26 = vld [vmem:[%s11796_s21 + $0x80c] ss:$200 sps:$4 sm:$0xff]   ;;  %v10265_v59 = vld [vmem:[%s11796_s21 + $0x81c] ss:$200 sps:$4 sm:$0xff]  }
 0x1da   : > { %v10262_v58 = vld [vmem:[%s11796_s21 + $0x814] ss:$200 sps:$4 sm:$0xff]   ;;  %p9390_p0 = scmp.ne.s32.totalorder %s11010_s23, 1 }
 0x1db   : > { %8941 = vmatmul.mubr.msk.bf16.vlgmr.msra.gmra.mrb[0].mxu0 %vm3047_vm6, %v11882_v4  ;;  %8943 = vmatmul.mubr.msk.bf16.vlgmr.msra.gmra.mrb[0].mxu1 %vm3047_vm6, %v11882_v4  ;;  %v3077_v3 = vsel %vm3051_vm5, %v8898_v0, 0 }
 0x1dc   : > { %3285 = vmatpush1.bf16.msra.mxu0 %v10110_v5  ;;  %3326 = vmatpush1.bf16.msra.mxu1 %v10113_v6  ;;  %v3083_v5 = vsel %vm3051_vm5, %v8900_v1, 0  ;;  %v10195_v6 = vld [vmem:[%s11796_s21 + $0x3c] ss:$200 sps:$4 sm:$0xff]  }
 0x1dd   : > { %3286 = vmatprep.subr.bf16.mxu0 %v10118_v7  ;;  %3327 = vmatprep.subr.bf16.mxu1 %v10121_v8  ;;  %v10190_v7 = vld [vmem:[%s11796_s21 + $0x30] ss:$200 sps:$4 sm:$0xff]  }
 0x1de   : > { %3316 = vmatprep.mubr.bf16.mxu0 %v11031_v35  ;;  %3357 = vmatprep.mubr.bf16.mxu1 %v11031_v35  ;;  %v10193_v8 = vld [vmem:[%s11796_s21 + $0x38] ss:$200 sps:$4 sm:$0xff]  }
 0x1e0   : > { %3287 = vmatpush1.bf16.msra.mxu0 %v10116_v9  ;;  %3328 = vmatpush1.bf16.msra.mxu1 %v10119_v10  ;;  %v10198_v9 = vld [vmem:[%s11796_s21 + $0x1c4] ss:$200 sps:$4 sm:$0xff]  }
 0x1e1   : > { %3288 = vmatprep.subr.bf16.mxu0 %v10124_v11  ;;  %3329 = vmatprep.subr.bf16.mxu1 %v10127_v12  ;;  %v10201_v10 = vld [vmem:[%s11796_s21 + $0x1cc] ss:$200 sps:$4 sm:$0xff]   ;;  %v10196_v11 = vld [vmem:[%s11796_s21 + $0x1c0] ss:$200 sps:$4 sm:$0xff]  }
 0x1e2   : > { %v10199_v12 = vld [vmem:[%s11796_s21 + $0x1c8] ss:$200 sps:$4 sm:$0xff]  }
 0x1e4   : > { %3289 = vmatpush1.bf16.msra.mxu0 %v10122_v13  ;;  %3330 = vmatpush1.bf16.msra.mxu1 %v10125_v14  ;;  %v10204_v13 = vld [vmem:[%s11796_s21 + $0x354] ss:$200 sps:$4 sm:$0xff]  }
 0x1e5   : > { %3290 = vmatprep.subr.bf16.mxu0 %v10130_v15  ;;  %3331 = vmatprep.subr.bf16.mxu1 %v10133_v16  ;;  %v10207_v14 = vld [vmem:[%s11796_s21 + $0x35c] ss:$200 sps:$4 sm:$0xff]   ;;  %v10202_v15 = vld [vmem:[%s11796_s21 + $0x350] ss:$200 sps:$4 sm:$0xff]  }
 0x1e6   : > { %v10205_v16 = vld [vmem:[%s11796_s21 + $0x358] ss:$200 sps:$4 sm:$0xff]  }
 0x1e8   : > { %3291 = vmatpush1.bf16.msra.mxu0 %v10128_v17  ;;  %3332 = vmatpush1.bf16.msra.mxu1 %v10131_v18  ;;  %v10210_v17 = vld [vmem:[%s11796_s21 + $0x4e4] ss:$200 sps:$4 sm:$0xff]  }
 0x1e9   : > { %3292 = vmatprep.subr.bf16.mxu0 %v10136_v19  ;;  %3333 = vmatprep.subr.bf16.mxu1 %v10139_v20  ;;  %v10213_v18 = vld [vmem:[%s11796_s21 + $0x4ec] ss:$200 sps:$4 sm:$0xff]   ;;  %v10208_v19 = vld [vmem:[%s11796_s21 + $0x4e0] ss:$200 sps:$4 sm:$0xff]  }
 0x1ea   : > { %v10211_v20 = vld [vmem:[%s11796_s21 + $0x4e8] ss:$200 sps:$4 sm:$0xff]  }
 0x1ec   : > { %3293 = vmatpush1.bf16.msra.mxu0 %v10134_v21  ;;  %3334 = vmatpush1.bf16.msra.mxu1 %v10137_v22  ;;  %v10216_v21 = vld [vmem:[%s11796_s21 + $0x674] ss:$200 sps:$4 sm:$0xff]  }
 0x1ed   : > { %3294 = vmatprep.subr.bf16.mxu0 %v10142_v23  ;;  %3335 = vmatprep.subr.bf16.mxu1 %v10145_v24  ;;  %v10219_v22 = vld [vmem:[%s11796_s21 + $0x67c] ss:$200 sps:$4 sm:$0xff]   ;;  %v10214_v23 = vld [vmem:[%s11796_s21 + $0x670] ss:$200 sps:$4 sm:$0xff]  }
 0x1ee   : > { %v10217_v24 = vld [vmem:[%s11796_s21 + $0x678] ss:$200 sps:$4 sm:$0xff]  }
 0x1f0   : > { %3295 = vmatpush1.bf16.msra.mxu0 %v10140_v27  ;;  %3336 = vmatpush1.bf16.msra.mxu1 %v10143_v28  ;;  %v1403_v27 = vld [vmem:[%s11796_s21 + $0x990] sm:$0x33]  ;;  %v1404_v28 = vld [vmem:[%s11796_s21 + $0x998] sm:$0x33] }
 0x1f1   : > { %8944 = vmatprep.subr.msk.bf16.mxu0 %vm3051_vm5, %v8895_v29  ;;  %8946 = vmatprep.subr.msk.bf16.mxu1 %vm3051_vm5, %v8897_v30  ;;  %v10220_v29 = vld [vmem:[%s11796_s21 + $0x800] ss:$200 sps:$4 sm:$0xff]   ;;  %v8903_v31 = vcombine.high %v1403_v27, %v1403_v27  ;;  %v8905_v32 = vcombine.high %v1404_v28, %v1404_v28 }
 0x1f2   : > { %v10223_v30 = vld [vmem:[%s11796_s21 + $0x808] ss:$200 sps:$4 sm:$0xff]  }
 0x1f4   : > { %3297 = vmatpush1.bf16.msra.mxu0 %v3065_v34  ;;  %3338 = vmatpush1.bf16.msra.mxu1 %v3071_v36  ;;  %v8904_v34 = vcombine.low %v1404_v28, %v1404_v28  ;;  %v10232_v36 = vld [vmem:[%s11796_s21 + $0x44] ss:$200 sps:$4 sm:$0xff]   ;;  %v1407_v28 = vld [vmem:[%s11796_s21 + $0x9b0] sm:$0x33] }
 0x1f5   : > { %3366 = vmatprep.subr.bf16.mxu0 %v10152_v33  ;;  %3407 = vmatprep.subr.bf16.mxu1 %v10155_v37  ;;  %v8902_v33 = vcombine.low %v1403_v27, %v1403_v27  ;;  %v10305_v27 = vld [vmem:[%s11796_s21 + $0x82c] ss:$200 sps:$4 sm:$0xff]  }
 0x1f7   : > { %8945 = vmatmul.mubr.msk.bf16.vlgmr.msra.gmra.mrb[4].mxu0 %vm3047_vm6, %v11882_v4  ;;  %8947 = vmatmul.mubr.msk.bf16.vlgmr.msra.gmra.mrb[4].mxu1 %vm3047_vm6, %v11882_v4  ;;  %v3089_v37 = vsel %vm3051_vm5, %v8902_v33, 0 }
 0x1f8   : > { %3367 = vmatpush1.bf16.msra.mxu0 %v10150_v38  ;;  %3408 = vmatpush1.bf16.msra.mxu1 %v10153_v39  ;;  %v3095_v38 = vsel %vm3051_vm5, %v8904_v34, 0  ;;  %v10235_v39 = vld [vmem:[%s11796_s21 + $0x4c] ss:$200 sps:$4 sm:$0xff]   ;;  %v8910_v34 = vcombine.low %v1407_v28, %v1407_v28 }
 0x1f9   : > { %3368 = vmatprep.subr.bf16.mxu0 %v10158_v40  ;;  %3409 = vmatprep.subr.bf16.mxu1 %v10161_v41  ;;  %v10230_v40 = vld [vmem:[%s11796_s21 + $0x40] ss:$200 sps:$4 sm:$0xff]  }
 0x1fa   : > { %3398 = vmatprep.mubr.bf16.mxu0 %v11031_v35  ;;  %3439 = vmatprep.mubr.bf16.mxu1 %v11031_v35  ;;  %v10233_v41 = vld [vmem:[%s11796_s21 + $0x48] ss:$200 sps:$4 sm:$0xff]  }
 0x1fc   : > { %3369 = vmatpush1.bf16.msra.mxu0 %v10156_v42  ;;  %3410 = vmatpush1.bf16.msra.mxu1 %v10159_v43  ;;  %v10238_v42 = vld [vmem:[%s11796_s21 + $0x1d4] ss:$200 sps:$4 sm:$0xff]  }
 0x1fd   : > { %3370 = vmatprep.subr.bf16.mxu0 %v10164_v44  ;;  %3411 = vmatprep.subr.bf16.mxu1 %v10167_v45  ;;  %v10241_v43 = vld [vmem:[%s11796_s21 + $0x1dc] ss:$200 sps:$4 sm:$0xff]   ;;  %v10236_v44 = vld [vmem:[%s11796_s21 + $0x1d0] ss:$200 sps:$4 sm:$0xff]  }
 0x1fe   : > { %v10239_v45 = vld [vmem:[%s11796_s21 + $0x1d8] ss:$200 sps:$4 sm:$0xff]  }
 0x200   : > { %3371 = vmatpush1.bf16.msra.mxu0 %v10162_v46  ;;  %3412 = vmatpush1.bf16.msra.mxu1 %v10165_v47  ;;  %v10244_v46 = vld [vmem:[%s11796_s21 + $0x364] ss:$200 sps:$4 sm:$0xff]  }
 0x201   : > { %3372 = vmatprep.subr.bf16.mxu0 %v10170_v48  ;;  %3413 = vmatprep.subr.bf16.mxu1 %v10173_v49  ;;  %v10247_v47 = vld [vmem:[%s11796_s21 + $0x36c] ss:$200 sps:$4 sm:$0xff]   ;;  %v10242_v48 = vld [vmem:[%s11796_s21 + $0x360] ss:$200 sps:$4 sm:$0xff]  }
 0x202   : > { %v10245_v49 = vld [vmem:[%s11796_s21 + $0x368] ss:$200 sps:$4 sm:$0xff]  }
 0x204   : > { %3373 = vmatpush1.bf16.msra.mxu0 %v10168_v50  ;;  %3414 = vmatpush1.bf16.msra.mxu1 %v10171_v51  ;;  %v10250_v50 = vld [vmem:[%s11796_s21 + $0x4f4] ss:$200 sps:$4 sm:$0xff]  }
 0x205   : > { %3374 = vmatprep.subr.bf16.mxu0 %v10176_v52  ;;  %3415 = vmatprep.subr.bf16.mxu1 %v10179_v53  ;;  %v10253_v51 = vld [vmem:[%s11796_s21 + $0x4fc] ss:$200 sps:$4 sm:$0xff]   ;;  %v10248_v52 = vld [vmem:[%s11796_s21 + $0x4f0] ss:$200 sps:$4 sm:$0xff]  }
 0x206   : > { %v10251_v53 = vld [vmem:[%s11796_s21 + $0x4f8] ss:$200 sps:$4 sm:$0xff]  }
 0x208   : > { %3375 = vmatpush1.bf16.msra.mxu0 %v10174_v54  ;;  %3416 = vmatpush1.bf16.msra.mxu1 %v10177_v55  ;;  %v10256_v54 = vld [vmem:[%s11796_s21 + $0x684] ss:$200 sps:$4 sm:$0xff]  }
 0x209   : > { %3376 = vmatprep.subr.bf16.mxu0 %v10182_v56  ;;  %3417 = vmatprep.subr.bf16.mxu1 %v10185_v57  ;;  %v10259_v55 = vld [vmem:[%s11796_s21 + $0x68c] ss:$200 sps:$4 sm:$0xff]   ;;  %v10254_v56 = vld [vmem:[%s11796_s21 + $0x680] ss:$200 sps:$4 sm:$0xff]  }
 0x20a   : > { %v10257_v57 = vld [vmem:[%s11796_s21 + $0x688] ss:$200 sps:$4 sm:$0xff]  }
 0x20c   : > { %3377 = vmatpush1.bf16.msra.mxu0 %v10180_v60  ;;  %3418 = vmatpush1.bf16.msra.mxu1 %v10183_v61  ;;  %v1405_v60 = vld [vmem:[%s11796_s21 + $0x9a0] sm:$0x33]  ;;  %v1406_v61 = vld [vmem:[%s11796_s21 + $0x9a8] sm:$0x33] }
 0x20d   : > { %8948 = vmatprep.subr.msk.bf16.mxu0 %vm3051_vm5, %v8899_v62  ;;  %8950 = vmatprep.subr.msk.bf16.mxu1 %vm3051_vm5, %v8901_v63  ;;  %v10260_v62 = vld [vmem:[%s11796_s21 + $0x810] ss:$200 sps:$4 sm:$0xff]   ;;  %v8907_v0 = vcombine.high %v1405_v60, %v1405_v60  ;;  %v8909_v1 = vcombine.high %v1406_v61, %v1406_v61 }
 0x20e   : > { %v10263_v63 = vld [vmem:[%s11796_s21 + $0x818] ss:$200 sps:$4 sm:$0xff]  }
 0x210   : > { %3379 = vmatpush1.bf16.msra.mxu0 %v3077_v3  ;;  %3420 = vmatpush1.bf16.msra.mxu1 %v3083_v5  ;;  %v8908_v3 = vcombine.low %v1406_v61, %v1406_v61  ;;  %v10272_v5 = vld [vmem:[%s11796_s21 + $0x54] ss:$200 sps:$4 sm:$0xff]  }
 0x211   : > { %3448 = vmatprep.subr.bf16.mxu0 %v10192_v2  ;;  %3489 = vmatprep.subr.bf16.mxu1 %v10195_v6  ;;  %v8906_v2 = vcombine.low %v1405_v60, %v1405_v60  ;;  %v10342_v60 = vld [vmem:[%s11796_s21 + $0x834] ss:$200 sps:$4 sm:$0xff]  }
 0x212   : > { %v10345_v61 = vld [vmem:[%s11796_s21 + $0x83c] ss:$200 sps:$4 sm:$0xff]  }
 0x213   : > { %8949 = vmatmul.mubr.msk.bf16.vlgmr.msra.gmra.mrb[8].mxu0 %vm3047_vm6, %v11882_v4  ;;  %8951 = vmatmul.mubr.msk.bf16.vlgmr.msra.gmra.mrb[8].mxu1 %vm3047_vm6, %v11882_v4  ;;  %v3101_v6 = vsel %vm3051_vm5, %v8906_v2, 0 }
 0x214   : > { %3449 = vmatpush1.bf16.msra.mxu0 %v10190_v7  ;;  %3490 = vmatpush1.bf16.msra.mxu1 %v10193_v8  ;;  %v3107_v7 = vsel %vm3051_vm5, %v8908_v3, 0  ;;  %v10275_v8 = vld [vmem:[%s11796_s21 + $0x5c] ss:$200 sps:$4 sm:$0xff]  }
 0x215   : > { %3450 = vmatprep.subr.bf16.mxu0 %v10198_v9  ;;  %3491 = vmatprep.subr.bf16.mxu1 %v10201_v10  ;;  %v10270_v9 = vld [vmem:[%s11796_s21 + $0x50] ss:$200 sps:$4 sm:$0xff]  }
 0x216   : > { %3480 = vmatprep.mubr.bf16.mxu0 %v11031_v35  ;;  %3521 = vmatprep.mubr.bf16.mxu1 %v11031_v35  ;;  %v10273_v10 = vld [vmem:[%s11796_s21 + $0x58] ss:$200 sps:$4 sm:$0xff]  }
 0x218   : > { %3451 = vmatpush1.bf16.msra.mxu0 %v10196_v11  ;;  %3492 = vmatpush1.bf16.msra.mxu1 %v10199_v12  ;;  %v10278_v11 = vld [vmem:[%s11796_s21 + $0x1e4] ss:$200 sps:$4 sm:$0xff]  }
 0x219   : > { %3452 = vmatprep.subr.bf16.mxu0 %v10204_v13  ;;  %3493 = vmatprep.subr.bf16.mxu1 %v10207_v14  ;;  %v10281_v12 = vld [vmem:[%s11796_s21 + $0x1ec] ss:$200 sps:$4 sm:$0xff]   ;;  %v10276_v13 = vld [vmem:[%s11796_s21 + $0x1e0] ss:$200 sps:$4 sm:$0xff]  }
 0x21a   : > { %v10279_v14 = vld [vmem:[%s11796_s21 + $0x1e8] ss:$200 sps:$4 sm:$0xff]  }
 0x21c   : > { %3453 = vmatpush1.bf16.msra.mxu0 %v10202_v15  ;;  %3494 = vmatpush1.bf16.msra.mxu1 %v10205_v16  ;;  %v10284_v15 = vld [vmem:[%s11796_s21 + $0x374] ss:$200 sps:$4 sm:$0xff]  }
 0x21d   : > { %3454 = vmatprep.subr.bf16.mxu0 %v10210_v17  ;;  %3495 = vmatprep.subr.bf16.mxu1 %v10213_v18  ;;  %v10287_v16 = vld [vmem:[%s11796_s21 + $0x37c] ss:$200 sps:$4 sm:$0xff]   ;;  %v10282_v17 = vld [vmem:[%s11796_s21 + $0x370] ss:$200 sps:$4 sm:$0xff]  }
 0x21e   : > { %v10290_v18 = vld [vmem:[%s11796_s21 + $0x504] ss:$200 sps:$4 sm:$0xff]  }
 0x220   : > { %3455 = vmatpush1.bf16.msra.mxu0 %v10208_v19  ;;  %3496 = vmatpush1.bf16.msra.mxu1 %v10211_v20  ;;  %v10293_v19 = vld [vmem:[%s11796_s21 + $0x50c] ss:$200 sps:$4 sm:$0xff]   ;;  %v10288_v20 = vld [vmem:[%s11796_s21 + $0x500] ss:$200 sps:$4 sm:$0xff]  }
 0x221   : > { %3456 = vmatprep.subr.bf16.mxu0 %v10216_v21  ;;  %3497 = vmatprep.subr.bf16.mxu1 %v10219_v22  ;;  %v10291_v21 = vld [vmem:[%s11796_s21 + $0x508] ss:$200 sps:$4 sm:$0xff]   ;;  %v10296_v22 = vld [vmem:[%s11796_s21 + $0x694] ss:$200 sps:$4 sm:$0xff]  }
 0x224   : > { %3457 = vmatpush1.bf16.msra.mxu0 %v10214_v23  ;;  %3498 = vmatpush1.bf16.msra.mxu1 %v10217_v24  ;;  %v10299_v23 = vld [vmem:[%s11796_s21 + $0x69c] ss:$200 sps:$4 sm:$0xff]   ;;  %v10294_v24 = vld [vmem:[%s11796_s21 + $0x690] ss:$200 sps:$4 sm:$0xff]  }
 0x225   : > { %3458 = vmatprep.subr.bf16.mxu0 %v10222_v25  ;;  %3499 = vmatprep.subr.bf16.mxu1 %v10225_v26  ;;  %v10297_v25 = vld [vmem:[%s11796_s21 + $0x698] ss:$200 sps:$4 sm:$0xff]   ;;  %v10302_v26 = vld [vmem:[%s11796_s21 + $0x824] ss:$200 sps:$4 sm:$0xff]  }
 0x228   : > { %3459 = vmatpush1.bf16.msra.mxu0 %v10220_v29  ;;  %3500 = vmatpush1.bf16.msra.mxu1 %v10223_v30  ;;  %v1408_v29 = vld [vmem:[%s11796_s21 + $0x9b8] sm:$0x33]  ;;  %v10300_v30 = vld [vmem:[%s11796_s21 + $0x820] ss:$200 sps:$4 sm:$0xff]  }
 0x229   : > { %8952 = vmatprep.subr.msk.bf16.mxu0 %vm3051_vm5, %v8903_v31  ;;  %8954 = vmatprep.subr.msk.bf16.mxu1 %vm3051_vm5, %v8905_v32  ;;  %v10303_v31 = vld [vmem:[%s11796_s21 + $0x828] ss:$200 sps:$4 sm:$0xff]   ;;  %v8911_v32 = vcombine.high %v1407_v28, %v1407_v28  ;;  %v8913_v33 = vcombine.high %v1408_v29, %v1408_v29  ;;  %v10382_v28 = vld [vmem:[%s11796_s21 + $0x844] ss:$200 sps:$4 sm:$0xff]  }
 0x22c   : > { %3461 = vmatpush1.bf16.msra.mxu0 %v3089_v37  ;;  %3502 = vmatpush1.bf16.msra.mxu1 %v3095_v38  ;;  %v10312_v37 = vld [vmem:[%s11796_s21 + $0x64] ss:$200 sps:$4 sm:$0xff]   ;;  %v3113_v38 = vsel %vm3051_vm5, %v8910_v34, 0 }
 0x22d   : > { %3530 = vmatprep.subr.bf16.mxu0 %v10232_v36  ;;  %3571 = vmatprep.subr.bf16.mxu1 %v10235_v39  ;;  %v8912_v36 = vcombine.low %v1408_v29, %v1408_v29  ;;  %v10385_v29 = vld [vmem:[%s11796_s21 + $0x84c] ss:$200 sps:$4 sm:$0xff]  }
 0x22f   : > { %8953 = vmatmul.mubr.msk.bf16.vlgmr.msra.gmra.mrb[12].mxu0 %vm3047_vm6, %v11882_v4  ;;  %8955 = vmatmul.mubr.msk.bf16.vlgmr.msra.gmra.mrb[12].mxu1 %vm3047_vm6, %v11882_v4  ;;  %v3119_v39 = vsel %vm3051_vm5, %v8912_v36, 0 }
 0x230   : > { %3531 = vmatpush1.bf16.msra.mxu0 %v10230_v40  ;;  %3572 = vmatpush1.bf16.msra.mxu1 %v10233_v41  ;;  %v10315_v40 = vld [vmem:[%s11796_s21 + $0x6c] ss:$200 sps:$4 sm:$0xff]   ;;  %v10310_v41 = vld [vmem:[%s11796_s21 + $0x60] ss:$200 sps:$4 sm:$0xff]  }
 0x231   : > { %3532 = vmatprep.subr.bf16.mxu0 %v10238_v42  ;;  %3573 = vmatprep.subr.bf16.mxu1 %v10241_v43  ;;  %v10313_v42 = vld [vmem:[%s11796_s21 + $0x68] ss:$200 sps:$4 sm:$0xff]   ;;  %v10318_v43 = vld [vmem:[%s11796_s21 + $0x1f4] ss:$200 sps:$4 sm:$0xff]  }
 0x232   : > { %3562 = vmatprep.mubr.bf16.mxu0 %v11031_v35  ;;  %3603 = vmatprep.mubr.bf16.mxu1 %v11031_v35 }
 0x234   : > { %3533 = vmatpush1.bf16.msra.mxu0 %v10236_v44  ;;  %3574 = vmatpush1.bf16.msra.mxu1 %v10239_v45  ;;  %v10321_v44 = vld [vmem:[%s11796_s21 + $0x1fc] ss:$200 sps:$4 sm:$0xff]  }
 0x235   : > { %3534 = vmatprep.subr.bf16.mxu0 %v10244_v46  ;;  %3575 = vmatprep.subr.bf16.mxu1 %v10247_v47  ;;  %v12068_v45 = vld [vmem:[#allocation2] sm:$0x1]  ;;  %v10316_v46 = vld [vmem:[%s11796_s21 + $0x1f0] ss:$200 sps:$4 sm:$0xff]  }
 0x236   : > { %v10319_v47 = vld [vmem:[%s11796_s21 + $0x1f8] ss:$200 sps:$4 sm:$0xff]  }
 0x238   : > { %3535 = vmatpush1.bf16.msra.mxu0 %v10242_v48  ;;  %3576 = vmatpush1.bf16.msra.mxu1 %v10245_v49  ;;  %v10324_v48 = vld [vmem:[%s11796_s21 + $0x384] ss:$200 sps:$4 sm:$0xff]  }
 0x239   : > { %3536 = vmatprep.subr.bf16.mxu0 %v10250_v50  ;;  %3577 = vmatprep.subr.bf16.mxu1 %v10253_v51  ;;  %v10327_v49 = vld [vmem:[%s11796_s21 + $0x38c] ss:$200 sps:$4 sm:$0xff]   ;;  %v10322_v50 = vld [vmem:[%s11796_s21 + $0x380] ss:$200 sps:$4 sm:$0xff]  }
 0x23a   : > { %v10325_v51 = vld [vmem:[%s11796_s21 + $0x388] ss:$200 sps:$4 sm:$0xff]  }
 0x23c   : > { %3537 = vmatpush1.bf16.msra.mxu0 %v10248_v52  ;;  %3578 = vmatpush1.bf16.msra.mxu1 %v10251_v53  ;;  %v10330_v52 = vld [vmem:[%s11796_s21 + $0x514] ss:$200 sps:$4 sm:$0xff]  }
 0x23d   : > { %3538 = vmatprep.subr.bf16.mxu0 %v10256_v54  ;;  %3579 = vmatprep.subr.bf16.mxu1 %v10259_v55  ;;  %v10333_v53 = vld [vmem:[%s11796_s21 + $0x51c] ss:$200 sps:$4 sm:$0xff]   ;;  %v10328_v54 = vld [vmem:[%s11796_s21 + $0x510] ss:$200 sps:$4 sm:$0xff]  }
 0x23e   : > { %v10331_v55 = vld [vmem:[%s11796_s21 + $0x518] ss:$200 sps:$4 sm:$0xff]  }
 0x240   : > { %3539 = vmatpush1.bf16.msra.mxu0 %v10254_v56  ;;  %3580 = vmatpush1.bf16.msra.mxu1 %v10257_v57  ;;  %v10336_v56 = vld [vmem:[%s11796_s21 + $0x6a4] ss:$200 sps:$4 sm:$0xff]  }
 0x241   : > { %3540 = vmatprep.subr.bf16.mxu0 %v10262_v58  ;;  %3581 = vmatprep.subr.bf16.mxu1 %v10265_v59  ;;  %v10339_v57 = vld [vmem:[%s11796_s21 + $0x6ac] ss:$200 sps:$4 sm:$0xff]   ;;  %v10334_v58 = vld [vmem:[%s11796_s21 + $0x6a0] ss:$200 sps:$4 sm:$0xff]  }
 0x242   : > { %v10337_v59 = vld [vmem:[%s11796_s21 + $0x6a8] ss:$200 sps:$4 sm:$0xff]  }
 0x244   : > { %3541 = vmatpush1.bf16.msra.mxu0 %v10260_v62  ;;  %3582 = vmatpush1.bf16.msra.mxu1 %v10263_v63  ;;  %v1409_v62 = vld [vmem:[%s11796_s21 + $0x9c0] sm:$0x33]  ;;  %v1410_v63 = vld [vmem:[%s11796_s21 + $0x9c8] sm:$0x33] }
 0x245   : > { %8956 = vmatprep.subr.msk.bf16.mxu0 %vm3051_vm5, %v8907_v0  ;;  %8958 = vmatprep.subr.msk.bf16.mxu1 %vm3051_vm5, %v8909_v1  ;;  %v10340_v0 = vld [vmem:[%s11796_s21 + $0x830] ss:$200 sps:$4 sm:$0xff]   ;;  %v8915_v2 = vcombine.high %v1409_v62, %v1409_v62  ;;  %v8917_v3 = vcombine.high %v1410_v63, %v1410_v63 }
 0x246   : > { %v10343_v1 = vld [vmem:[%s11796_s21 + $0x838] ss:$200 sps:$4 sm:$0xff]  }
 0x248   : > { %3543 = vmatpush1.bf16.msra.mxu0 %v3101_v6  ;;  %3584 = vmatpush1.bf16.msra.mxu1 %v3107_v7  ;;  %v8916_v6 = vcombine.low %v1410_v63, %v1410_v63  ;;  %v10352_v7 = vld [vmem:[%s11796_s21 + $0x74] ss:$200 sps:$4 sm:$0xff]  }
 0x249   : > { %3612 = vmatprep.subr.bf16.mxu0 %v10272_v5  ;;  %3653 = vmatprep.subr.bf16.mxu1 %v10275_v8  ;;  %v8914_v5 = vcombine.low %v1409_v62, %v1409_v62  ;;  %v10422_v62 = vld [vmem:[%s11796_s21 + $0x854] ss:$200 sps:$4 sm:$0xff]  }
 0x24a   : > { %v10425_v63 = vld [vmem:[%s11796_s21 + $0x85c] ss:$200 sps:$4 sm:$0xff]  }
 0x24b   : > { %8957 = vmatmul.mubr.msk.bf16.vlgmr.msra.gmra.mrb[16].mxu0 %vm3047_vm6, %v11882_v4  ;;  %8959 = vmatmul.mubr.msk.bf16.vlgmr.msra.gmra.mrb[16].mxu1 %vm3047_vm6, %v11882_v4  ;;  %v10285_v4 = vld [vmem:[%s11796_s21 + $0x378] ss:$200 sps:$4 sm:$0xff]   ;;  %v3125_v8 = vsel %vm3051_vm5, %v8914_v5, 0  ;;  %v1414_v5 = vld [vmem:[%s11796_s21 + $0x9e8] sm:$0x33] }
 0x24c   : > { %3613 = vmatpush1.bf16.msra.mxu0 %v10270_v9  ;;  %3654 = vmatpush1.bf16.msra.mxu1 %v10273_v10  ;;  %v3131_v9 = vsel %vm3051_vm5, %v8916_v6, 0  ;;  %v10355_v10 = vld [vmem:[%s11796_s21 + $0x7c] ss:$200 sps:$4 sm:$0xff]  }
 0x24d   : > { %3614 = vmatprep.subr.bf16.mxu0 %v10278_v11  ;;  %3655 = vmatprep.subr.bf16.mxu1 %v10281_v12  ;;  %v10350_v11 = vld [vmem:[%s11796_s21 + $0x70] ss:$200 sps:$4 sm:$0xff]  }
 0x24e   : > { %3644 = vmatprep.mubr.bf16.mxu0 %v11031_v35  ;;  %3685 = vmatprep.mubr.bf16.mxu1 %v11031_v35  ;;  %v10353_v12 = vld [vmem:[%s11796_s21 + $0x78] ss:$200 sps:$4 sm:$0xff]  }
 0x250   : > { %3615 = vmatpush1.bf16.msra.mxu0 %v10276_v13  ;;  %3656 = vmatpush1.bf16.msra.mxu1 %v10279_v14  ;;  %v10358_v13 = vld [vmem:[%s11796_s21 + $0x204] ss:$200 sps:$4 sm:$0xff]  }
 0x251   : > { %3616 = vmatprep.subr.bf16.mxu0 %v10284_v15  ;;  %3657 = vmatprep.subr.bf16.mxu1 %v10287_v16  ;;  %v10361_v14 = vld [vmem:[%s11796_s21 + $0x20c] ss:$200 sps:$4 sm:$0xff]   ;;  %v10356_v15 = vld [vmem:[%s11796_s21 + $0x200] ss:$200 sps:$4 sm:$0xff]  }
 0x252   : > { %v10359_v16 = vld [vmem:[%s11796_s21 + $0x208] ss:$200 sps:$4 sm:$0xff]  }
 0x254   : > { %3617 = vmatpush1.bf16.msra.mxu0 %v10282_v17  ;;  %3658 = vmatpush1.bf16.msra.mxu1 %v10285_v4  ;;  %v10364_v17 = vld [vmem:[%s11796_s21 + $0x394] ss:$200 sps:$4 sm:$0xff]  }
 0x255   : > { %3618 = vmatprep.subr.bf16.mxu0 %v10290_v18  ;;  %3659 = vmatprep.subr.bf16.mxu1 %v10293_v19  ;;  %v10367_v4 = vld [vmem:[%s11796_s21 + $0x39c] ss:$200 sps:$4 sm:$0xff]   ;;  %v10362_v18 = vld [vmem:[%s11796_s21 + $0x390] ss:$200 sps:$4 sm:$0xff]  }
 0x256   : > { %v10365_v19 = vld [vmem:[%s11796_s21 + $0x398] ss:$200 sps:$4 sm:$0xff]  }
 0x258   : > { %3619 = vmatpush1.bf16.msra.mxu0 %v10288_v20  ;;  %3660 = vmatpush1.bf16.msra.mxu1 %v10291_v21  ;;  %v10370_v20 = vld [vmem:[%s11796_s21 + $0x524] ss:$200 sps:$4 sm:$0xff]  }
 0x259   : > { %3620 = vmatprep.subr.bf16.mxu0 %v10296_v22  ;;  %3661 = vmatprep.subr.bf16.mxu1 %v10299_v23  ;;  %v10373_v21 = vld [vmem:[%s11796_s21 + $0x52c] ss:$200 sps:$4 sm:$0xff]   ;;  %v10368_v22 = vld [vmem:[%s11796_s21 + $0x520] ss:$200 sps:$4 sm:$0xff]  }
 0x25a   : > { %v10371_v23 = vld [vmem:[%s11796_s21 + $0x528] ss:$200 sps:$4 sm:$0xff]  }
 0x25c   : > { %3621 = vmatpush1.bf16.msra.mxu0 %v10294_v24  ;;  %3662 = vmatpush1.bf16.msra.mxu1 %v10297_v25  ;;  %v10376_v24 = vld [vmem:[%s11796_s21 + $0x6b4] ss:$200 sps:$4 sm:$0xff]  }
 0x25d   : > { %3622 = vmatprep.subr.bf16.mxu0 %v10302_v26  ;;  %3663 = vmatprep.subr.bf16.mxu1 %v10305_v27  ;;  %v10379_v25 = vld [vmem:[%s11796_s21 + $0x6bc] ss:$200 sps:$4 sm:$0xff]   ;;  %v10374_v26 = vld [vmem:[%s11796_s21 + $0x6b0] ss:$200 sps:$4 sm:$0xff]  }
 0x25e   : > { %v10377_v27 = vld [vmem:[%s11796_s21 + $0x6b8] ss:$200 sps:$4 sm:$0xff]  }
 0x260   : > { %3623 = vmatpush1.bf16.msra.mxu0 %v10300_v30  ;;  %3664 = vmatpush1.bf16.msra.mxu1 %v10303_v31  ;;  %v1411_v30 = vld [vmem:[%s11796_s21 + $0x9d0] sm:$0x33]  ;;  %v1412_v31 = vld [vmem:[%s11796_s21 + $0x9d8] sm:$0x33] }
 0x261   : > { %8960 = vmatprep.subr.msk.bf16.mxu0 %vm3051_vm5, %v8911_v32  ;;  %8962 = vmatprep.subr.msk.bf16.mxu1 %vm3051_vm5, %v8913_v33  ;;  %v10380_v32 = vld [vmem:[%s11796_s21 + $0x840] ss:$200 sps:$4 sm:$0xff]   ;;  %v8918_v34 = vcombine.low %v1411_v30, %v1411_v30  ;;  %v8920_v36 = vcombine.low %v1412_v31, %v1412_v31 }
 0x262   : > { %v10383_v33 = vld [vmem:[%s11796_s21 + $0x848] ss:$200 sps:$4 sm:$0xff]  }
 0x264   : > { %3625 = vmatpush1.bf16.msra.mxu0 %v3113_v38  ;;  %3666 = vmatpush1.bf16.msra.mxu1 %v3119_v39  ;;  %v8921_v38 = vcombine.high %v1412_v31, %v1412_v31  ;;  %v3137_v39 = vsel %vm3051_vm5, %v8918_v34, 0  ;;  %v10453_v31 = vld [vmem:[%s11796_s21 + $0x54c] ss:$200 sps:$4 sm:$0xff]  }
 0x265   : > { %3694 = vmatprep.subr.bf16.mxu0 %v10312_v37  ;;  %3735 = vmatprep.subr.bf16.mxu1 %v10315_v40  ;;  %v8919_v37 = vcombine.high %v1411_v30, %v1411_v30  ;;  %v3143_v40 = vsel %vm3051_vm5, %v8920_v36, 0  ;;  %v10450_v30 = vld [vmem:[%s11796_s21 + $0x544] ss:$200 sps:$4 sm:$0xff]   ;;  %v10456_v34 = vld [vmem:[%s11796_s21 + $0x6d4] ss:$200 sps:$4 sm:$0xff]  }
 0x266   : > { %v10459_v36 = vld [vmem:[%s11796_s21 + $0x6dc] ss:$200 sps:$4 sm:$0xff]  }
 0x267   : > { %8961 = vmatmul.mubr.msk.bf16.vlgmr.msra.gmra.mrb[20].mxu0 %vm3047_vm6, %v12068_v45  ;;  %8963 = vmatmul.mubr.msk.bf16.vlgmr.msra.gmra.mrb[20].mxu1 %vm3047_vm6, %v12068_v45 }
 0x268   : > { %3695 = vmatpush1.bf16.msra.mxu0 %v10310_v41  ;;  %3736 = vmatpush1.bf16.msra.mxu1 %v10313_v42  ;;  %v10392_v41 = vld [vmem:[%s11796_s21 + $0x84] ss:$200 sps:$4 sm:$0xff]  }
 0x269   : > { %3696 = vmatprep.subr.bf16.mxu0 %v10318_v43  ;;  %3737 = vmatprep.subr.bf16.mxu1 %v10321_v44  ;;  %v10395_v42 = vld [vmem:[%s11796_s21 + $0x8c] ss:$200 sps:$4 sm:$0xff]   ;;  %v10390_v43 = vld [vmem:[%s11796_s21 + $0x80] ss:$200 sps:$4 sm:$0xff]  }
 0x26a   : > { %3726 = vmatprep.mubr.bf16.mxu0 %v11031_v35  ;;  %3767 = vmatprep.mubr.bf16.mxu1 %v11031_v35  ;;  %v10393_v44 = vld [vmem:[%s11796_s21 + $0x88] ss:$200 sps:$4 sm:$0xff]  }
 0x26c   : > { %3697 = vmatpush1.bf16.msra.mxu0 %v10316_v46  ;;  %3738 = vmatpush1.bf16.msra.mxu1 %v10319_v47  ;;  %v10398_v46 = vld [vmem:[%s11796_s21 + $0x214] ss:$200 sps:$4 sm:$0xff]  }
 0x26d   : > { %3698 = vmatprep.subr.bf16.mxu0 %v10324_v48  ;;  %3739 = vmatprep.subr.bf16.mxu1 %v10327_v49  ;;  %v10401_v47 = vld [vmem:[%s11796_s21 + $0x21c] ss:$200 sps:$4 sm:$0xff]   ;;  %v10396_v48 = vld [vmem:[%s11796_s21 + $0x210] ss:$200 sps:$4 sm:$0xff]  }
 0x26e   : > { %v10399_v49 = vld [vmem:[%s11796_s21 + $0x218] ss:$200 sps:$4 sm:$0xff]  }
 0x270   : > { %3699 = vmatpush1.bf16.msra.mxu0 %v10322_v50  ;;  %3740 = vmatpush1.bf16.msra.mxu1 %v10325_v51  ;;  %v10404_v50 = vld [vmem:[%s11796_s21 + $0x3a4] ss:$200 sps:$4 sm:$0xff]  }
 0x271   : > { %3700 = vmatprep.subr.bf16.mxu0 %v10330_v52  ;;  %3741 = vmatprep.subr.bf16.mxu1 %v10333_v53  ;;  %v10407_v51 = vld [vmem:[%s11796_s21 + $0x3ac] ss:$200 sps:$4 sm:$0xff]   ;;  %v10402_v52 = vld [vmem:[%s11796_s21 + $0x3a0] ss:$200 sps:$4 sm:$0xff]  }
 0x272   : > { %v10405_v53 = vld [vmem:[%s11796_s21 + $0x3a8] ss:$200 sps:$4 sm:$0xff]  }
 0x274   : > { %3701 = vmatpush1.bf16.msra.mxu0 %v10328_v54  ;;  %3742 = vmatpush1.bf16.msra.mxu1 %v10331_v55  ;;  %v10410_v54 = vld [vmem:[%s11796_s21 + $0x534] ss:$200 sps:$4 sm:$0xff]  }
 0x275   : > { %3702 = vmatprep.subr.bf16.mxu0 %v10336_v56  ;;  %3743 = vmatprep.subr.bf16.mxu1 %v10339_v57  ;;  %v10413_v55 = vld [vmem:[%s11796_s21 + $0x53c] ss:$200 sps:$4 sm:$0xff]   ;;  %v10408_v56 = vld [vmem:[%s11796_s21 + $0x530] ss:$200 sps:$4 sm:$0xff]  }
 0x276   : > { %v10411_v57 = vld [vmem:[%s11796_s21 + $0x538] ss:$200 sps:$4 sm:$0xff]  }
 0x278   : > { %3703 = vmatpush1.bf16.msra.mxu0 %v10334_v58  ;;  %3744 = vmatpush1.bf16.msra.mxu1 %v10337_v59  ;;  %v10416_v58 = vld [vmem:[%s11796_s21 + $0x6c4] ss:$200 sps:$4 sm:$0xff]  }
 0x279   : > { %3704 = vmatprep.subr.bf16.mxu0 %v10342_v60  ;;  %3745 = vmatprep.subr.bf16.mxu1 %v10345_v61  ;;  %v10419_v59 = vld [vmem:[%s11796_s21 + $0x6cc] ss:$200 sps:$4 sm:$0xff]   ;;  %v10414_v60 = vld [vmem:[%s11796_s21 + $0x6c0] ss:$200 sps:$4 sm:$0xff]  }
 0x27a   : > { %v10417_v61 = vld [vmem:[%s11796_s21 + $0x6c8] ss:$200 sps:$4 sm:$0xff]  }
 0x27c   : > { %3705 = vmatpush1.bf16.msra.mxu0 %v10340_v0  ;;  %3746 = vmatpush1.bf16.msra.mxu1 %v10343_v1  ;;  %v1413_v0 = vld [vmem:[%s11796_s21 + $0x9e0] sm:$0x33] }
 0x27d   : > { %8964 = vmatprep.subr.msk.bf16.mxu0 %vm3051_vm5, %v8915_v2  ;;  %8966 = vmatprep.subr.msk.bf16.mxu1 %vm3051_vm5, %v8917_v3  ;;  %v10420_v3 = vld [vmem:[%s11796_s21 + $0x850] ss:$200 sps:$4 sm:$0xff]  }
 0x280   : > { %3707 = vmatpush1.bf16.msra.mxu0 %v3125_v8  ;;  %3748 = vmatpush1.bf16.msra.mxu1 %v3131_v9  ;;  %v10423_v8 = vld [vmem:[%s11796_s21 + $0x858] ss:$200 sps:$4 sm:$0xff]  }
 0x281   : > { %3776 = vmatprep.subr.bf16.mxu0 %v10352_v7  ;;  %3817 = vmatprep.subr.bf16.mxu1 %v10355_v10 }
 0x283   : > { %8965 = vmatmul.mubr.msk.bf16.vlgmr.msra.gmra.mrb[24].mxu0 %vm3047_vm6, %v12068_v45  ;;  %8967 = vmatmul.mubr.msk.bf16.vlgmr.msra.gmra.mrb[24].mxu1 %vm3047_vm6, %v12068_v45 }
 0x284   : > { %3777 = vmatpush1.bf16.msra.mxu0 %v10350_v11  ;;  %3818 = vmatpush1.bf16.msra.mxu1 %v10353_v12  ;;  %v8923_v11 = vcombine.high %v1413_v0, %v1413_v0 }
 0x285   : > { %3778 = vmatprep.subr.bf16.mxu0 %v10358_v13  ;;  %3819 = vmatprep.subr.bf16.mxu1 %v10361_v14  ;;  %v8925_v14 = vcombine.high %v1414_v5, %v1414_v5 }
 0x286   : > { %3808 = vmatprep.mubr.bf16.mxu0 %v11031_v35  ;;  %3849 = vmatprep.mubr.bf16.mxu1 %v11031_v35 }
 0x288   : > { %3779 = vmatpush1.bf16.msra.mxu0 %v10356_v15  ;;  %3820 = vmatpush1.bf16.msra.mxu1 %v10359_v16  ;;  %v8922_v15 = vcombine.low %v1413_v0, %v1413_v0  ;;  %v8924_v16 = vcombine.low %v1414_v5, %v1414_v5  ;;  %v10478_v0 = vld [vmem:[%s11796_s21 + $0x234] ss:$200 sps:$4 sm:$0xff]   ;;  %v10476_v5 = vld [vmem:[%s11796_s21 + $0x230] ss:$200 sps:$4 sm:$0xff]  }
 0x289   : > { %3780 = vmatprep.subr.bf16.mxu0 %v10364_v17  ;;  %3821 = vmatprep.subr.bf16.mxu1 %v10367_v4  ;;  %v10432_v17 = vld [vmem:[%s11796_s21 + $0x94] ss:$200 sps:$4 sm:$0xff]  }
 0x28a   : > { %v3149_v4 = vsel %vm3051_vm5, %v8922_v15, 0  ;;  %v10491_v15 = vld [vmem:[%s11796_s21 + $0x558] ss:$200 sps:$4 sm:$0xff]  }
 0x28c   : > { %3781 = vmatpush1.bf16.msra.mxu0 %v10362_v18  ;;  %3822 = vmatpush1.bf16.msra.mxu1 %v10365_v19  ;;  %v3155_v18 = vsel %vm3051_vm5, %v8924_v16, 0  ;;  %v10435_v19 = vld [vmem:[%s11796_s21 + $0x9c] ss:$200 sps:$4 sm:$0xff]  }
 0x28d   : > { %3782 = vmatprep.subr.bf16.mxu0 %v10370_v20  ;;  %3823 = vmatprep.subr.bf16.mxu1 %v10373_v21  ;;  %v10430_v20 = vld [vmem:[%s11796_s21 + $0x90] ss:$200 sps:$4 sm:$0xff]   ;;  %v10496_v16 = vld [vmem:[%s11796_s21 + $0x6e4] ss:$200 sps:$4 sm:$0xff]  }
 0x28e   : > { %v10433_v21 = vld [vmem:[%s11796_s21 + $0x98] ss:$200 sps:$4 sm:$0xff]  }
 0x290   : > { %3783 = vmatpush1.bf16.msra.mxu0 %v10368_v22  ;;  %3824 = vmatpush1.bf16.msra.mxu1 %v10371_v23  ;;  %v10438_v22 = vld [vmem:[%s11796_s21 + $0x224] ss:$200 sps:$4 sm:$0xff]  }
 0x291   : > { %3784 = vmatprep.subr.bf16.mxu0 %v10376_v24  ;;  %3825 = vmatprep.subr.bf16.mxu1 %v10379_v25  ;;  %v10441_v23 = vld [vmem:[%s11796_s21 + $0x22c] ss:$200 sps:$4 sm:$0xff]   ;;  %v10436_v24 = vld [vmem:[%s11796_s21 + $0x220] ss:$200 sps:$4 sm:$0xff]  }
 0x292   : > { %v10439_v25 = vld [vmem:[%s11796_s21 + $0x228] ss:$200 sps:$4 sm:$0xff]  }
 0x294   : > { %3785 = vmatpush1.bf16.msra.mxu0 %v10374_v26  ;;  %3826 = vmatpush1.bf16.msra.mxu1 %v10377_v27  ;;  %v10444_v26 = vld [vmem:[%s11796_s21 + $0x3b4] ss:$200 sps:$4 sm:$0xff]  }
 0x295   : > { %3786 = vmatprep.subr.bf16.mxu0 %v10382_v28  ;;  %3827 = vmatprep.subr.bf16.mxu1 %v10385_v29  ;;  %v10447_v27 = vld [vmem:[%s11796_s21 + $0x3bc] ss:$200 sps:$4 sm:$0xff]   ;;  %v10442_v28 = vld [vmem:[%s11796_s21 + $0x3b0] ss:$200 sps:$4 sm:$0xff]  }
 0x296   : > { %v10445_v29 = vld [vmem:[%s11796_s21 + $0x3b8] ss:$200 sps:$4 sm:$0xff]  }
 0x298   : > { %3787 = vmatpush1.bf16.msra.mxu0 %v10380_v32  ;;  %3828 = vmatpush1.bf16.msra.mxu1 %v10383_v33  ;;  %v10448_v32 = vld [vmem:[%s11796_s21 + $0x540] ss:$200 sps:$4 sm:$0xff]  }
 0x299   : > { %8968 = vmatprep.subr.msk.bf16.mxu0 %vm3051_vm5, %v8919_v37  ;;  %8970 = vmatprep.subr.msk.bf16.mxu1 %vm3051_vm5, %v8921_v38  ;;  %v10451_v33 = vld [vmem:[%s11796_s21 + $0x548] ss:$200 sps:$4 sm:$0xff]   ;;  %v10457_v38 = vld [vmem:[%s11796_s21 + $0x6d8] ss:$200 sps:$4 sm:$0xff]  }
 0x29a   : > { %v10454_v37 = vld [vmem:[%s11796_s21 + $0x6d0] ss:$200 sps:$4 sm:$0xff]  }
 0x29c   : > { %3789 = vmatpush1.bf16.msra.mxu0 %v3137_v39  ;;  %3830 = vmatpush1.bf16.msra.mxu1 %v3143_v40  ;;  %v10462_v39 = vld [vmem:[%s11796_s21 + $0x864] ss:$200 sps:$4 sm:$0xff]  }
 0x29d   : > { %3858 = vmatprep.subr.bf16.mxu0 %v10392_v41  ;;  %3899 = vmatprep.subr.bf16.mxu1 %v10395_v42  ;;  %v10465_v40 = vld [vmem:[%s11796_s21 + $0x86c] ss:$200 sps:$4 sm:$0xff]  }
 0x29e   : > { %v1415_v41 = vld [vmem:[%s11796_s21 + $0x9f0] sm:$0x33] }
 0x29f   : > { %8969 = vmatmul.mubr.msk.bf16.vlgmr.msra.gmra.mrb[28].mxu0 %vm3047_vm6, %v12068_v45  ;;  %8971 = vmatmul.mubr.msk.bf16.vlgmr.msra.gmra.mrb[28].mxu1 %vm3047_vm6, %v12068_v45 }
 0x2a0   : > { %3859 = vmatpush1.bf16.msra.mxu0 %v10390_v43  ;;  %3900 = vmatpush1.bf16.msra.mxu1 %v10393_v44  ;;  %v10460_v44 = vld [vmem:[%s11796_s21 + $0x860] ss:$200 sps:$4 sm:$0xff]  }
 0x2a1   : > { %3860 = vmatprep.subr.bf16.mxu0 %v10398_v46  ;;  %3901 = vmatprep.subr.bf16.mxu1 %v10401_v47  ;;  %v1416_v46 = vld [vmem:[%s11796_s21 + $0x9f8] sm:$0x33] }
 0x2a2   : > { %3890 = vmatprep.mubr.bf16.mxu0 %v11031_v35  ;;  %3931 = vmatprep.mubr.bf16.mxu1 %v11031_v35 }
 0x2a4   : > { %3861 = vmatpush1.bf16.msra.mxu0 %v10396_v48  ;;  %3902 = vmatpush1.bf16.msra.mxu1 %v10399_v49  ;;  %v10463_v49 = vld [vmem:[%s11796_s21 + $0x868] ss:$200 sps:$4 sm:$0xff]  }
 0x2a5   : > { %3862 = vmatprep.subr.bf16.mxu0 %v10404_v50  ;;  %3903 = vmatprep.subr.bf16.mxu1 %v10407_v51 }
 0x2a8   : > { %3863 = vmatpush1.bf16.msra.mxu0 %v10402_v52  ;;  %3904 = vmatpush1.bf16.msra.mxu1 %v10405_v53  ;;  %v8927_v52 = vcombine.high %v1415_v41, %v1415_v41 }
 0x2a9   : > { %3864 = vmatprep.subr.bf16.mxu0 %v10410_v54  ;;  %3905 = vmatprep.subr.bf16.mxu1 %v10413_v55  ;;  %v8929_v55 = vcombine.high %v1416_v46, %v1416_v46 }
 0x2ac   : > { %3865 = vmatpush1.bf16.msra.mxu0 %v10408_v56  ;;  %3906 = vmatpush1.bf16.msra.mxu1 %v10411_v57  ;;  %v8926_v56 = vcombine.low %v1415_v41, %v1415_v41  ;;  %v8928_v57 = vcombine.low %v1416_v46, %v1416_v46  ;;  %v10515_v41 = vld [vmem:[%s11796_s21 + $0xbc] ss:$200 sps:$4 sm:$0xff]   ;;  %v10513_v46 = vld [vmem:[%s11796_s21 + $0xb8] ss:$200 sps:$4 sm:$0xff]  }
 0x2ad   : > { %3866 = vmatprep.subr.bf16.mxu0 %v10416_v58  ;;  %3907 = vmatprep.subr.bf16.mxu1 %v10419_v59  ;;  %v10472_v58 = vld [vmem:[%s11796_s21 + $0xa4] ss:$200 sps:$4 sm:$0xff]  }
 0x2ae   : > { %v12165_v1 = vpop.f32.mrb[0].mxu0  ;;  %v12167_v2 = vpop.f32.mrb[0].mxu1  ;;  %v3161_v59 = vsel %vm3051_vm5, %v8926_v56, 0  ;;  %v10522_v56 = vld [vmem:[%s11796_s21 + $0x3d0] ss:$200 sps:$4 sm:$0xff]  }
 0x2af   : > { %v12171_v6 = vpop.f32.mrb[1].mxu0  ;;  %v12173_v7 = vpop.f32.mrb[1].mxu1 }
 0x2b0   : > { %v3240_v9 = vpop.f32.mrb[2].mxu0  ;;  %v3281_v10 = vpop.f32.mrb[2].mxu1  ;;  %3867 = vmatpush1.bf16.msra.mxu0 %v10414_v60  ;;  %3908 = vmatpush1.bf16.msra.mxu1 %v10417_v61  ;;  %v3167_v60 = vsel %vm3051_vm5, %v8928_v57, 0  ;;  %v10475_v61 = vld [vmem:[%s11796_s21 + $0xac] ss:$200 sps:$4 sm:$0xff]  }
 0x2b1   : > { %v3241_v12 = vpop.f32.mrb[3].mxu0  ;;  %v3282_v13 = vpop.f32.mrb[3].mxu1  ;;  %3868 = vmatprep.subr.bf16.mxu0 %v10422_v62  ;;  %3909 = vmatprep.subr.bf16.mxu1 %v10425_v63  ;;  %v10470_v62 = vld [vmem:[%s11796_s21 + $0xa0] ss:$200 sps:$4 sm:$0xff]   ;;  %v10484_v9 = vld [vmem:[%s11796_s21 + $0x3c4] ss:$200 sps:$4 sm:$0xff]  }
 0x2b2   : > { %v10473_v63 = vld [vmem:[%s11796_s21 + $0xa8] ss:$200 sps:$4 sm:$0xff]   ;;  %v10487_v10 = vld [vmem:[%s11796_s21 + $0x3cc] ss:$200 sps:$4 sm:$0xff]   ;;  %v10493_v13 = vld [vmem:[%s11796_s21 + $0x55c] ss:$200 sps:$4 sm:$0xff]  }
 0x2b3   : > { %v10490_v12 = vld [vmem:[%s11796_s21 + $0x554] ss:$200 sps:$4 sm:$0xff]   ;;  %v10525_v57 = vld [vmem:[%s11796_s21 + $0x3d8] ss:$200 sps:$4 sm:$0xff]  }
 0x2b4   : > { %3869 = vmatpush1.bf16.msra.mxu0 %v10420_v3  ;;  %3910 = vmatpush1.bf16.msra.mxu1 %v10423_v8  ;;  %v10481_v3 = vld [vmem:[%s11796_s21 + $0x23c] ss:$200 sps:$4 sm:$0xff]   ;;  %v10479_v8 = vld [vmem:[%s11796_s21 + $0x238] ss:$200 sps:$4 sm:$0xff]  }
 0x2b5   : > { %8972 = vmatprep.subr.msk.bf16.mxu0 %vm3051_vm5, %v8923_v11  ;;  %8974 = vmatprep.subr.msk.bf16.mxu1 %vm3051_vm5, %v8925_v14  ;;  %v10482_v11 = vld [vmem:[%s11796_s21 + $0x3c0] ss:$200 sps:$4 sm:$0xff]   ;;  %v10488_v14 = vld [vmem:[%s11796_s21 + $0x550] ss:$200 sps:$4 sm:$0xff]  }
 0x2b8   : > { %3871 = vmatpush1.bf16.msra.mxu0 %v3149_v4  ;;  %3912 = vmatpush1.bf16.msra.mxu1 %v3155_v18  ;;  %v10494_v4 = vld [vmem:[%s11796_s21 + $0x6e0] ss:$200 sps:$4 sm:$0xff]  }
 0x2b9   : > { %3940 = vmatprep.subr.bf16.mxu0 %v10432_v17  ;;  %3981 = vmatprep.subr.bf16.mxu1 %v10435_v19  ;;  %v10499_v17 = vld [vmem:[%s11796_s21 + $0x6ec] ss:$200 sps:$4 sm:$0xff]   ;;  %v10497_v18 = vld [vmem:[%s11796_s21 + $0x6e8] ss:$200 sps:$4 sm:$0xff]   ;;  %v1417_v19 = vld [vmem:[%s11796_s21 + $0xa00] sm:$0x33] }
 0x2bb   : > { %8973 = vmatmul.mubr.msk.bf16.vlgmr.msra.gmra.mrb[32].mxu0 %vm3047_vm6, %v12068_v45  ;;  %8975 = vmatmul.mubr.msk.bf16.vlgmr.msra.gmra.mrb[32].mxu1 %vm3047_vm6, %v12068_v45 }
 0x2bc   : > { %3941 = vmatpush1.bf16.msra.mxu0 %v10430_v20  ;;  %3982 = vmatpush1.bf16.msra.mxu1 %v10433_v21  ;;  %v1418_v20 = vld [vmem:[%s11796_s21 + $0xa08] sm:$0x33]  ;;  %v10502_v21 = vld [vmem:[%s11796_s21 + $0x874] ss:$200 sps:$4 sm:$0xff]  }
 0x2bd   : > { %3942 = vmatprep.subr.bf16.mxu0 %v10438_v22  ;;  %3983 = vmatprep.subr.bf16.mxu1 %v10441_v23  ;;  %v10505_v22 = vld [vmem:[%s11796_s21 + $0x87c] ss:$200 sps:$4 sm:$0xff]  }
 0x2be   : > { %3972 = vmatprep.mubr.bf16.mxu0 %v11031_v35  ;;  %4013 = vmatprep.mubr.bf16.mxu1 %v11031_v35 }
 0x2c0   : > { %3943 = vmatpush1.bf16.msra.mxu0 %v10436_v24  ;;  %3984 = vmatpush1.bf16.msra.mxu1 %v10439_v25  ;;  %v10500_v25 = vld [vmem:[%s11796_s21 + $0x870] ss:$200 sps:$4 sm:$0xff]  }
 0x2c1   : > { %3944 = vmatprep.subr.bf16.mxu0 %v10444_v26  ;;  %3985 = vmatprep.subr.bf16.mxu1 %v10447_v27 }
 0x2c4   : > { %3945 = vmatpush1.bf16.msra.mxu0 %v10442_v28  ;;  %3986 = vmatpush1.bf16.msra.mxu1 %v10445_v29  ;;  %v10503_v28 = vld [vmem:[%s11796_s21 + $0x878] ss:$200 sps:$4 sm:$0xff]   ;;  %v8930_v29 = vcombine.low %v1417_v19, %v1417_v19 }
 0x2c5   : > { %3946 = vmatprep.subr.bf16.mxu0 %v10450_v30  ;;  %3987 = vmatprep.subr.bf16.mxu1 %v10453_v31  ;;  %v8932_v30 = vcombine.low %v1418_v20, %v1418_v20 }
 0x2c8   : > { %3947 = vmatpush1.bf16.msra.mxu0 %v10448_v32  ;;  %3988 = vmatpush1.bf16.msra.mxu1 %v10451_v33 }
 0x2c9   : > { %3948 = vmatprep.subr.bf16.mxu0 %v10456_v34  ;;  %3989 = vmatprep.subr.bf16.mxu1 %v10459_v36  ;;  %v8931_v36 = vcombine.high %v1417_v19, %v1417_v19 }
 0x2ca   : > { %v12209_v42 = vpop.f32.mrb[4].mxu0  ;;  %v12211_v43 = vpop.f32.mrb[4].mxu1 }
 0x2cb   : > { %v12215_v47 = vpop.f32.mrb[5].mxu0  ;;  %v12217_v48 = vpop.f32.mrb[5].mxu1 }
 0x2cc   : > { %v3322_v50 = vpop.f32.mrb[6].mxu0  ;;  %v3363_v51 = vpop.f32.mrb[6].mxu1  ;;  %3949 = vmatpush1.bf16.msra.mxu0 %v10454_v37  ;;  %3990 = vmatpush1.bf16.msra.mxu1 %v10457_v38  ;;  %v8933_v37 = vcombine.high %v1418_v20, %v1418_v20  ;;  %v3173_v38 = vsel %vm3051_vm5, %v8930_v29, 0  ;;  %v10552_v29 = vld [vmem:[%s11796_s21 + $0xc4] ss:$200 sps:$4 sm:$0xff]  }
 0x2cd   : > { %v3323_v53 = vpop.f32.mrb[7].mxu0  ;;  %v3364_v54 = vpop.f32.mrb[7].mxu1  ;;  %3950 = vmatprep.subr.bf16.mxu0 %v10462_v39  ;;  %3991 = vmatprep.subr.bf16.mxu1 %v10465_v40  ;;  %v3179_v39 = vsel %vm3051_vm5, %v8932_v30, 0  ;;  %v10512_v40 = vld [vmem:[%s11796_s21 + $0xb4] ss:$200 sps:$4 sm:$0xff]  }
 0x2ce   : > { %v10521_v50 = vld [vmem:[%s11796_s21 + $0x24c] ss:$200 sps:$4 sm:$0xff]   ;;  %v10519_v53 = vld [vmem:[%s11796_s21 + $0x248] ss:$200 sps:$4 sm:$0xff]  }
 0x2cf   : > { %v12274_v51 = vld [vmem:[#allocation2] sm:$0x1] }
 0x2d0   : > { %3951 = vmatpush1.bf16.msra.mxu0 %v10460_v44  ;;  %3992 = vmatpush1.bf16.msra.mxu1 %v10463_v49  ;;  %v10510_v44 = vld [vmem:[%s11796_s21 + $0xb0] ss:$200 sps:$4 sm:$0xff]   ;;  %v10518_v49 = vld [vmem:[%s11796_s21 + $0x244] ss:$200 sps:$4 sm:$0xff]   ;;  %v10524_v54 = vld [vmem:[%s11796_s21 + $0x3d4] ss:$200 sps:$4 sm:$0xff]  }
 0x2d1   : > { %8976 = vmatprep.subr.msk.bf16.mxu0 %vm3051_vm5, %v8927_v52  ;;  %8978 = vmatprep.subr.msk.bf16.mxu1 %vm3051_vm5, %v8929_v55  ;;  %v10516_v52 = vld [vmem:[%s11796_s21 + $0x240] ss:$200 sps:$4 sm:$0xff]   ;;  %v10527_v55 = vld [vmem:[%s11796_s21 + $0x3dc] ss:$200 sps:$4 sm:$0xff]  }
 0x2d2   : > { %v10553_v30 = vld [vmem:[%s11794_s19 + $0x40] sm:$0xff]  }
 0x2d4   : > { %3953 = vmatpush1.bf16.msra.mxu0 %v3161_v59  ;;  %3994 = vmatpush1.bf16.msra.mxu1 %v3167_v60  ;;  %v10533_v59 = vld [vmem:[%s11796_s21 + $0x56c] ss:$200 sps:$4 sm:$0xff]   ;;  %v10528_v60 = vld [vmem:[%s11796_s21 + $0x560] ss:$200 sps:$4 sm:$0xff]  }
 0x2d5   : > { %4022 = vmatprep.subr.bf16.mxu0 %v10472_v58  ;;  %4063 = vmatprep.subr.bf16.mxu1 %v10475_v61  ;;  %v10530_v58 = vld [vmem:[%s11796_s21 + $0x564] ss:$200 sps:$4 sm:$0xff]   ;;  %v10531_v61 = vld [vmem:[%s11796_s21 + $0x568] ss:$200 sps:$4 sm:$0xff]  }
 0x2d7   : > { %8977 = vmatmul.mubr.msk.bf16.vlgmr.msra.gmra.mrb[36].mxu0 %vm3047_vm6, %v12068_v45  ;;  %8979 = vmatmul.mubr.msk.bf16.vlgmr.msra.gmra.mrb[36].mxu1 %vm3047_vm6, %v12068_v45  ;;  %v10485_v45 = vld [vmem:[%s11796_s21 + $0x3c8] ss:$200 sps:$4 sm:$0xff]  }
 0x2d8   : > { %4023 = vmatpush1.bf16.msra.mxu0 %v10470_v62  ;;  %4064 = vmatpush1.bf16.msra.mxu1 %v10473_v63  ;;  %v10536_v62 = vld [vmem:[%s11796_s21 + $0x6f4] ss:$200 sps:$4 sm:$0xff]  }
 0x2d9   : > { %4024 = vmatprep.subr.bf16.mxu0 %v10478_v0  ;;  %4065 = vmatprep.subr.bf16.mxu1 %v10481_v3  ;;  %v10539_v63 = vld [vmem:[%s11796_s21 + $0x6fc] ss:$200 sps:$4 sm:$0xff]   ;;  %v1419_v0 = vld [vmem:[%s11796_s21 + $0xa10] sm:$0x33] }
 0x2da   : > { %4054 = vmatprep.mubr.bf16.mxu0 %v11031_v35  ;;  %4095 = vmatprep.mubr.bf16.mxu1 %v11031_v35  ;;  %v10534_v3 = vld [vmem:[%s11796_s21 + $0x6f0] ss:$200 sps:$4 sm:$0xff]  }
 0x2dc   : > { %4025 = vmatpush1.bf16.msra.mxu0 %v10476_v5  ;;  %4066 = vmatpush1.bf16.msra.mxu1 %v10479_v8  ;;  %v10537_v5 = vld [vmem:[%s11796_s21 + $0x6f8] ss:$200 sps:$4 sm:$0xff]  }
 0x2dd   : > { %4026 = vmatprep.subr.bf16.mxu0 %v10484_v9  ;;  %4067 = vmatprep.subr.bf16.mxu1 %v10487_v10  ;;  %v1420_v8 = vld [vmem:[%s11796_s21 + $0xa18] sm:$0x33]  ;;  %v10542_v9 = vld [vmem:[%s11796_s21 + $0x884] ss:$200 sps:$4 sm:$0xff]  }
 0x2de   : > { %v10545_v10 = vld [vmem:[%s11796_s21 + $0x88c] ss:$200 sps:$4 sm:$0xff]  }
 0x2e0   : > { %4027 = vmatpush1.bf16.msra.mxu0 %v10482_v11  ;;  %4068 = vmatpush1.bf16.msra.mxu1 %v10485_v45  ;;  %v8934_v11 = vcombine.low %v1419_v0, %v1419_v0 }
 0x2e1   : > { %4028 = vmatprep.subr.bf16.mxu0 %v10490_v12  ;;  %4069 = vmatprep.subr.bf16.mxu1 %v10493_v13 }
 0x2e4   : > { %4029 = vmatpush1.bf16.msra.mxu0 %v10488_v14  ;;  %4070 = vmatpush1.bf16.msra.mxu1 %v10491_v15  ;;  %v10540_v15 = vld [vmem:[%s11796_s21 + $0x880] ss:$200 sps:$4 sm:$0xff]  }
 0x2e5   : > { %4030 = vmatprep.subr.bf16.mxu0 %v10496_v16  ;;  %4071 = vmatprep.subr.bf16.mxu1 %v10499_v17  ;;  %v8936_v16 = vcombine.low %v1420_v8, %v1420_v8 }
 0x2e6   : > { %v12254_v23 = vpop.f32.mrb[8].mxu0  ;;  %v12256_v24 = vpop.f32.mrb[8].mxu1 }
 0x2e7   : > { %v12259_v26 = vpop.f32.mrb[9].mxu0  ;;  %v12261_v27 = vpop.f32.mrb[9].mxu1 }
 0x2e8   : > { %v3404_v31 = vpop.f32.mrb[10].mxu0  ;;  %v3445_v32 = vpop.f32.mrb[10].mxu1  ;;  %4031 = vmatpush1.bf16.msra.mxu0 %v10494_v4  ;;  %4072 = vmatpush1.bf16.msra.mxu1 %v10497_v18  ;;  %v10543_v18 = vld [vmem:[%s11796_s21 + $0x888] ss:$200 sps:$4 sm:$0xff]  }
 0x2e9   : > { %v3405_v33 = vpop.f32.mrb[11].mxu0  ;;  %v3446_v34 = vpop.f32.mrb[11].mxu1  ;;  %4032 = vmatprep.subr.bf16.mxu0 %v10502_v21  ;;  %4073 = vmatprep.subr.bf16.mxu1 %v10505_v22  ;;  %v8935_v21 = vcombine.high %v1419_v0, %v1419_v0  ;;  %v8937_v22 = vcombine.high %v1420_v8, %v1420_v8  ;;  %v10550_v31 = vld [vmem:[%s11796_s21 + $0xc0] ss:$200 sps:$4 sm:$0xff]  }
 0x2ea   : > { %v10554_v32 = vld [vmem:[%s11794_s19] sm:$0xff]   ;;  %v10558_v34 = vld [vmem:[%s11794_s19 + $0x48] sm:$0xff]  }
 0x2eb   : > { %v10557_v33 = vld [vmem:[%s11796_s21 + $0x254] ss:$200 sps:$4 sm:$0xff]  }
 0x2ec   : > { %4033 = vmatpush1.bf16.msra.mxu0 %v10500_v25  ;;  %4074 = vmatpush1.bf16.msra.mxu1 %v10503_v28  ;;  %v3185_v25 = vsel %vm3051_vm5, %v8934_v11, 0  ;;  %v3191_v28 = vsel %vm3051_vm5, %v8936_v16, 0 }
 0x2ed   : > { %8980 = vmatprep.subr.msk.bf16.mxu0 %vm3051_vm5, %v8931_v36  ;;  %8982 = vmatprep.subr.msk.bf16.mxu1 %vm3051_vm5, %v8933_v37  ;;  %v4229_v36 = vpack.c.bf16 %v12171_v6, %v12171_v6  ;;  %v10555_v37 = vld [vmem:[%s11796_s21 + $0x250] ss:$200 sps:$4 sm:$0xff]   ;;  %v10560_v6 = vld [vmem:[%s11796_s21 + $0x3e0] ss:$200 sps:$4 sm:$0xff]  }
 0x2f0   : > { %4035 = vmatpush1.bf16.msra.mxu0 %v3173_v38  ;;  %4076 = vmatpush1.bf16.msra.mxu1 %v3179_v39  ;;  %v10559_v38 = vld [vmem:[%s11794_s19 + $0x8] sm:$0xff]  }
 0x2f1   : > { %4104 = vmatprep.subr.bf16.mxu0 %v10512_v40  ;;  %4145 = vmatprep.subr.bf16.mxu1 %v10515_v41  ;;  %v10562_v39 = vld [vmem:[%s11796_s21 + $0x3e4] ss:$200 sps:$4 sm:$0xff]  }
 0x2f2   : > { %v10563_v40 = vld [vmem:[%s11794_s19 + $0x50] sm:$0xff]  }
 0x2f3   : > { %8981 = vmatmul.mubr.msk.bf16.vlgmr.msra.gmra.mrb[40].mxu0 %vm3047_vm6, %v12274_v51  ;;  %8983 = vmatmul.mubr.msk.bf16.vlgmr.msra.gmra.mrb[40].mxu1 %vm3047_vm6, %v12274_v51  ;;  %v10564_v41 = vld [vmem:[%s11794_s19 + $0x10] sm:$0xff]  }
 0x2f4   : > { %4105 = vmatpush1.bf16.msra.mxu0 %v10510_v44  ;;  %4146 = vmatpush1.bf16.msra.mxu1 %v10513_v46  ;;  %v10567_v44 = vld [vmem:[%s11796_s21 + $0x574] ss:$200 sps:$4 sm:$0xff]  }
 0x2f5   : > { %4106 = vmatprep.subr.bf16.mxu0 %v10518_v49  ;;  %4147 = vmatprep.subr.bf16.mxu1 %v10521_v50  ;;  %v10568_v46 = vld [vmem:[%s11794_s19 + $0x58] sm:$0xff]  }
 0x2f6   : > { %4136 = vmatprep.mubr.bf16.mxu0 %v11031_v35  ;;  %4177 = vmatprep.mubr.bf16.mxu1 %v11031_v35  ;;  %v10565_v49 = vld [vmem:[%s11796_s21 + $0x570] ss:$200 sps:$4 sm:$0xff]  }
 0x2f7   : > { %v10569_v50 = vld [vmem:[%s11794_s19 + $0x18] sm:$0xff]  }
 0x2f8   : > { %4107 = vmatpush1.bf16.msra.mxu0 %v10516_v52  ;;  %4148 = vmatpush1.bf16.msra.mxu1 %v10519_v53  ;;  %v10573_v52 = vld [vmem:[%s11794_s19 + $0x60] sm:$0xff]  }
 0x2f9   : > { %4108 = vmatprep.subr.bf16.mxu0 %v10524_v54  ;;  %4149 = vmatprep.subr.bf16.mxu1 %v10527_v55  ;;  %v10570_v53 = vld [vmem:[%s11796_s21 + $0x700] ss:$200 sps:$4 sm:$0xff]   ;;  %v10577_v55 = vld [vmem:[%s11796_s21 + $0x894] ss:$200 sps:$4 sm:$0xff]  }
 0x2fa   : > { %v10574_v54 = vld [vmem:[%s11794_s19 + $0x20] sm:$0xff]  }
 0x2fc   : > { %4109 = vmatpush1.bf16.msra.mxu0 %v10522_v56  ;;  %4150 = vmatpush1.bf16.msra.mxu1 %v10525_v57  ;;  %v10578_v56 = vld [vmem:[%s11794_s19 + $0x68] sm:$0xff]  }
 0x2fd   : > { %4110 = vmatprep.subr.bf16.mxu0 %v10530_v58  ;;  %4151 = vmatprep.subr.bf16.mxu1 %v10533_v59  ;;  %v1421_v57 = vld [vmem:[%s11796_s21 + $0xa20] sm:$0x33] }
 0x2fe   : > { %v8938_v11 = vcombine.low %v1421_v57, %v1421_v57 }
 0x300   : > { %4111 = vmatpush1.bf16.msra.mxu0 %v10528_v60  ;;  %4152 = vmatpush1.bf16.msra.mxu1 %v10531_v61  ;;  %v3197_v16 = vsel %vm3051_vm5, %v8938_v11, 0  ;;  %v10618_v11 = vld [vmem:[%s11794_s19 + $0x138] sm:$0xff]  }
 0x301   : > { %4112 = vmatprep.subr.bf16.mxu0 %v10536_v62  ;;  %4153 = vmatprep.subr.bf16.mxu1 %v10539_v63  ;;  %v10575_v62 = vld [vmem:[%s11796_s21 + $0x890] ss:$200 sps:$4 sm:$0xff]  }
 0x302   : > { %v12300_v45 = vpop.f32.mrb[12].mxu0  ;;  %v12302_v12 = vpop.f32.mrb[12].mxu1 }
 0x303   : > { %v12304_v13 = vpop.f32.mrb[13].mxu0  ;;  %v12306_v14 = vpop.f32.mrb[13].mxu1 }
 0x304   : > { %v3486_v17 = vpop.f32.mrb[14].mxu0  ;;  %v3527_v4 = vpop.f32.mrb[14].mxu1  ;;  %4113 = vmatpush1.bf16.msra.mxu0 %v10534_v3  ;;  %4154 = vmatpush1.bf16.msra.mxu1 %v10537_v5  ;;  %v10579_v3 = vld [vmem:[%s11794_s19 + $0x28] sm:$0xff]  }
 0x305   : > { %v3487_v19 = vpop.f32.mrb[15].mxu0  ;;  %v3528_v20 = vpop.f32.mrb[15].mxu1  ;;  %4114 = vmatprep.subr.bf16.mxu0 %v10542_v9  ;;  %4155 = vmatprep.subr.bf16.mxu1 %v10545_v10  ;;  %v8939_v9 = vcombine.high %v1421_v57, %v1421_v57  ;;  %v10581_v10 = vld [vmem:[%s11794_s19 + $0x70] sm:$0xff]   ;;  %v10584_v17 = vld [vmem:[%s11794_s19 + $0x78] sm:$0xff]   ;;  %v10585_v4 = vld [vmem:[%s11794_s19 + $0xc0] sm:$0xff]  }
 0x306   : > { %v10587_v19 = vld [vmem:[%s11794_s19 + $0x80] sm:$0xff]   ;;  %v10588_v20 = vld [vmem:[%s11794_s19 + $0xc8] sm:$0xff]  }
 0x307   : > { %v10609_v57 = vld [vmem:[%s11794_s19 + $0x168] sm:$0xff]  }
 0x308   : > { %4115 = vmatpush1.bf16.msra.mxu0 %v10540_v15  ;;  %4156 = vmatpush1.bf16.msra.mxu1 %v10543_v18  ;;  %v10583_v15 = vld [vmem:[%s11794_s19 + $0x30] sm:$0xff]   ;;  %v10586_v18 = vld [vmem:[%s11794_s19 + $0x38] sm:$0xff]  }
 0x309   : > { %8984 = vmatprep.subr.msk.bf16.mxu0 %vm3051_vm5, %v8935_v21  ;;  %8986 = vmatprep.subr.msk.bf16.mxu1 %vm3051_vm5, %v8937_v22  ;;  %v10589_v21 = vld [vmem:[%s11794_s19 + $0x140] sm:$0xff]   ;;  %v10590_v22 = vld [vmem:[%s11794_s19 + $0x88] sm:$0xff]  }
 0x30c   : > { %4117 = vmatpush1.bf16.msra.mxu0 %v3185_v25  ;;  %4158 = vmatpush1.bf16.msra.mxu1 %v3191_v28  ;;  %v4231_v25 = vpack.c.bf16 %v12173_v7, %v12173_v7  ;;  %v10591_v28 = vld [vmem:[%s11794_s19 + $0x100] sm:$0xff]   ;;  %v4233_v7 = vpack.c.bf16 %v12215_v47, %v12215_v47  ;;  %v10599_v47 = vld [vmem:[%s11794_s19 + $0x110] sm:$0xff]  }
 0x30d   : > { %4186 = vmatprep.subr.bf16.mxu0 %v10552_v29  ;;  %9408 = vmatprep.subr.bf16.mxu1 %v10553_v30  ;;  %v10592_v29 = vld [vmem:[%s11794_s19 + $0xd0] sm:$0xff]   ;;  %v4228_v30 = vpack.c.bf16 %v12165_v1, %v12165_v1  ;;  %v10596_v1 = vld [vmem:[%s11794_s19 + $0xd8] sm:$0xff]  }
 0x30f   : > { %8985 = vmatmul.mubr.msk.bf16.vlgmr.msra.gmra.mrb[44].mxu0 %vm3047_vm6, %v12274_v51  ;;  %8987 = vmatmul.mubr.msk.bf16.vlgmr.msra.gmra.mrb[44].mxu1 %vm3047_vm6, %v12274_v51 }
 0x310   : > { %4187 = vmatpush1.bf16.msra.mxu0 %v10550_v31  ;;  %9409 = vmatpush3.bf16.msra.mxu1 %v10554_v32  ;;  %v10593_v31 = vld [vmem:[%s11794_s19 + $0x148] sm:$0xff]  }
 0x311   : > { %7510 = vmatprep.mubr.bf16.mxu1 %v4229_v36  ;;  %4188 = vmatprep.subr.bf16.mxu0 %v10557_v33  ;;  %v10595_v32 = vld [vmem:[%s11794_s19 + $0x108] sm:$0xff]   ;;  %v10597_v33 = vld [vmem:[%s11794_s19 + $0x150] sm:$0xff]   ;;  %v10600_v36 = vld [vmem:[%s11794_s19 + $0xe0] sm:$0xff]  }
 0x312   : > { %9410 = vmatprep.subr.bf16.mxu1 %v10558_v34  ;;  %4218 = vmatprep.mubr.bf16.mxu0 %v11031_v35  ;;  %v10572_v35 = vld [vmem:[%s11796_s21 + $0x704] ss:$200 sps:$4 sm:$0xff]  }
 0x313   : > { %v10598_v34 = vld [vmem:[%s11794_s19 + $0x98] sm:$0xff]  }
 0x314   : > { %4189 = vmatpush1.bf16.msra.mxu0 %v10555_v37  ;;  %9411 = vmatpush3.bf16.msra.mxu1 %v10559_v38  ;;  %v10601_v37 = vld [vmem:[%s11794_s19 + $0x158] sm:$0xff]   ;;  %v10602_v38 = vld [vmem:[%s11794_s19 + $0xa0] sm:$0xff]  }
 0x315   : > { %4190 = vmatprep.subr.bf16.mxu0 %v10562_v39  ;;  %9412 = vmatprep.subr.bf16.mxu1 %v10563_v40  ;;  %v10603_v39 = vld [vmem:[%s11794_s19 + $0x118] sm:$0xff]   ;;  %v10604_v40 = vld [vmem:[%s11794_s19 + $0xe8] sm:$0xff]  }
 0x318   : > { %4191 = vmatpush1.bf16.msra.mxu0 %v10560_v6  ;;  %9413 = vmatpush3.bf16.msra.mxu1 %v10564_v41  ;;  %v10605_v6 = vld [vmem:[%s11794_s19 + $0x160] sm:$0xff]  }
 0x319   : > { %4192 = vmatprep.subr.bf16.mxu0 %v10567_v44  ;;  %9414 = vmatprep.subr.bf16.mxu1 %v10568_v46 }
 0x31c   : > { %4193 = vmatpush1.bf16.msra.mxu0 %v10565_v49  ;;  %9415 = vmatpush3.bf16.msra.mxu1 %v10569_v50 }
 0x31d   : > { %4194 = vmatprep.subr.bf16.mxu0 %v10572_v35  ;;  %9416 = vmatprep.subr.bf16.mxu1 %v10573_v52  ;;  %v10606_v52 = vld [vmem:[%s11794_s19 + $0xa8] sm:$0xff]  }
 0x31e   : > { %v12344_v58 = vpop.f32.mrb[16].mxu0  ;;  %v12346_v59 = vpop.f32.mrb[16].mxu1 }
 0x31f   : > { %v12348_v60 = vpop.f32.mrb[17].mxu0  ;;  %v12350_v61 = vpop.f32.mrb[17].mxu1 }
 0x320   : > { %v3568_v63 = vpop.f32.mrb[18].mxu0  ;;  %v3609_v0 = vpop.f32.mrb[18].mxu1  ;;  %4195 = vmatpush1.bf16.msra.mxu0 %v10570_v53  ;;  %9417 = vmatpush3.bf16.msra.mxu1 %v10574_v54  ;;  %v10607_v53 = vld [vmem:[%s11794_s19 + $0x120] sm:$0xff]  }
 0x321   : > { %v3569_v5 = vpop.f32.mrb[19].mxu0  ;;  %v3610_v8 = vpop.f32.mrb[19].mxu1  ;;  %4196 = vmatprep.subr.bf16.mxu0 %v10577_v55  ;;  %9418 = vmatprep.subr.bf16.mxu1 %v10578_v56  ;;  %v10608_v56 = vld [vmem:[%s11794_s19 + $0xf0] sm:$0xff]   ;;  %v10611_v63 = vld [vmem:[%s11794_s19 + $0x128] sm:$0xff]   ;;  %v10612_v0 = vld [vmem:[%s11794_s19 + $0xf8] sm:$0xff]  }
 0x322   : > { %v10614_v5 = vld [vmem:[%s11794_s19 + $0xb8] sm:$0xff]   ;;  %v10615_v8 = vld [vmem:[%s11794_s19 + $0x130] sm:$0xff]  }
 0x324   : > { %4197 = vmatpush1.bf16.msra.mxu0 %v10575_v62  ;;  %9419 = vmatpush3.bf16.msra.mxu1 %v10579_v3  ;;  %v10610_v62 = vld [vmem:[%s11794_s19 + $0xb0] sm:$0xff]  }
 0x325   : > { %8988 = vmatprep.subr.msk.bf16.mxu0 %vm3051_vm5, %v8939_v9  ;;  %9420 = vmatprep.subr.bf16.mxu1 %v10581_v10  ;;  %v10613_v3 = vld [vmem:[%s11794_s19 + $0x170] sm:$0xff]   ;;  %v10616_v9 = vld [vmem:[%s11794_s19 + $0x178] sm:$0xff]   ;;  %v10617_v10 = vld [vmem:[%s11794_s19 + $0x1c0] sm:$0xff]  }
 0x328   : > { %4199 = vmatpush1.bf16.msra.mxu0 %v3197_v16  ;;  %9421 = vmatpush3.bf16.msra.mxu1 %v10583_v15  ;;  %v10619_v15 = vld [vmem:[%s11794_s19 + $0x180] sm:$0xff]   ;;  %v10620_v16 = vld [vmem:[%s11794_s19 + $0x1c8] sm:$0xff]  }
 0x329   : > { %9422 = vmatprep.subr.bf16.mxu1 %v10584_v17  ;;  %9430 = vmatprep.subr.bf16.mxu0 %v10585_v4  ;;  %v4230_v17 = vpack.c.bf16 %v12167_v2, %v12167_v2  ;;  %v10621_v4 = vld [vmem:[%s11794_s19 + $0x240] sm:$0xff]   ;;  %v10625_v2 = vld [vmem:[%s11794_s19 + $0x248] sm:$0xff]  }
 0x32b   : > { %8989 = vmatmul.mubr.msk.bf16.vlgmr.msra.gmra.mrb[48].mxu0 %vm3047_vm6, %v12274_v51  ;;  %v10594_v51 = vld [vmem:[%s11794_s19 + $0x90] sm:$0xff]  }
 0x32c   : > { %9423 = vmatpush3.bf16.msra.mxu1 %v10586_v18  ;;  %9431 = vmatpush3.bf16.msra.mxu0 %v10587_v19  ;;  %v10622_v18 = vld [vmem:[%s11794_s19 + $0x188] sm:$0xff]   ;;  %v4235_v19 = vpack.c.bf16 %v12217_v48, %v12217_v48  ;;  %v10626_v48 = vld [vmem:[%s11794_s19 + $0x190] sm:$0xff]  }
 0x32d   : > { %7550 = vmatprep.mubr.bf16.mxu0 %v4231_v25  ;;  %9432 = vmatprep.subr.bf16.mxu0 %v10588_v20  ;;  %v10623_v20 = vld [vmem:[%s11794_s19 + $0x200] sm:$0xff]   ;;  %v4237_v25 = vpack.c.bf16 %v12259_v26, %v12259_v26 }
 0x32e   : > { %9452 = vmatprep.subr.bf16.mxu1 %v10589_v21  ;;  %v10624_v21 = vld [vmem:[%s11794_s19 + $0x1d0] sm:$0xff]   ;;  %v10632_v26 = vld [vmem:[%s11794_s19 + $0x1e0] sm:$0xff]  }
 0x32f   : > { %7511 = vmatmul.mubr.bf16.vlgmr.msra.gmra.mrb[48].mxu1 %v4228_v30  ;;  %v10630_v30 = vld [vmem:[%s11794_s19 + $0x198] sm:$0xff]  }
 0x330   : > { %9433 = vmatpush3.bf16.msra.mxu0 %v10590_v22  ;;  %9453 = vmatpush3.bf16.msra.mxu1 %v10591_v28  ;;  %v4232_v22 = vpack.c.bf16 %v12209_v42, %v12209_v42  ;;  %v10627_v28 = vld [vmem:[%s11794_s19 + $0x208] sm:$0xff]   ;;  %v10629_v42 = vld [vmem:[%s11794_s19 + $0x250] sm:$0xff]  }
 0x331   : > { %7590 = vmatprep.mubr.bf16.mxu1 %v4233_v7  ;;  %9434 = vmatprep.subr.bf16.mxu0 %v10592_v29  ;;  %v10628_v29 = vld [vmem:[%s11794_s19 + $0x1d8] sm:$0xff]  }
 0x332   : > { %9454 = vmatprep.subr.bf16.mxu1 %v10593_v31  ;;  %v10631_v31 = vld [vmem:[%s11794_s19 + $0x210] sm:$0xff]   ;;  %v10633_v7 = vld [vmem:[%s11794_s19 + $0x258] sm:$0xff]  }
 0x334   : > { %9435 = vmatpush3.bf16.msra.mxu0 %v10594_v51  ;;  %9455 = vmatpush3.bf16.msra.mxu1 %v10595_v32 }
 0x335   : > { %9436 = vmatprep.subr.bf16.mxu0 %v10596_v1  ;;  %9456 = vmatprep.subr.bf16.mxu1 %v10597_v33 }
 0x338   : > { %9437 = vmatpush3.bf16.msra.mxu0 %v10598_v34  ;;  %9457 = vmatpush3.bf16.msra.mxu1 %v10599_v47 }
 0x339   : > { %9438 = vmatprep.subr.bf16.mxu0 %v10600_v36  ;;  %9458 = vmatprep.subr.bf16.mxu1 %v10601_v37  ;;  %v10634_v36 = vld [vmem:[%s11794_s19 + $0x1a0] sm:$0xff]   ;;  %v10635_v37 = vld [vmem:[%s11794_s19 + $0x218] sm:$0xff]  }
 0x33a   : > { %v12388_v41 = vpop.f32.mrb[20].mxu0  ;;  %v12390_v44 = vpop.f32.mrb[20].mxu1 }
 0x33b   : > { %v12392_v46 = vpop.f32.mrb[21].mxu0  ;;  %v12394_v49 = vpop.f32.mrb[21].mxu1 }
 0x33c   : > { %v3650_v50 = vpop.f32.mrb[22].mxu0  ;;  %v3691_v35 = vpop.f32.mrb[22].mxu1  ;;  %9439 = vmatpush3.bf16.msra.mxu0 %v10602_v38  ;;  %9459 = vmatpush3.bf16.msra.mxu1 %v10603_v39 }
 0x33d   : > { %v3651_v54 = vpop.f32.mrb[23].mxu0  ;;  %v3692_v55 = vpop.f32.mrb[23].mxu1  ;;  %9440 = vmatprep.subr.bf16.mxu0 %v10604_v40  ;;  %9460 = vmatprep.subr.bf16.mxu1 %v10605_v6  ;;  %v10636_v40 = vld [vmem:[%s11794_s19 + $0x1e8] sm:$0xff]   ;;  %v10637_v6 = vld [vmem:[%s11794_s19 + $0x260] sm:$0xff]  }
 0x33e   : > { %v10638_v50 = vld [vmem:[%s11794_s19 + $0x1a8] sm:$0xff]   ;;  %v10639_v35 = vld [vmem:[%s11794_s19 + $0x220] sm:$0xff]   ;;  %v10642_v54 = vld [vmem:[%s11794_s19 + $0x1b0] sm:$0xff]  }
 0x33f   : > { %v10643_v55 = vld [vmem:[%s11794_s19 + $0x228] sm:$0xff]  }
 0x340   : > { %9441 = vmatpush3.bf16.msra.mxu0 %v10606_v52  ;;  %9461 = vmatpush3.bf16.msra.mxu1 %v10607_v53  ;;  %v10640_v52 = vld [vmem:[%s11794_s19 + $0x1f0] sm:$0xff]   ;;  %v10641_v53 = vld [vmem:[%s11794_s19 + $0x268] sm:$0xff]  }
 0x341   : > { %9442 = vmatprep.subr.bf16.mxu0 %v10608_v56  ;;  %9462 = vmatprep.subr.bf16.mxu1 %v10609_v57  ;;  %v10644_v56 = vld [vmem:[%s11794_s19 + $0x1f8] sm:$0xff]   ;;  %v10645_v57 = vld [vmem:[%s11794_s19 + $0x270] sm:$0xff]  }
 0x344   : > { %9443 = vmatpush3.bf16.msra.mxu0 %v10610_v62  ;;  %9463 = vmatpush3.bf16.msra.mxu1 %v10611_v63  ;;  %v10646_v62 = vld [vmem:[%s11794_s19 + $0x1b8] sm:$0xff]   ;;  %v10647_v63 = vld [vmem:[%s11794_s19 + $0x230] sm:$0xff]  }
 0x345   : > { %9444 = vmatprep.subr.bf16.mxu0 %v10612_v0  ;;  %9464 = vmatprep.subr.bf16.mxu1 %v10613_v3  ;;  %v10648_v0 = vld [vmem:[%s11794_s19 + $0x278] sm:$0xff]   ;;  %v10649_v3 = vld [vmem:[%s11794_s19 + $0x2c0] sm:$0xff]  }
 0x348   : > { %9445 = vmatpush3.bf16.msra.mxu0 %v10614_v5  ;;  %9465 = vmatpush3.bf16.msra.mxu1 %v10615_v8  ;;  %v10650_v5 = vld [vmem:[%s11794_s19 + $0x238] sm:$0xff]   ;;  %v10651_v8 = vld [vmem:[%s11794_s19 + $0x280] sm:$0xff]  }
 0x349   : > { %9466 = vmatprep.subr.bf16.mxu1 %v10616_v9  ;;  %9474 = vmatprep.subr.bf16.mxu0 %v10617_v10  ;;  %v10652_v9 = vld [vmem:[%s11794_s19 + $0x2c8] sm:$0xff]   ;;  %v4234_v10 = vpack.c.bf16 %v12211_v43, %v12211_v43 }
 0x34a   : > { %v10657_v43 = vld [vmem:[%s11794_s19 + $0x348] sm:$0xff]  }
 0x34b   : > { %7551 = vmatmul.mubr.bf16.vlgmr.msra.gmra.mrb[52].mxu0 %v4230_v17  ;;  %v10655_v17 = vld [vmem:[%s11794_s19 + $0x300] sm:$0xff]  }
 0x34c   : > { %9467 = vmatpush3.bf16.msra.mxu1 %v10618_v11  ;;  %9475 = vmatpush3.bf16.msra.mxu0 %v10619_v15  ;;  %v10653_v11 = vld [vmem:[%s11794_s19 + $0x340] sm:$0xff]   ;;  %v10654_v15 = vld [vmem:[%s11794_s19 + $0x288] sm:$0xff]  }
 0x34d   : > { %7630 = vmatprep.mubr.bf16.mxu0 %v4235_v19  ;;  %9476 = vmatprep.subr.bf16.mxu0 %v10620_v16  ;;  %v4239_v16 = vpack.c.bf16 %v12261_v27, %v12261_v27  ;;  %v4241_v19 = vpack.c.bf16 %v12304_v13, %v12304_v13  ;;  %v10659_v27 = vld [vmem:[%s11794_s19 + $0x308] sm:$0xff]  }
 0x34e   : > { %9496 = vmatprep.subr.bf16.mxu1 %v10621_v4  ;;  %v10656_v4 = vld [vmem:[%s11794_s19 + $0x2d0] sm:$0xff]  }
 0x34f   : > { %7591 = vmatmul.mubr.bf16.vlgmr.msra.gmra.mrb[52].mxu1 %v4232_v22  ;;  %v10661_v22 = vld [vmem:[%s11794_s19 + $0x350] sm:$0xff]  }
 0x350   : > { %9477 = vmatpush3.bf16.msra.mxu0 %v10622_v18  ;;  %9497 = vmatpush3.bf16.msra.mxu1 %v10623_v20  ;;  %v4236_v18 = vpack.c.bf16 %v12254_v23, %v12254_v23  ;;  %v10658_v20 = vld [vmem:[%s11794_s19 + $0x290] sm:$0xff]  }
 0x351   : > { %7670 = vmatprep.mubr.bf16.mxu1 %v4237_v25  ;;  %9478 = vmatprep.subr.bf16.mxu0 %v10624_v21  ;;  %v10660_v21 = vld [vmem:[%s11794_s19 + $0x2d8] sm:$0xff]  }
 0x352   : > { %9498 = vmatprep.subr.bf16.mxu1 %v10625_v2 }
 0x354   : > { %9479 = vmatpush3.bf16.msra.mxu0 %v10626_v48  ;;  %9499 = vmatpush3.bf16.msra.mxu1 %v10627_v28 }
 0x355   : > { %9480 = vmatprep.subr.bf16.mxu0 %v10628_v29  ;;  %9500 = vmatprep.subr.bf16.mxu1 %v10629_v42  ;;  %v10662_v29 = vld [vmem:[%s11794_s19 + $0x298] sm:$0xff]   ;;  %v10663_v42 = vld [vmem:[%s11794_s19 + $0x310] sm:$0xff]  }
 0x356   : > { %v12432_v51 = vpop.f32.mrb[24].mxu0  ;;  %v12434_v32 = vpop.f32.mrb[24].mxu1 }
 0x357   : > { %v12436_v1 = vpop.f32.mrb[25].mxu0  ;;  %v12438_v33 = vpop.f32.mrb[25].mxu1 }
 0x358   : > { %v3732_v34 = vpop.f32.mrb[26].mxu0  ;;  %v3773_v47 = vpop.f32.mrb[26].mxu1  ;;  %9481 = vmatpush3.bf16.msra.mxu0 %v10630_v30  ;;  %9501 = vmatpush3.bf16.msra.mxu1 %v10631_v31 }
 0x359   : > { %v3733_v38 = vpop.f32.mrb[27].mxu0  ;;  %v3774_v39 = vpop.f32.mrb[27].mxu1  ;;  %9482 = vmatprep.subr.bf16.mxu0 %v10632_v26  ;;  %9502 = vmatprep.subr.bf16.mxu1 %v10633_v7  ;;  %v10664_v26 = vld [vmem:[%s11794_s19 + $0x2e0] sm:$0xff]   ;;  %v10665_v7 = vld [vmem:[%s11794_s19 + $0x358] sm:$0xff]  }
 0x35a   : > { %v10666_v34 = vld [vmem:[%s11794_s19 + $0x2a0] sm:$0xff]   ;;  %v10667_v47 = vld [vmem:[%s11794_s19 + $0x318] sm:$0xff]   ;;  %v10670_v38 = vld [vmem:[%s11794_s19 + $0x2a8] sm:$0xff]  }
 0x35b   : > { %v10671_v39 = vld [vmem:[%s11794_s19 + $0x320] sm:$0xff]  }
 0x35c   : > { %9483 = vmatpush3.bf16.msra.mxu0 %v10634_v36  ;;  %9503 = vmatpush3.bf16.msra.mxu1 %v10635_v37  ;;  %v10668_v36 = vld [vmem:[%s11794_s19 + $0x2e8] sm:$0xff]   ;;  %v10669_v37 = vld [vmem:[%s11794_s19 + $0x360] sm:$0xff]  }
 0x35d   : > { %9484 = vmatprep.subr.bf16.mxu0 %v10636_v40  ;;  %9504 = vmatprep.subr.bf16.mxu1 %v10637_v6  ;;  %v10672_v40 = vld [vmem:[%s11794_s19 + $0x2f0] sm:$0xff]   ;;  %v10673_v6 = vld [vmem:[%s11794_s19 + $0x368] sm:$0xff]  }
 0x360   : > { %9485 = vmatpush3.bf16.msra.mxu0 %v10638_v50  ;;  %9505 = vmatpush3.bf16.msra.mxu1 %v10639_v35  ;;  %v10674_v50 = vld [vmem:[%s11794_s19 + $0x2b0] sm:$0xff]   ;;  %v10675_v35 = vld [vmem:[%s11794_s19 + $0x328] sm:$0xff]  }
 0x361   : > { %9486 = vmatprep.subr.bf16.mxu0 %v10640_v52  ;;  %9506 = vmatprep.subr.bf16.mxu1 %v10641_v53  ;;  %v10676_v52 = vld [vmem:[%s11794_s19 + $0x2f8] sm:$0xff]   ;;  %v10677_v53 = vld [vmem:[%s11794_s19 + $0x370] sm:$0xff]  }
 0x364   : > { %9487 = vmatpush3.bf16.msra.mxu0 %v10642_v54  ;;  %9507 = vmatpush3.bf16.msra.mxu1 %v10643_v55  ;;  %v10678_v54 = vld [vmem:[%s11794_s19 + $0x2b8] sm:$0xff]   ;;  %v10679_v55 = vld [vmem:[%s11794_s19 + $0x330] sm:$0xff]  }
 0x365   : > { %9488 = vmatprep.subr.bf16.mxu0 %v10644_v56  ;;  %9508 = vmatprep.subr.bf16.mxu1 %v10645_v57  ;;  %v10680_v56 = vld [vmem:[%s11794_s19 + $0x378] sm:$0xff]   ;;  %v10681_v57 = vld [vmem:[%s11794_s19 + $0x3c0] sm:$0xff]  }
 0x368   : > { %9489 = vmatpush3.bf16.msra.mxu0 %v10646_v62  ;;  %9509 = vmatpush3.bf16.msra.mxu1 %v10647_v63  ;;  %v10682_v62 = vld [vmem:[%s11794_s19 + $0x338] sm:$0xff]   ;;  %v10683_v63 = vld [vmem:[%s11794_s19 + $0x380] sm:$0xff]  }
 0x369   : > { %9510 = vmatprep.subr.bf16.mxu1 %v10648_v0  ;;  %9518 = vmatprep.subr.bf16.mxu0 %v10649_v3  ;;  %v10684_v0 = vld [vmem:[%s11794_s19 + $0x3c8] sm:$0xff]   ;;  %v4238_v3 = vpack.c.bf16 %v12256_v24, %v12256_v24 }
 0x36b   : > { %7631 = vmatmul.mubr.bf16.vlgmr.msra.gmra.mrb[56].mxu0 %v4234_v10  ;;  %v10687_v10 = vld [vmem:[%s11794_s19 + $0x400] sm:$0xff]  }
 0x36c   : > { %9511 = vmatpush3.bf16.msra.mxu1 %v10650_v5  ;;  %9519 = vmatpush3.bf16.msra.mxu0 %v10651_v8  ;;  %v10685_v5 = vld [vmem:[%s11794_s19 + $0x440] sm:$0xff]   ;;  %v10686_v8 = vld [vmem:[%s11794_s19 + $0x388] sm:$0xff]  }
 0x36d   : > { %7710 = vmatprep.mubr.bf16.mxu0 %v4239_v16  ;;  %9520 = vmatprep.subr.bf16.mxu0 %v10652_v9  ;;  %v4243_v9 = vpack.c.bf16 %v12306_v14, %v12306_v14  ;;  %v4245_v14 = vpack.c.bf16 %v12348_v60, %v12348_v60  ;;  %v10692_v60 = vld [vmem:[%s11794_s19 + $0x3d8] sm:$0xff]  }
 0x36e   : > { %9540 = vmatprep.subr.bf16.mxu1 %v10653_v11  ;;  %v10688_v11 = vld [vmem:[%s11794_s19 + $0x3d0] sm:$0xff]  }
 0x36f   : > { %7671 = vmatmul.mubr.bf16.vlgmr.msra.gmra.mrb[56].mxu1 %v4236_v18 }
 0x370   : > { %9521 = vmatpush3.bf16.msra.mxu0 %v10654_v15  ;;  %9541 = vmatpush3.bf16.msra.mxu1 %v10655_v17  ;;  %v4240_v15 = vpack.c.bf16 %v12300_v45, %v12300_v45  ;;  %v10689_v17 = vld [vmem:[%s11794_s19 + $0x448] sm:$0xff]   ;;  %v10690_v45 = vld [vmem:[%s11794_s19 + $0x390] sm:$0xff]  }
 0x371   : > { %7750 = vmatprep.mubr.bf16.mxu1 %v4241_v19  ;;  %9522 = vmatprep.subr.bf16.mxu0 %v10656_v4 }
 0x372   : > { %v12476_v23 = vpop.f32.mrb[28].mxu0  ;;  %v12478_v2 = vpop.f32.mrb[28].mxu1  ;;  %9542 = vmatprep.subr.bf16.mxu1 %v10657_v43  ;;  %v10691_v43 = vld [vmem:[%s11794_s19 + $0x408] sm:$0xff]  }
 0x373   : > { %v12480_v13 = vpop.f32.mrb[29].mxu0  ;;  %v12482_v25 = vpop.f32.mrb[29].mxu1 }
 0x374   : > { %v3814_v48 = vpop.f32.mrb[30].mxu0  ;;  %v3855_v28 = vpop.f32.mrb[30].mxu1  ;;  %9523 = vmatpush3.bf16.msra.mxu0 %v10658_v20  ;;  %9543 = vmatpush3.bf16.msra.mxu1 %v10659_v27 }
 0x375   : > { %v3815_v30 = vpop.f32.mrb[31].mxu0  ;;  %v3856_v31 = vpop.f32.mrb[31].mxu1  ;;  %9524 = vmatprep.subr.bf16.mxu0 %v10660_v21  ;;  %9544 = vmatprep.subr.bf16.mxu1 %v10661_v22  ;;  %v10693_v22 = vld [vmem:[%s11794_s19 + $0x450] sm:$0xff]   ;;  %v10694_v48 = vld [vmem:[%s11794_s19 + $0x398] sm:$0xff]  }
 0x376   : > { %v10695_v28 = vld [vmem:[%s11794_s19 + $0x410] sm:$0xff]   ;;  %v10698_v30 = vld [vmem:[%s11794_s19 + $0x3a0] sm:$0xff]   ;;  %v10699_v31 = vld [vmem:[%s11794_s19 + $0x418] sm:$0xff]  }
 0x378   : > { %9525 = vmatpush3.bf16.msra.mxu0 %v10662_v29  ;;  %9545 = vmatpush3.bf16.msra.mxu1 %v10663_v42  ;;  %v10696_v29 = vld [vmem:[%s11794_s19 + $0x3e0] sm:$0xff]   ;;  %v10697_v42 = vld [vmem:[%s11794_s19 + $0x458] sm:$0xff]  }
 0x379   : > { %9526 = vmatprep.subr.bf16.mxu0 %v10664_v26  ;;  %9546 = vmatprep.subr.bf16.mxu1 %v10665_v7  ;;  %v10700_v26 = vld [vmem:[%s11794_s19 + $0x3e8] sm:$0xff]   ;;  %v10701_v7 = vld [vmem:[%s11794_s19 + $0x460] sm:$0xff]  }
 0x37c   : > { %9527 = vmatpush3.bf16.msra.mxu0 %v10666_v34  ;;  %9547 = vmatpush3.bf16.msra.mxu1 %v10667_v47  ;;  %v10702_v34 = vld [vmem:[%s11794_s19 + $0x3a8] sm:$0xff]   ;;  %v10703_v47 = vld [vmem:[%s11794_s19 + $0x420] sm:$0xff]  }
 0x37d   : > { %9528 = vmatprep.subr.bf16.mxu0 %v10668_v36  ;;  %9548 = vmatprep.subr.bf16.mxu1 %v10669_v37  ;;  %v10704_v36 = vld [vmem:[%s11794_s19 + $0x3f0] sm:$0xff]   ;;  %v10705_v37 = vld [vmem:[%s11794_s19 + $0x468] sm:$0xff]  }
 0x380   : > { %9529 = vmatpush3.bf16.msra.mxu0 %v10670_v38  ;;  %9549 = vmatpush3.bf16.msra.mxu1 %v10671_v39  ;;  %v10706_v38 = vld [vmem:[%s11794_s19 + $0x3b0] sm:$0xff]   ;;  %v10707_v39 = vld [vmem:[%s11794_s19 + $0x428] sm:$0xff]  }
 0x381   : > { %9530 = vmatprep.subr.bf16.mxu0 %v10672_v40  ;;  %9550 = vmatprep.subr.bf16.mxu1 %v10673_v6  ;;  %v10708_v40 = vld [vmem:[%s11794_s19 + $0x3f8] sm:$0xff]   ;;  %v10709_v6 = vld [vmem:[%s11794_s19 + $0x470] sm:$0xff]  }
 0x384   : > { %9531 = vmatpush3.bf16.msra.mxu0 %v10674_v50  ;;  %9551 = vmatpush3.bf16.msra.mxu1 %v10675_v35  ;;  %v10710_v50 = vld [vmem:[%s11794_s19 + $0x3b8] sm:$0xff]   ;;  %v10711_v35 = vld [vmem:[%s11794_s19 + $0x430] sm:$0xff]  }
 0x385   : > { %9532 = vmatprep.subr.bf16.mxu0 %v10676_v52  ;;  %9552 = vmatprep.subr.bf16.mxu1 %v10677_v53  ;;  %v10712_v52 = vld [vmem:[%s11794_s19 + $0x478] sm:$0xff]   ;;  %v10713_v53 = vld [vmem:[%s11794_s19 + $0x4c0] sm:$0xff]  }
 0x388   : > { %9533 = vmatpush3.bf16.msra.mxu0 %v10678_v54  ;;  %9553 = vmatpush3.bf16.msra.mxu1 %v10679_v55  ;;  %v10714_v54 = vld [vmem:[%s11794_s19 + $0x438] sm:$0xff]   ;;  %v10715_v55 = vld [vmem:[%s11794_s19 + $0x480] sm:$0xff]  }
 0x389   : > { %9554 = vmatprep.subr.bf16.mxu1 %v10680_v56  ;;  %9562 = vmatprep.subr.bf16.mxu0 %v10681_v57  ;;  %v10716_v56 = vld [vmem:[%s11794_s19 + $0x4c8] sm:$0xff]   ;;  %v4242_v57 = vpack.c.bf16 %v12302_v12, %v12302_v12  ;;  %v10720_v12 = vld [vmem:[%s11794_s19 + $0x4d0] sm:$0xff]  }
 0x38b   : > { %7711 = vmatmul.mubr.bf16.vlgmr.msra.gmra.mrb[60].mxu0 %v4238_v3  ;;  %v10718_v3 = vld [vmem:[%s11794_s19 + $0x488] sm:$0xff]  }
 0x38c   : > { %9555 = vmatpush3.bf16.msra.mxu1 %v10682_v62  ;;  %9563 = vmatpush3.bf16.msra.mxu0 %v10683_v63 }
 0x38d   : > { %7790 = vmatprep.mubr.bf16.mxu0 %v4243_v9  ;;  %9564 = vmatprep.subr.bf16.mxu0 %v10684_v0  ;;  %v10717_v0 = vld [vmem:[%s11794_s19 + $0x540] sm:$0xff]  }
 0x38e   : > { %v12517_v24 = vpop.f32.mrb[32].mxu0  ;;  %v12519_v16 = vpop.f32.mrb[32].mxu1  ;;  %9584 = vmatprep.subr.bf16.mxu1 %v10685_v5  ;;  %v4247_v5 = vpack.c.bf16 %v12350_v61, %v12350_v61 }
 0x38f   : > { %v12524_v4 = vpop.f32.mrb[33].mxu0  ;;  %v12526_v18 = vpop.f32.mrb[33].mxu1  ;;  %7751 = vmatmul.mubr.bf16.vlgmr.msra.gmra.mrb[60].mxu1 %v4240_v15 }
 0x390   : > { %v3896_v19 = vpop.f32.mrb[34].mxu0  ;;  %v3937_v20 = vpop.f32.mrb[34].mxu1  ;;  %9565 = vmatpush3.bf16.msra.mxu0 %v10686_v8  ;;  %9585 = vmatpush3.bf16.msra.mxu1 %v10687_v10  ;;  %v10719_v10 = vld [vmem:[%s11794_s19 + $0x500] sm:$0xff]  }
 0x391   : > { %7830 = vmatprep.mubr.bf16.mxu1 %v4245_v14  ;;  %v3897_v27 = vpop.f32.mrb[35].mxu0  ;;  %v3938_v21 = vpop.f32.mrb[35].mxu1  ;;  %9566 = vmatprep.subr.bf16.mxu0 %v10688_v11  ;;  %v10722_v19 = vld [vmem:[%s11794_s19 + $0x490] sm:$0xff]   ;;  %v10723_v20 = vld [vmem:[%s11794_s19 + $0x508] sm:$0xff]  }
 0x392   : > { %9586 = vmatprep.subr.bf16.mxu1 %v10689_v17  ;;  %v4244_v17 = vpack.c.bf16 %v12344_v58, %v12344_v58  ;;  %v10724_v58 = vld [vmem:[%s11794_s19 + $0x4d8] sm:$0xff]   ;;  %v10725_v27 = vld [vmem:[%s11794_s19 + $0x550] sm:$0xff]  }
 0x393   : > { %v10726_v21 = vld [vmem:[%s11794_s19 + $0x498] sm:$0xff]  }
 0x394   : > { %9567 = vmatpush3.bf16.msra.mxu0 %v10690_v45  ;;  %9587 = vmatpush3.bf16.msra.mxu1 %v10691_v43  ;;  %v10721_v45 = vld [vmem:[%s11794_s19 + $0x548] sm:$0xff]   ;;  %v4249_v43 = vpack.c.bf16 %v12392_v46, %v12392_v46  ;;  %v10727_v46 = vld [vmem:[%s11794_s19 + $0x510] sm:$0xff]  }
 0x395   : > { %9568 = vmatprep.subr.bf16.mxu0 %v10692_v60  ;;  %9588 = vmatprep.subr.bf16.mxu1 %v10693_v22  ;;  %v10728_v60 = vld [vmem:[%s11794_s19 + $0x4e0] sm:$0xff]   ;;  %v10729_v22 = vld [vmem:[%s11794_s19 + $0x558] sm:$0xff]  }
 0x398   : > { %9569 = vmatpush3.bf16.msra.mxu0 %v10694_v48  ;;  %9589 = vmatpush3.bf16.msra.mxu1 %v10695_v28  ;;  %v10730_v48 = vld [vmem:[%s11794_s19 + $0x4a0] sm:$0xff]   ;;  %v10731_v28 = vld [vmem:[%s11794_s19 + $0x518] sm:$0xff]  }
 0x399   : > { %9570 = vmatprep.subr.bf16.mxu0 %v10696_v29  ;;  %9590 = vmatprep.subr.bf16.mxu1 %v10697_v42  ;;  %v10732_v29 = vld [vmem:[%s11794_s19 + $0x4e8] sm:$0xff]   ;;  %v10733_v42 = vld [vmem:[%s11794_s19 + $0x560] sm:$0xff]  }
 0x39c   : > { %9571 = vmatpush3.bf16.msra.mxu0 %v10698_v30  ;;  %9591 = vmatpush3.bf16.msra.mxu1 %v10699_v31  ;;  %v10734_v30 = vld [vmem:[%s11794_s19 + $0x4a8] sm:$0xff]   ;;  %v10735_v31 = vld [vmem:[%s11794_s19 + $0x520] sm:$0xff]  }
 0x39d   : > { %9572 = vmatprep.subr.bf16.mxu0 %v10700_v26  ;;  %9592 = vmatprep.subr.bf16.mxu1 %v10701_v7  ;;  %v10736_v26 = vld [vmem:[%s11794_s19 + $0x4f0] sm:$0xff]   ;;  %v10737_v7 = vld [vmem:[%s11794_s19 + $0x568] sm:$0xff]  }
 0x3a0   : > { %9573 = vmatpush3.bf16.msra.mxu0 %v10702_v34  ;;  %9593 = vmatpush3.bf16.msra.mxu1 %v10703_v47  ;;  %v10738_v34 = vld [vmem:[%s11794_s19 + $0x4b0] sm:$0xff]   ;;  %v10739_v47 = vld [vmem:[%s11794_s19 + $0x528] sm:$0xff]  }
 0x3a1   : > { %9574 = vmatprep.subr.bf16.mxu0 %v10704_v36  ;;  %9594 = vmatprep.subr.bf16.mxu1 %v10705_v37  ;;  %v10740_v36 = vld [vmem:[%s11794_s19 + $0x4f8] sm:$0xff]   ;;  %v10741_v37 = vld [vmem:[%s11794_s19 + $0x570] sm:$0xff]  }
 0x3a4   : > { %9575 = vmatpush3.bf16.msra.mxu0 %v10706_v38  ;;  %9595 = vmatpush3.bf16.msra.mxu1 %v10707_v39  ;;  %v10742_v38 = vld [vmem:[%s11794_s19 + $0x4b8] sm:$0xff]   ;;  %v10743_v39 = vld [vmem:[%s11794_s19 + $0x530] sm:$0xff]  }
 0x3a5   : > { %9576 = vmatprep.subr.bf16.mxu0 %v10708_v40  ;;  %9596 = vmatprep.subr.bf16.mxu1 %v10709_v6  ;;  %v10744_v40 = vld [vmem:[%s11794_s19 + $0x578] sm:$0xff]   ;;  %v10745_v6 = vld [vmem:[%s11794_s19 + $0x5c0] sm:$0xff]  }
 0x3a8   : > { %9577 = vmatpush3.bf16.msra.mxu0 %v10710_v50  ;;  %9597 = vmatpush3.bf16.msra.mxu1 %v10711_v35 }
 0x3a9   : > { %9598 = vmatprep.subr.bf16.mxu1 %v10712_v52  ;;  %9606 = vmatprep.subr.bf16.mxu0 %v10713_v53  ;;  %v10746_v52 = vld [vmem:[%s11794_s19 + $0x538] sm:$0xff]  }
 0x3aa   : > { %v12557_v62 = vpop.f32.mrb[36].mxu0  ;;  %v12559_v63 = vpop.f32.mrb[36].mxu1 }
 0x3ab   : > { %v12565_v8 = vpop.f32.mrb[37].mxu0  ;;  %v12567_v9 = vpop.f32.mrb[37].mxu1  ;;  %7791 = vmatmul.mubr.bf16.vlgmr.msra.gmra.mrb[64].mxu0 %v4242_v57 }
 0x3ac   : > { %v3978_v11 = vpop.f32.mrb[38].mxu0  ;;  %v4019_v15 = vpop.f32.mrb[38].mxu1  ;;  %9599 = vmatpush3.bf16.msra.mxu1 %v10714_v54  ;;  %9607 = vmatpush3.bf16.msra.mxu0 %v10715_v55  ;;  %v10747_v55 = vld [vmem:[%s11794_s19 + $0x580] sm:$0xff]  }
 0x3ad   : > { %7870 = vmatprep.mubr.bf16.mxu0 %v4247_v5  ;;  %v3979_v61 = vpop.f32.mrb[39].mxu0  ;;  %v4020_v14 = vpop.f32.mrb[39].mxu1  ;;  %9608 = vmatprep.subr.bf16.mxu0 %v10716_v56  ;;  %v10748_v56 = vld [vmem:[%s11794_s19 + $0x5c8] sm:$0xff]   ;;  %v4251_v15 = vpack.c.bf16 %v12394_v49, %v12394_v49  ;;  %v10754_v49 = vld [vmem:[%s11794_s19 + $0x590] sm:$0xff]  }
 0x3ae   : > { %9628 = vmatprep.subr.bf16.mxu1 %v10717_v0  ;;  %v10750_v11 = vld [vmem:[%s11794_s19 + $0x588] sm:$0xff]   ;;  %v10752_v61 = vld [vmem:[%s11794_s19 + $0x5d0] sm:$0xff]  }
 0x3af   : > { %7831 = vmatmul.mubr.bf16.vlgmr.msra.gmra.mrb[64].mxu1 %v4244_v17  ;;  %v10751_v17 = vld [vmem:[%s11794_s19 + $0x600] sm:$0xff]   ;;  %v10753_v14 = vld [vmem:[%s11794_s19 + $0x648] sm:$0xff]  }
 0x3b0   : > { %9609 = vmatpush3.bf16.msra.mxu0 %v10718_v3  ;;  %9629 = vmatpush3.bf16.msra.mxu1 %v10719_v10  ;;  %v4246_v3 = vpack.c.bf16 %v12346_v59, %v12346_v59  ;;  %v4248_v59 = vpack.c.bf16 %v12388_v41, %v12388_v41  ;;  %v10756_v41 = vld [vmem:[%s11794_s19 + $0x5d8] sm:$0xff]  }
 0x3b1   : > { %7910 = vmatprep.mubr.bf16.mxu1 %v4249_v43  ;;  %9610 = vmatprep.subr.bf16.mxu0 %v10720_v12  ;;  %v10749_v12 = vld [vmem:[%s11794_s19 + $0x640] sm:$0xff]   ;;  %v10755_v43 = vld [vmem:[%s11794_s19 + $0x608] sm:$0xff]  }
 0x3b2   : > { %9630 = vmatprep.subr.bf16.mxu1 %v10721_v45  ;;  %v4253_v45 = vpack.c.bf16 %v12436_v1, %v12436_v1  ;;  %v10759_v1 = vld [vmem:[%s11794_s19 + $0x610] sm:$0xff]  }
 0x3b4   : > { %9611 = vmatpush3.bf16.msra.mxu0 %v10722_v19  ;;  %9631 = vmatpush3.bf16.msra.mxu1 %v10723_v20  ;;  %v10757_v19 = vld [vmem:[%s11794_s19 + $0x650] sm:$0xff]   ;;  %v10758_v20 = vld [vmem:[%s11794_s19 + $0x598] sm:$0xff]  }
 0x3b5   : > { %9612 = vmatprep.subr.bf16.mxu0 %v10724_v58  ;;  %9632 = vmatprep.subr.bf16.mxu1 %v10725_v27  ;;  %v10760_v58 = vld [vmem:[%s11794_s19 + $0x5e0] sm:$0xff]   ;;  %v10761_v27 = vld [vmem:[%s11794_s19 + $0x658] sm:$0xff]  }
 0x3b8   : > { %9613 = vmatpush3.bf16.msra.mxu0 %v10726_v21  ;;  %9633 = vmatpush3.bf16.msra.mxu1 %v10727_v46  ;;  %v10762_v21 = vld [vmem:[%s11794_s19 + $0x5a0] sm:$0xff]   ;;  %v10763_v46 = vld [vmem:[%s11794_s19 + $0x618] sm:$0xff]  }
 0x3b9   : > { %9614 = vmatprep.subr.bf16.mxu0 %v10728_v60  ;;  %9634 = vmatprep.subr.bf16.mxu1 %v10729_v22  ;;  %v10764_v60 = vld [vmem:[%s11794_s19 + $0x5e8] sm:$0xff]   ;;  %v10765_v22 = vld [vmem:[%s11794_s19 + $0x660] sm:$0xff]  }
 0x3bc   : > { %9615 = vmatpush3.bf16.msra.mxu0 %v10730_v48  ;;  %9635 = vmatpush3.bf16.msra.mxu1 %v10731_v28  ;;  %v10766_v48 = vld [vmem:[%s11794_s19 + $0x5a8] sm:$0xff]   ;;  %v10767_v28 = vld [vmem:[%s11794_s19 + $0x620] sm:$0xff]  }
 0x3bd   : > { %9616 = vmatprep.subr.bf16.mxu0 %v10732_v29  ;;  %9636 = vmatprep.subr.bf16.mxu1 %v10733_v42  ;;  %v10768_v29 = vld [vmem:[%s11794_s19 + $0x5f0] sm:$0xff]   ;;  %v10769_v42 = vld [vmem:[%s11794_s19 + $0x668] sm:$0xff]  }
 0x3c0   : > { %9617 = vmatpush3.bf16.msra.mxu0 %v10734_v30  ;;  %9637 = vmatpush3.bf16.msra.mxu1 %v10735_v31  ;;  %v10770_v30 = vld [vmem:[%s11794_s19 + $0x5b0] sm:$0xff]   ;;  %v10771_v31 = vld [vmem:[%s11794_s19 + $0x628] sm:$0xff]  }
 0x3c1   : > { %9618 = vmatprep.subr.bf16.mxu0 %v10736_v26  ;;  %9638 = vmatprep.subr.bf16.mxu1 %v10737_v7  ;;  %v10772_v26 = vld [vmem:[%s11794_s19 + $0x5f8] sm:$0xff]   ;;  %v10773_v7 = vld [vmem:[%s11794_s19 + $0x670] sm:$0xff]  }
 0x3c4   : > { %9619 = vmatpush3.bf16.msra.mxu0 %v10738_v34  ;;  %9639 = vmatpush3.bf16.msra.mxu1 %v10739_v47 }
 0x3c5   : > { %9620 = vmatprep.subr.bf16.mxu0 %v10740_v36  ;;  %9640 = vmatprep.subr.bf16.mxu1 %v10741_v37  ;;  %v10774_v36 = vld [vmem:[%s11794_s19 + $0x5b8] sm:$0xff]   ;;  %v10775_v37 = vld [vmem:[%s11794_s19 + $0x630] sm:$0xff]  }
 0x3c6   : > { %v12600_v50 = vpop.f32.mrb[40].mxu0  ;;  %v12602_v35 = vpop.f32.mrb[40].mxu1 }
 0x3c7   : > { %v12605_v53 = vpop.f32.mrb[41].mxu0  ;;  %v12607_v54 = vpop.f32.mrb[41].mxu1 }
 0x3c8   : > { %v4060_v57 = vpop.f32.mrb[42].mxu0  ;;  %v4101_v0 = vpop.f32.mrb[42].mxu1  ;;  %9621 = vmatpush3.bf16.msra.mxu0 %v10742_v38  ;;  %9641 = vmatpush3.bf16.msra.mxu1 %v10743_v39 }
 0x3c9   : > { %v4061_v5 = vpop.f32.mrb[43].mxu0  ;;  %v4102_v10 = vpop.f32.mrb[43].mxu1  ;;  %9642 = vmatprep.subr.bf16.mxu1 %v10744_v40  ;;  %9650 = vmatprep.subr.bf16.mxu0 %v10745_v6  ;;  %v10776_v40 = vld [vmem:[%s11794_s19 + $0x678] sm:$0xff]   ;;  %v10777_v6 = vld [vmem:[%s11794_s19 + $0x6c0] sm:$0xff]  }
 0x3ca   : > { %v10778_v0 = vld [vmem:[%s11794_s19 + $0x638] sm:$0xff]   ;;  %v10780_v5 = vld [vmem:[%s11794_s19 + $0x6c8] sm:$0xff]   ;;  %v4250_v10 = vpack.c.bf16 %v12390_v44, %v12390_v44 }
 0x3cb   : > { %7871 = vmatmul.mubr.bf16.vlgmr.msra.gmra.mrb[68].mxu0 %v4246_v3  ;;  %v10779_v3 = vld [vmem:[%s11794_s19 + $0x680] sm:$0xff]   ;;  %v10785_v44 = vld [vmem:[%s11794_s19 + $0x748] sm:$0xff]  }
 0x3cc   : > { %9643 = vmatpush3.bf16.msra.mxu1 %v10746_v52  ;;  %9651 = vmatpush3.bf16.msra.mxu0 %v10747_v55 }
 0x3cd   : > { %7950 = vmatprep.mubr.bf16.mxu0 %v4251_v15  ;;  %9652 = vmatprep.subr.bf16.mxu0 %v10748_v56  ;;  %v4255_v15 = vpack.c.bf16 %v12438_v33, %v12438_v33  ;;  %v10786_v33 = vld [vmem:[%s11794_s19 + $0x690] sm:$0xff]  }
 0x3ce   : > { %9672 = vmatprep.subr.bf16.mxu1 %v10749_v12  ;;  %v10781_v12 = vld [vmem:[%s11794_s19 + $0x740] sm:$0xff]  }
 0x3cf   : > { %7911 = vmatmul.mubr.bf16.vlgmr.msra.gmra.mrb[68].mxu1 %v4248_v59  ;;  %v4252_v59 = vpack.c.bf16 %v12432_v51, %v12432_v51  ;;  %v10788_v51 = vld [vmem:[%s11794_s19 + $0x6d8] sm:$0xff]  }
 0x3d0   : > { %9653 = vmatpush3.bf16.msra.mxu0 %v10750_v11  ;;  %9673 = vmatpush3.bf16.msra.mxu1 %v10751_v17  ;;  %v10782_v11 = vld [vmem:[%s11794_s19 + $0x688] sm:$0xff]   ;;  %v10783_v17 = vld [vmem:[%s11794_s19 + $0x700] sm:$0xff]  }
 0x3d1   : > { %7990 = vmatprep.mubr.bf16.mxu1 %v4253_v45  ;;  %9654 = vmatprep.subr.bf16.mxu0 %v10752_v61  ;;  %v10784_v61 = vld [vmem:[%s11794_s19 + $0x6d0] sm:$0xff]   ;;  %v10787_v45 = vld [vmem:[%s11794_s19 + $0x708] sm:$0xff]  }
 0x3d2   : > { %9674 = vmatprep.subr.bf16.mxu1 %v10753_v14  ;;  %v4257_v14 = vpack.c.bf16 %v12480_v13, %v12480_v13  ;;  %v10791_v13 = vld [vmem:[%s11794_s19 + $0x710] sm:$0xff]  }
 0x3d4   : > { %9655 = vmatpush3.bf16.msra.mxu0 %v10754_v49  ;;  %9675 = vmatpush3.bf16.msra.mxu1 %v10755_v43  ;;  %v10789_v49 = vld [vmem:[%s11794_s19 + $0x750] sm:$0xff]   ;;  %v10790_v43 = vld [vmem:[%s11794_s19 + $0x698] sm:$0xff]  }
 0x3d5   : > { %9656 = vmatprep.subr.bf16.mxu0 %v10756_v41  ;;  %9676 = vmatprep.subr.bf16.mxu1 %v10757_v19  ;;  %v10792_v41 = vld [vmem:[%s11794_s19 + $0x6e0] sm:$0xff]   ;;  %v10793_v19 = vld [vmem:[%s11794_s19 + $0x758] sm:$0xff]  }
 0x3d8   : > { %9657 = vmatpush3.bf16.msra.mxu0 %v10758_v20  ;;  %9677 = vmatpush3.bf16.msra.mxu1 %v10759_v1  ;;  %v10794_v20 = vld [vmem:[%s11794_s19 + $0x6a0] sm:$0xff]   ;;  %v10795_v1 = vld [vmem:[%s11794_s19 + $0x718] sm:$0xff]  }
 0x3d9   : > { %9658 = vmatprep.subr.bf16.mxu0 %v10760_v58  ;;  %9678 = vmatprep.subr.bf16.mxu1 %v10761_v27  ;;  %v10796_v58 = vld [vmem:[%s11794_s19 + $0x6e8] sm:$0xff]   ;;  %v10797_v27 = vld [vmem:[%s11794_s19 + $0x760] sm:$0xff]  }
 0x3dc   : > { %9659 = vmatpush3.bf16.msra.mxu0 %v10762_v21  ;;  %9679 = vmatpush3.bf16.msra.mxu1 %v10763_v46  ;;  %v10798_v21 = vld [vmem:[%s11794_s19 + $0x6a8] sm:$0xff]   ;;  %v10799_v46 = vld [vmem:[%s11794_s19 + $0x720] sm:$0xff]  }
 0x3dd   : > { %9660 = vmatprep.subr.bf16.mxu0 %v10764_v60  ;;  %9680 = vmatprep.subr.bf16.mxu1 %v10765_v22  ;;  %v10800_v60 = vld [vmem:[%s11794_s19 + $0x6f0] sm:$0xff]   ;;  %v10801_v22 = vld [vmem:[%s11794_s19 + $0x768] sm:$0xff]  }
 0x3e0   : > { %9661 = vmatpush3.bf16.msra.mxu0 %v10766_v48  ;;  %9681 = vmatpush3.bf16.msra.mxu1 %v10767_v28 }
 0x3e1   : > { %9662 = vmatprep.subr.bf16.mxu0 %v10768_v29  ;;  %9682 = vmatprep.subr.bf16.mxu1 %v10769_v42  ;;  %v10802_v29 = vld [vmem:[%s11794_s19 + $0x6b0] sm:$0xff]   ;;  %v10803_v42 = vld [vmem:[%s11794_s19 + $0x728] sm:$0xff]  }
 0x3e2   : > { %v12644_v34 = vpop.f32.mrb[44].mxu0  ;;  %v12646_v47 = vpop.f32.mrb[44].mxu1 }
 0x3e3   : > { %v12650_v38 = vpop.f32.mrb[45].mxu0  ;;  %v12652_v39 = vpop.f32.mrb[45].mxu1 }
 0x3e4   : > { %v4142_v52 = vpop.f32.mrb[46].mxu0  ;;  %v4183_v55 = vpop.f32.mrb[46].mxu1  ;;  %9663 = vmatpush3.bf16.msra.mxu0 %v10770_v30  ;;  %9683 = vmatpush3.bf16.msra.mxu1 %v10771_v31  ;;  %v10804_v31 = vld [vmem:[%s11794_s19 + $0x6f8] sm:$0xff]  }
 0x3e5   : > { %v4143_v56 = vpop.f32.mrb[47].mxu0  ;;  %v4184_v57 = vpop.f32.mrb[47].mxu1  ;;  %9664 = vmatprep.subr.bf16.mxu0 %v10772_v26  ;;  %9684 = vmatprep.subr.bf16.mxu1 %v10773_v7  ;;  %v10805_v7 = vld [vmem:[%s11794_s19 + $0x770] sm:$0xff]  }
 0x3e6   : > { %v10808_v56 = vld [vmem:[%s11794_s19 + $0x778] sm:$0xff]  }
 0x3e8   : > { %9665 = vmatpush3.bf16.msra.mxu0 %v10774_v36  ;;  %9685 = vmatpush3.bf16.msra.mxu1 %v10775_v37 }
 0x3e9   : > { %9686 = vmatprep.subr.bf16.mxu1 %v10776_v40  ;;  %9694 = vmatprep.subr.bf16.mxu0 %v10777_v6  ;;  %v10806_v40 = vld [vmem:[%s11794_s19 + $0x6b8] sm:$0xff]   ;;  %v10807_v6 = vld [vmem:[%s11794_s19 + $0x730] sm:$0xff]  }
 0x3eb   : > { %7951 = vmatmul.mubr.bf16.vlgmr.msra.gmra.mrb[72].mxu0 %v4250_v10  ;;  %v10812_v10 = vld [vmem:[%s11794_s19 + $0x7c8] sm:$0xff]  }
 0x3ec   : > { %9687 = vmatpush3.bf16.msra.mxu1 %v10778_v0  ;;  %9695 = vmatpush3.bf16.msra.mxu0 %v10779_v3  ;;  %v10809_v0 = vld [vmem:[%s11794_s19 + $0x7c0] sm:$0xff]   ;;  %v10810_v3 = vld [vmem:[%s11794_s19 + $0x738] sm:$0xff]  }
 0x3ed   : > { %8030 = vmatprep.mubr.bf16.mxu0 %v4255_v15  ;;  %9696 = vmatprep.subr.bf16.mxu0 %v10780_v5  ;;  %v10811_v5 = vld [vmem:[%s11794_s19 + $0x780] sm:$0xff]   ;;  %v10814_v15 = vld [vmem:[%s11794_s19 + $0x788] sm:$0xff]  }
 0x3ee   : > { %9716 = vmatprep.subr.bf16.mxu1 %v10781_v12  ;;  %v4254_v12 = vpack.c.bf16 %v12434_v32, %v12434_v32  ;;  %v10817_v32 = vld [vmem:[%s11794_s19 + $0x848] sm:$0xff]  }
 0x3ef   : > { %7991 = vmatmul.mubr.bf16.vlgmr.msra.gmra.mrb[72].mxu1 %v4252_v59  ;;  %v10816_v59 = vld [vmem:[%s11794_s19 + $0x7d0] sm:$0xff]  }
 0x3f0   : > { %9697 = vmatpush3.bf16.msra.mxu0 %v10782_v11  ;;  %9717 = vmatpush3.bf16.msra.mxu1 %v10783_v17  ;;  %v10813_v11 = vld [vmem:[%s11794_s19 + $0x840] sm:$0xff]   ;;  %v4259_v17 = vpack.c.bf16 %v12482_v25, %v12482_v25  ;;  %v10818_v25 = vld [vmem:[%s11794_s19 + $0x790] sm:$0xff]  }
 0x3f1   : > { %8070 = vmatprep.mubr.bf16.mxu1 %v4257_v14  ;;  %9698 = vmatprep.subr.bf16.mxu0 %v10784_v61  ;;  %v10815_v61 = vld [vmem:[%s11794_s19 + $0x800] sm:$0xff]   ;;  %v4261_v14 = vpack.c.bf16 %v12524_v4, %v12524_v4  ;;  %v10823_v4 = vld [vmem:[%s11794_s19 + $0x810] sm:$0xff]  }
 0x3f2   : > { %9718 = vmatprep.subr.bf16.mxu1 %v10785_v44  ;;  %v4256_v44 = vpack.c.bf16 %v12476_v23, %v12476_v23  ;;  %v10820_v23 = vld [vmem:[%s11794_s19 + $0x7d8] sm:$0xff]  }
 0x3f4   : > { %9699 = vmatpush3.bf16.msra.mxu0 %v10786_v33  ;;  %9719 = vmatpush3.bf16.msra.mxu1 %v10787_v45  ;;  %v10819_v33 = vld [vmem:[%s11794_s19 + $0x808] sm:$0xff]   ;;  %v10821_v45 = vld [vmem:[%s11794_s19 + $0x850] sm:$0xff]  }
 0x3f5   : > { %9700 = vmatprep.subr.bf16.mxu0 %v10788_v51  ;;  %9720 = vmatprep.subr.bf16.mxu1 %v10789_v49  ;;  %v10822_v51 = vld [vmem:[%s11794_s19 + $0x798] sm:$0xff]   ;;  %v10824_v49 = vld [vmem:[%s11794_s19 + $0x7e0] sm:$0xff]  }
 0x3f8   : > { %9701 = vmatpush3.bf16.msra.mxu0 %v10790_v43  ;;  %9721 = vmatpush3.bf16.msra.mxu1 %v10791_v13  ;;  %v10825_v43 = vld [vmem:[%s11794_s19 + $0x858] sm:$0xff]   ;;  %v10826_v13 = vld [vmem:[%s11794_s19 + $0x7a0] sm:$0xff]  }
 0x3f9   : > { %9702 = vmatprep.subr.bf16.mxu0 %v10792_v41  ;;  %9722 = vmatprep.subr.bf16.mxu1 %v10793_v19  ;;  %v10827_v41 = vld [vmem:[%s11794_s19 + $0x818] sm:$0xff]   ;;  %v10828_v19 = vld [vmem:[%s11794_s19 + $0x7e8] sm:$0xff]  }
 0x3fc   : > { %9703 = vmatpush3.bf16.msra.mxu0 %v10794_v20  ;;  %9723 = vmatpush3.bf16.msra.mxu1 %v10795_v1  ;;  %v10829_v20 = vld [vmem:[%s11794_s19 + $0x860] sm:$0xff]   ;;  %v10830_v1 = vld [vmem:[%s11794_s19 + $0x7a8] sm:$0xff]  }
 0x3fd   : > { %9704 = vmatprep.subr.bf16.mxu0 %v10796_v58  ;;  %9724 = vmatprep.subr.bf16.mxu1 %v10797_v27  ;;  %v10831_v58 = vld [vmem:[%s11794_s19 + $0x820] sm:$0xff]   ;;  %v10832_v27 = vld [vmem:[%s11794_s19 + $0x7f0] sm:$0xff]  }
 0x3fe   : > { %v12688_v48 = vpop.f32.mrb[48].mxu0 }
 0x3ff   : > { %v12690_v28 = vpop.f32.mrb[49].mxu0 }
 0x400   : > { %v4224_v30 = vpop.f32.mrb[50].mxu0  ;;  %9705 = vmatpush3.bf16.msra.mxu0 %v10798_v21  ;;  %9725 = vmatpush3.bf16.msra.mxu1 %v10799_v46  ;;  %v10833_v21 = vld [vmem:[%s11794_s19 + $0x868] sm:$0xff]  }
 0x401   : > { %v4225_v26 = vpop.f32.mrb[51].mxu0  ;;  %9706 = vmatprep.subr.bf16.mxu0 %v10800_v60  ;;  %9726 = vmatprep.subr.bf16.mxu1 %v10801_v22  ;;  %v10834_v22 = vld [vmem:[%s11794_s19 + $0x7b0] sm:$0xff]  }
 0x402   : > { %v9424_v36 = vpop.f32.mrb[48].mxu1 }
 0x403   : > { %v9425_v37 = vpop.f32.mrb[49].mxu1 }
 0x404   : > { %v12698_v52 = vadd.f32 %v9425_v37, %v9424_v36  ;;  %v9427_v55 = vpop.f32.mrb[50].mxu1  ;;  %9707 = vmatpush3.bf16.msra.mxu0 %v10802_v29  ;;  %9727 = vmatpush3.bf16.msra.mxu1 %v10803_v42  ;;  %v10835_v29 = vld [vmem:[%s11794_s19 + $0x828] sm:$0xff]  }
 0x405   : > { %v9428_v57 = vpop.f32.mrb[51].mxu1  ;;  %9708 = vmatprep.subr.bf16.mxu0 %v10804_v31  ;;  %9728 = vmatprep.subr.bf16.mxu1 %v10805_v7  ;;  %v10836_v31 = vld [vmem:[%s11794_s19 + $0x7f8] sm:$0xff]   ;;  %v10837_v7 = vld [vmem:[%s11794_s19 + $0x870] sm:$0xff]  }
 0x406   : > { %v10839_v55 = vld [vmem:[%s11794_s19 + $0x830] sm:$0xff]  }
 0x408   : > { %9709 = vmatpush3.bf16.msra.mxu0 %v10806_v40  ;;  %9729 = vmatpush3.bf16.msra.mxu1 %v10807_v6  ;;  %v10838_v6 = vld [vmem:[%s11794_s19 + $0x7b8] sm:$0xff]  }
 0x409   : > { %9730 = vmatprep.subr.bf16.mxu1 %v10808_v56  ;;  %9738 = vmatprep.subr.bf16.mxu0 %v10809_v0  ;;  %v10840_v0 = vld [vmem:[%s11794_s19 + $0x878] sm:$0xff]  }
 0x40b   : > { %8031 = vmatmul.mubr.bf16.vlgmr.msra.gmra.mrb[76].mxu0 %v4254_v12  ;;  %v10843_v12 = vld [vmem:[%s11794_s19 + $0x880] sm:$0xff]  }
 0x40c   : > { %9731 = vmatpush3.bf16.msra.mxu1 %v10810_v3  ;;  %9739 = vmatpush3.bf16.msra.mxu0 %v10811_v5  ;;  %v10841_v5 = vld [vmem:[%s11794_s19 + $0x8c0] sm:$0xff]  }
 0x40d   : > { %8110 = vmatprep.mubr.bf16.mxu0 %v4259_v17  ;;  %9740 = vmatprep.subr.bf16.mxu0 %v10812_v10  ;;  %v10845_v17 = vld [vmem:[%s11794_s19 + $0x940] sm:$0xff]  }
 0x40e   : > { %9760 = vmatprep.subr.bf16.mxu1 %v10813_v11  ;;  %v4258_v11 = vpack.c.bf16 %v12478_v2, %v12478_v2  ;;  %v4260_v2 = vpack.c.bf16 %v12517_v24, %v12517_v24  ;;  %v10852_v24 = vld [vmem:[%s11794_s19 + $0x8d8] sm:$0xff]  }
 0x40f   : > { %8071 = vmatmul.mubr.bf16.vlgmr.msra.gmra.mrb[76].mxu1 %v4256_v44  ;;  %v10847_v44 = vld [vmem:[%s11794_s19 + $0x900] sm:$0xff]  }
 0x410   : > { %9741 = vmatpush3.bf16.msra.mxu0 %v10814_v15  ;;  %9761 = vmatpush3.bf16.msra.mxu1 %v10815_v61  ;;  %v10844_v15 = vld [vmem:[%s11794_s19 + $0x8c8] sm:$0xff]   ;;  %v4263_v61 = vpack.c.bf16 %v12526_v18, %v12526_v18  ;;  %v4265_v18 = vpack.c.bf16 %v12565_v8, %v12565_v8  ;;  %v10855_v8 = vld [vmem:[%s11794_s19 + $0x910] sm:$0xff]  }
 0x411   : > { %8150 = vmatprep.mubr.bf16.mxu1 %v4261_v14  ;;  %9742 = vmatprep.subr.bf16.mxu0 %v10816_v59  ;;  %v10846_v59 = vld [vmem:[%s11794_s19 + $0x888] sm:$0xff]  }
 0x412   : > { %9762 = vmatprep.subr.bf16.mxu1 %v10817_v32  ;;  %v10848_v32 = vld [vmem:[%s11794_s19 + $0x8d0] sm:$0xff]   ;;  %v10849_v14 = vld [vmem:[%s11794_s19 + $0x948] sm:$0xff]  }
 0x414   : > { %9743 = vmatpush3.bf16.msra.mxu0 %v10818_v25  ;;  %9763 = vmatpush3.bf16.msra.mxu1 %v10819_v33  ;;  %v10850_v25 = vld [vmem:[%s11794_s19 + $0x890] sm:$0xff]   ;;  %v10851_v33 = vld [vmem:[%s11794_s19 + $0x908] sm:$0xff]  }
 0x415   : > { %9744 = vmatprep.subr.bf16.mxu0 %v10820_v23  ;;  %9764 = vmatprep.subr.bf16.mxu1 %v10821_v45  ;;  %v10853_v23 = vld [vmem:[%s11794_s19 + $0x950] sm:$0xff]   ;;  %v10854_v45 = vld [vmem:[%s11794_s19 + $0x898] sm:$0xff]  }
 0x418   : > { %9745 = vmatpush3.bf16.msra.mxu0 %v10822_v51  ;;  %9765 = vmatpush3.bf16.msra.mxu1 %v10823_v4  ;;  %v10856_v51 = vld [vmem:[%s11794_s19 + $0x8e0] sm:$0xff]   ;;  %v10857_v4 = vld [vmem:[%s11794_s19 + $0x958] sm:$0xff]  }
 0x419   : > { %9746 = vmatprep.subr.bf16.mxu0 %v10824_v49  ;;  %9766 = vmatprep.subr.bf16.mxu1 %v10825_v43  ;;  %v10858_v49 = vld [vmem:[%s11794_s19 + $0x8a0] sm:$0xff]   ;;  %v10859_v43 = vld [vmem:[%s11794_s19 + $0x918] sm:$0xff]  }
 0x41c   : > { %9747 = vmatpush3.bf16.msra.mxu0 %v10826_v13  ;;  %9767 = vmatpush3.bf16.msra.mxu1 %v10827_v41  ;;  %v10860_v13 = vld [vmem:[%s11794_s19 + $0x8e8] sm:$0xff]   ;;  %v10861_v41 = vld [vmem:[%s11794_s19 + $0x960] sm:$0xff]  }
 0x41d   : > { %9748 = vmatprep.subr.bf16.mxu0 %v10828_v19  ;;  %9768 = vmatprep.subr.bf16.mxu1 %v10829_v20  ;;  %v10862_v19 = vld [vmem:[%s11794_s19 + $0x8a8] sm:$0xff]   ;;  %v10863_v20 = vld [vmem:[%s11794_s19 + $0x920] sm:$0xff]  }
 0x41e   : > { %v9446_v46 = vpop.f32.mrb[52].mxu0 }
 0x41f   : > { %v9447_v60 = vpop.f32.mrb[53].mxu0 }
 0x420   : > { %v9448_v42 = vadd.f32 %v9447_v60, %v9446_v46  ;;  %v9449_v30 = vpop.f32.mrb[54].mxu0  ;;  %9749 = vmatpush3.bf16.msra.mxu0 %v10830_v1  ;;  %9769 = vmatpush3.bf16.msra.mxu1 %v10831_v58  ;;  %v10864_v1 = vld [vmem:[%s11794_s19 + $0x8f0] sm:$0xff]   ;;  %v10865_v58 = vld [vmem:[%s11794_s19 + $0x968] sm:$0xff]  }
 0x421   : > { %v9450_v26 = vpop.f32.mrb[55].mxu0  ;;  %9750 = vmatprep.subr.bf16.mxu0 %v10832_v27  ;;  %9770 = vmatprep.subr.bf16.mxu1 %v10833_v21  ;;  %v10868_v30 = vld [vmem:[%s11794_s19 + $0x8f8] sm:$0xff]  }
 0x422   : > { %v7553_v36 = vadd.f32 %v9448_v42, %v12698_v52  ;;  %v9468_v37 = vpop.f32.mrb[52].mxu1  ;;  %v10842_v52 = vld [vmem:[%s11794_s19 + $0x838] sm:$0xff]  }
 0x423   : > { %v9469_v40 = vpop.f32.mrb[53].mxu1 }
 0x424   : > { %v9470_v56 = vadd.f32 %v9469_v40, %v9468_v37  ;;  %v9471_v57 = vpop.f32.mrb[54].mxu1  ;;  %9751 = vmatpush3.bf16.msra.mxu0 %v10834_v22  ;;  %9771 = vmatpush3.bf16.msra.mxu1 %v10835_v29  ;;  %v10866_v22 = vld [vmem:[%s11794_s19 + $0x8b0] sm:$0xff]   ;;  %v10867_v29 = vld [vmem:[%s11794_s19 + $0x928] sm:$0xff]  }
 0x425   : > { %v9472_v3 = vpop.f32.mrb[55].mxu1  ;;  %9752 = vmatprep.subr.bf16.mxu0 %v10836_v31  ;;  %9772 = vmatprep.subr.bf16.mxu1 %v10837_v7  ;;  %v10869_v31 = vld [vmem:[%s11794_s19 + $0x970] sm:$0xff]   ;;  %v10872_v57 = vld [vmem:[%s11794_s19 + $0x978] sm:$0xff]  }
 0x426   : > { %v12743_v10 = vadd.f32 %v9470_v56, %v7553_v36 }
 0x428   : > { %9753 = vmatpush3.bf16.msra.mxu0 %v10838_v6  ;;  %9773 = vmatpush3.bf16.msra.mxu1 %v10839_v55  ;;  %v10870_v6 = vld [vmem:[%s11794_s19 + $0x8b8] sm:$0xff]   ;;  %v10871_v55 = vld [vmem:[%s11794_s19 + $0x930] sm:$0xff]  }
 0x429   : > { %9774 = vmatprep.subr.bf16.mxu1 %v10840_v0  ;;  %9782 = vmatprep.subr.bf16.mxu0 %v10841_v5  ;;  %v10873_v0 = vld [vmem:[%s11794_s19 + $0x9c0] sm:$0xff]   ;;  %v10874_v5 = vld [vmem:[%s11794_s19 + $0x938] sm:$0xff]  }
 0x42b   : > { %8111 = vmatmul.mubr.bf16.vlgmr.msra.gmra.mrb[80].mxu0 %v4258_v11  ;;  %v10877_v11 = vld [vmem:[%s11794_s19 + $0xa40] sm:$0xff]  }
 0x42c   : > { %9775 = vmatpush3.bf16.msra.mxu1 %v10842_v52  ;;  %9783 = vmatpush3.bf16.msra.mxu0 %v10843_v12  ;;  %v4262_v52 = vpack.c.bf16 %v12519_v16, %v12519_v16  ;;  %v10876_v12 = vld [vmem:[%s11794_s19 + $0x9c8] sm:$0xff]   ;;  %v4264_v16 = vpack.c.bf16 %v12557_v62, %v12557_v62  ;;  %v10884_v62 = vld [vmem:[%s11794_s19 + $0x9d8] sm:$0xff]  }
 0x42d   : > { %8190 = vmatprep.mubr.bf16.mxu0 %v4263_v61  ;;  %9784 = vmatprep.subr.bf16.mxu0 %v10844_v15  ;;  %v4267_v15 = vpack.c.bf16 %v12567_v9, %v12567_v9  ;;  %v10879_v61 = vld [vmem:[%s11794_s19 + $0xa00] sm:$0xff]   ;;  %v4269_v9 = vpack.c.bf16 %v12605_v53, %v12605_v53  ;;  %v10887_v53 = vld [vmem:[%s11794_s19 + $0xa10] sm:$0xff]  }
 0x42e   : > { %9804 = vmatprep.subr.bf16.mxu1 %v10845_v17  ;;  %v10878_v17 = vld [vmem:[%s11794_s19 + $0x988] sm:$0xff]  }
 0x42f   : > { %8151 = vmatmul.mubr.bf16.vlgmr.msra.gmra.mrb[80].mxu1 %v4260_v2  ;;  %v10882_v2 = vld [vmem:[%s11794_s19 + $0x990] sm:$0xff]  }
 0x430   : > { %9785 = vmatpush3.bf16.msra.mxu0 %v10846_v59  ;;  %9805 = vmatpush3.bf16.msra.mxu1 %v10847_v44  ;;  %v10880_v59 = vld [vmem:[%s11794_s19 + $0x9d0] sm:$0xff]   ;;  %v10881_v44 = vld [vmem:[%s11794_s19 + $0xa48] sm:$0xff]  }
 0x431   : > { %8230 = vmatprep.mubr.bf16.mxu1 %v4265_v18  ;;  %9786 = vmatprep.subr.bf16.mxu0 %v10848_v32  ;;  %v10883_v32 = vld [vmem:[%s11794_s19 + $0xa08] sm:$0xff]   ;;  %v10886_v18 = vld [vmem:[%s11794_s19 + $0x998] sm:$0xff]  }
 0x432   : > { %9806 = vmatprep.subr.bf16.mxu1 %v10849_v14  ;;  %v10885_v14 = vld [vmem:[%s11794_s19 + $0xa50] sm:$0xff]  }
 0x434   : > { %9787 = vmatpush3.bf16.msra.mxu0 %v10850_v25  ;;  %9807 = vmatpush3.bf16.msra.mxu1 %v10851_v33  ;;  %v10888_v25 = vld [vmem:[%s11794_s19 + $0x9e0] sm:$0xff]   ;;  %v10889_v33 = vld [vmem:[%s11794_s19 + $0xa58] sm:$0xff]  }
 0x435   : > { %9788 = vmatprep.subr.bf16.mxu0 %v10852_v24  ;;  %9808 = vmatprep.subr.bf16.mxu1 %v10853_v23  ;;  %v10890_v24 = vld [vmem:[%s11794_s19 + $0x9a0] sm:$0xff]   ;;  %v10891_v23 = vld [vmem:[%s11794_s19 + $0xa18] sm:$0xff]  }
 0x438   : > { %9789 = vmatpush3.bf16.msra.mxu0 %v10854_v45  ;;  %9809 = vmatpush3.bf16.msra.mxu1 %v10855_v8  ;;  %v10892_v45 = vld [vmem:[%s11794_s19 + $0x9e8] sm:$0xff]   ;;  %v10893_v8 = vld [vmem:[%s11794_s19 + $0xa60] sm:$0xff]  }
 0x439   : > { %9790 = vmatprep.subr.bf16.mxu0 %v10856_v51  ;;  %9810 = vmatprep.subr.bf16.mxu1 %v10857_v4  ;;  %v10894_v51 = vld [vmem:[%s11794_s19 + $0x9a8] sm:$0xff]   ;;  %v10895_v4 = vld [vmem:[%s11794_s19 + $0xa20] sm:$0xff]  }
 0x43c   : > { %9791 = vmatpush3.bf16.msra.mxu0 %v10858_v49  ;;  %9811 = vmatpush3.bf16.msra.mxu1 %v10859_v43  ;;  %v10896_v49 = vld [vmem:[%s11794_s19 + $0x9f0] sm:$0xff]   ;;  %v10897_v43 = vld [vmem:[%s11794_s19 + $0xa68] sm:$0xff]  }
 0x43d   : > { %9792 = vmatprep.subr.bf16.mxu0 %v10860_v13  ;;  %9812 = vmatprep.subr.bf16.mxu1 %v10861_v41 }
 0x43e   : > { %v9490_v27 = vpop.f32.mrb[56].mxu0 }
 0x43f   : > { %v9491_v21 = vpop.f32.mrb[57].mxu0 }
 0x440   : > { %v9492_v46 = vadd.f32 %v9491_v21, %v9490_v27  ;;  %v9493_v60 = vpop.f32.mrb[58].mxu0  ;;  %9793 = vmatpush3.bf16.msra.mxu0 %v10862_v19  ;;  %9813 = vmatpush3.bf16.msra.mxu1 %v10863_v20  ;;  %v10900_v21 = vld [vmem:[%s11794_s19 + $0x9f8] sm:$0xff]  }
 0x441   : > { %v9494_v42 = vpop.f32.mrb[59].mxu0  ;;  %9794 = vmatprep.subr.bf16.mxu0 %v10864_v1  ;;  %9814 = vmatprep.subr.bf16.mxu1 %v10865_v58  ;;  %v10898_v1 = vld [vmem:[%s11794_s19 + $0x9b0] sm:$0xff]   ;;  %v10899_v58 = vld [vmem:[%s11794_s19 + $0xa28] sm:$0xff]  }
 0x442   : > { %v7633_v26 = vadd.f32 %v9492_v46, %v12743_v10  ;;  %v9512_v7 = vpop.f32.mrb[56].mxu1  ;;  %v10875_v10 = vld [vmem:[%s11794_s19 + $0x980] sm:$0xff]   ;;  %v10901_v46 = vld [vmem:[%s11794_s19 + $0xa70] sm:$0xff]  }
 0x443   : > { %v9513_v36 = vpop.f32.mrb[57].mxu1 }
 0x444   : > { %v9514_v37 = vadd.f32 %v9513_v36, %v9512_v7  ;;  %v9515_v40 = vpop.f32.mrb[58].mxu1  ;;  %9795 = vmatpush3.bf16.msra.mxu0 %v10866_v22  ;;  %9815 = vmatpush3.bf16.msra.mxu1 %v10867_v29  ;;  %v10904_v36 = vld [vmem:[%s11794_s19 + $0xa78] sm:$0xff]  }
 0x445   : > { %v9516_v56 = vpop.f32.mrb[59].mxu1  ;;  %9796 = vmatprep.subr.bf16.mxu0 %v10868_v30  ;;  %9816 = vmatprep.subr.bf16.mxu1 %v10869_v31  ;;  %v10902_v31 = vld [vmem:[%s11794_s19 + $0x9b8] sm:$0xff]  }
 0x446   : > { %v12786_v3 = vadd.f32 %v9514_v37, %v7633_v26  ;;  %v10903_v26 = vld [vmem:[%s11794_s19 + $0xa30] sm:$0xff]   ;;  %v10905_v37 = vld [vmem:[%s11794_s19 + $0xac0] sm:$0xff]   ;;  %v4266_v56 = vpack.c.bf16 %v12559_v63, %v12559_v63  ;;  %v4268_v63 = vpack.c.bf16 %v12600_v50, %v12600_v50  ;;  %v10916_v50 = vld [vmem:[%s11794_s19 + $0xad8] sm:$0xff]  }
 0x448   : > { %9797 = vmatpush3.bf16.msra.mxu0 %v10870_v6  ;;  %9817 = vmatpush3.bf16.msra.mxu1 %v10871_v55  ;;  %v10906_v6 = vld [vmem:[%s11794_s19 + $0xa38] sm:$0xff]   ;;  %v10907_v55 = vld [vmem:[%s11794_s19 + $0xa80] sm:$0xff]  }
 0x449   : > { %9818 = vmatprep.subr.bf16.mxu1 %v10872_v57  ;;  %9826 = vmatprep.subr.bf16.mxu0 %v10873_v0  ;;  %v10908_v57 = vld [vmem:[%s11794_s19 + $0xac8] sm:$0xff]   ;;  %v10909_v0 = vld [vmem:[%s11794_s19 + $0xb40] sm:$0xff]  }
 0x44b   : > { %8191 = vmatmul.mubr.bf16.vlgmr.msra.gmra.mrb[84].mxu0 %v4262_v52  ;;  %v10912_v52 = vld [vmem:[%s11794_s19 + $0xad0] sm:$0xff]  }
 0x44c   : > { %9819 = vmatpush3.bf16.msra.mxu1 %v10874_v5  ;;  %9827 = vmatpush3.bf16.msra.mxu0 %v10875_v10  ;;  %v10910_v5 = vld [vmem:[%s11794_s19 + $0xa88] sm:$0xff]   ;;  %v10911_v10 = vld [vmem:[%s11794_s19 + $0xb00] sm:$0xff]  }
 0x44d   : > { %8270 = vmatprep.mubr.bf16.mxu0 %v4267_v15  ;;  %9828 = vmatprep.subr.bf16.mxu0 %v10876_v12  ;;  %v10913_v12 = vld [vmem:[%s11794_s19 + $0xb48] sm:$0xff]  }
 0x44e   : > { %9848 = vmatprep.subr.bf16.mxu1 %v10877_v11  ;;  %v10914_v11 = vld [vmem:[%s11794_s19 + $0xa90] sm:$0xff]   ;;  %v10915_v15 = vld [vmem:[%s11794_s19 + $0xb08] sm:$0xff]  }
 0x44f   : > { %8231 = vmatmul.mubr.bf16.vlgmr.msra.gmra.mrb[84].mxu1 %v4264_v16  ;;  %v10920_v16 = vld [vmem:[%s11794_s19 + $0xae0] sm:$0xff]  }
 0x450   : > { %9829 = vmatpush3.bf16.msra.mxu0 %v10878_v17  ;;  %9849 = vmatpush3.bf16.msra.mxu1 %v10879_v61  ;;  %v10917_v17 = vld [vmem:[%s11794_s19 + $0xb50] sm:$0xff]   ;;  %v10918_v61 = vld [vmem:[%s11794_s19 + $0xa98] sm:$0xff]  }
 0x451   : > { %8310 = vmatprep.mubr.bf16.mxu1 %v4269_v9  ;;  %9830 = vmatprep.subr.bf16.mxu0 %v10880_v59  ;;  %v10921_v59 = vld [vmem:[%s11794_s19 + $0xb58] sm:$0xff]  }
 0x452   : > { %9850 = vmatprep.subr.bf16.mxu1 %v10881_v44  ;;  %v10922_v44 = vld [vmem:[%s11794_s19 + $0xaa0] sm:$0xff]   ;;  %v10923_v9 = vld [vmem:[%s11794_s19 + $0xb18] sm:$0xff]  }
 0x454   : > { %9831 = vmatpush3.bf16.msra.mxu0 %v10882_v2  ;;  %9851 = vmatpush3.bf16.msra.mxu1 %v10883_v32  ;;  %v10924_v2 = vld [vmem:[%s11794_s19 + $0xae8] sm:$0xff]   ;;  %v10925_v32 = vld [vmem:[%s11794_s19 + $0xb60] sm:$0xff]  }
 0x455   : > { %9832 = vmatprep.subr.bf16.mxu0 %v10884_v62  ;;  %9852 = vmatprep.subr.bf16.mxu1 %v10885_v14  ;;  %v10926_v62 = vld [vmem:[%s11794_s19 + $0xaa8] sm:$0xff]   ;;  %v10927_v14 = vld [vmem:[%s11794_s19 + $0xb20] sm:$0xff]  }
 0x458   : > { %9833 = vmatpush3.bf16.msra.mxu0 %v10886_v18  ;;  %9853 = vmatpush3.bf16.msra.mxu1 %v10887_v53  ;;  %v10928_v18 = vld [vmem:[%s11794_s19 + $0xaf0] sm:$0xff]   ;;  %v10929_v53 = vld [vmem:[%s11794_s19 + $0xb68] sm:$0xff]  }
 0x459   : > { %9834 = vmatprep.subr.bf16.mxu0 %v10888_v25  ;;  %9854 = vmatprep.subr.bf16.mxu1 %v10889_v33 }
 0x45c   : > { %9835 = vmatpush3.bf16.msra.mxu0 %v10890_v24  ;;  %9855 = vmatpush3.bf16.msra.mxu1 %v10891_v23 }
 0x45d   : > { %9836 = vmatprep.subr.bf16.mxu0 %v10892_v45  ;;  %9856 = vmatprep.subr.bf16.mxu1 %v10893_v8  ;;  %v10930_v45 = vld [vmem:[%s11794_s19 + $0xab0] sm:$0xff]   ;;  %v10931_v8 = vld [vmem:[%s11794_s19 + $0xb28] sm:$0xff]  }
 0x45e   : > { %v9534_v13 = vpop.f32.mrb[60].mxu0 }
 0x45f   : > { %v9535_v41 = vpop.f32.mrb[61].mxu0 }
 0x460   : > { %v9536_v19 = vadd.f32 %v9535_v41, %v9534_v13  ;;  %v9537_v20 = vpop.f32.mrb[62].mxu0  ;;  %9837 = vmatpush3.bf16.msra.mxu0 %v10894_v51  ;;  %9857 = vmatpush3.bf16.msra.mxu1 %v10895_v4  ;;  %v10932_v4 = vld [vmem:[%s11794_s19 + $0xaf8] sm:$0xff]  }
 0x461   : > { %v9538_v27 = vpop.f32.mrb[63].mxu0  ;;  %9838 = vmatprep.subr.bf16.mxu0 %v10896_v49  ;;  %9858 = vmatprep.subr.bf16.mxu1 %v10897_v43  ;;  %v10933_v49 = vld [vmem:[%s11794_s19 + $0xb70] sm:$0xff]  }
 0x462   : > { %v7713_v60 = vadd.f32 %v9536_v19, %v12786_v3  ;;  %v9556_v22 = vpop.f32.mrb[60].mxu1  ;;  %v4271_v3 = vpack.c.bf16 %v12607_v54, %v12607_v54  ;;  %v4273_v54 = vpack.c.bf16 %v12650_v38, %v12650_v38  ;;  %v10919_v38 = vld [vmem:[%s11794_s19 + $0xb10] sm:$0xff]  }
 0x463   : > { %v9557_v29 = vpop.f32.mrb[61].mxu1 }
 0x464   : > { %v9558_v42 = vadd.f32 %v9557_v29, %v9556_v22  ;;  %v9559_v30 = vpop.f32.mrb[62].mxu1  ;;  %9839 = vmatpush3.bf16.msra.mxu0 %v10898_v1  ;;  %9859 = vmatpush3.bf16.msra.mxu1 %v10899_v58  ;;  %v10934_v1 = vld [vmem:[%s11794_s19 + $0xab8] sm:$0xff]   ;;  %v10935_v58 = vld [vmem:[%s11794_s19 + $0xb30] sm:$0xff]   ;;  %v10939_v29 = vld [vmem:[%s11794_s19 + $0xb80] sm:$0xff]  }
 0x465   : > { %v9560_v7 = vpop.f32.mrb[63].mxu1  ;;  %9840 = vmatprep.subr.bf16.mxu0 %v10900_v21  ;;  %9860 = vmatprep.subr.bf16.mxu1 %v10901_v46  ;;  %v10936_v21 = vld [vmem:[%s11794_s19 + $0xb78] sm:$0xff]   ;;  %v10937_v46 = vld [vmem:[%s11794_s19 + $0xbc0] sm:$0xff]   ;;  %v10940_v30 = vld [vmem:[%s11794_s19 + $0xbc8] sm:$0xff]  }
 0x466   : > { %v12829_v40 = vadd.f32 %v9558_v42, %v7713_v60  ;;  %v10938_v22 = vld [vmem:[%s11794_s19 + $0xb38] sm:$0xff]   ;;  %v4270_v42 = vpack.c.bf16 %v12602_v35, %v12602_v35  ;;  %v10942_v7 = vld [vmem:[%s11794_s19 + $0xb88] sm:$0xff]   ;;  %v4272_v35 = vpack.c.bf16 %v12644_v34, %v12644_v34 }
 0x467   : > { %v10948_v34 = vld [vmem:[%s11794_s19 + $0xbd8] sm:$0xff]  }
 0x468   : > { %9841 = vmatpush3.bf16.msra.mxu0 %v10902_v31  ;;  %9861 = vmatpush3.bf16.msra.mxu1 %v10903_v26  ;;  %v10941_v31 = vld [vmem:[%s11794_s19 + $0xc40] sm:$0xff]   ;;  %v4275_v26 = vpack.c.bf16 %v12652_v39, %v12652_v39  ;;  %v4277_v39 = vpack.c.bf16 %v12690_v28, %v12690_v28  ;;  %v10951_v28 = vld [vmem:[%s11794_s19 + $0xc10] sm:$0xff]  }
 0x469   : > { %9862 = vmatprep.subr.bf16.mxu1 %v10904_v36  ;;  %9870 = vmatprep.subr.bf16.mxu0 %v10905_v37  ;;  %v10943_v36 = vld [vmem:[%s11794_s19 + $0xc00] sm:$0xff]   ;;  %v10944_v37 = vld [vmem:[%s11794_s19 + $0xbd0] sm:$0xff]  }
 0x46b   : > { %8271 = vmatmul.mubr.bf16.vlgmr.msra.gmra.mrb[88].mxu0 %v4266_v56  ;;  %v10949_v56 = vld [vmem:[%s11794_s19 + $0xc50] sm:$0xff]  }
 0x46c   : > { %9863 = vmatpush3.bf16.msra.mxu1 %v10906_v6  ;;  %9871 = vmatpush3.bf16.msra.mxu0 %v10907_v55  ;;  %v10946_v6 = vld [vmem:[%s11794_s19 + $0xb90] sm:$0xff]   ;;  %v10947_v55 = vld [vmem:[%s11794_s19 + $0xc08] sm:$0xff]  }
 0x46d   : > { %8350 = vmatprep.mubr.bf16.mxu0 %v4271_v3  ;;  %9872 = vmatprep.subr.bf16.mxu0 %v10908_v57  ;;  %v10950_v57 = vld [vmem:[%s11794_s19 + $0xb98] sm:$0xff]  }
 0x46e   : > { %9892 = vmatprep.subr.bf16.mxu1 %v10909_v0  ;;  %v10952_v0 = vld [vmem:[%s11794_s19 + $0xbe0] sm:$0xff]   ;;  %v10953_v3 = vld [vmem:[%s11794_s19 + $0xc58] sm:$0xff]  }
 0x46f   : > { %8311 = vmatmul.mubr.bf16.vlgmr.msra.gmra.mrb[88].mxu1 %v4268_v63  ;;  %v10956_v63 = vld [vmem:[%s11794_s19 + $0xbe8] sm:$0xff]  }
 0x470   : > { %9873 = vmatpush3.bf16.msra.mxu0 %v10910_v5  ;;  %9893 = vmatpush3.bf16.msra.mxu1 %v10911_v10  ;;  %v10954_v5 = vld [vmem:[%s11794_s19 + $0xba0] sm:$0xff]   ;;  %v10955_v10 = vld [vmem:[%s11794_s19 + $0xc18] sm:$0xff]  }
 0x471   : > { %8390 = vmatprep.mubr.bf16.mxu1 %v4273_v54  ;;  %9874 = vmatprep.subr.bf16.mxu0 %v10912_v52  ;;  %v10957_v52 = vld [vmem:[%s11794_s19 + $0xc60] sm:$0xff]  }
 0x472   : > { %9894 = vmatprep.subr.bf16.mxu1 %v10913_v12  ;;  %v10958_v12 = vld [vmem:[%s11794_s19 + $0xba8] sm:$0xff]   ;;  %v10959_v54 = vld [vmem:[%s11794_s19 + $0xc20] sm:$0xff]  }
 0x474   : > { %9875 = vmatpush3.bf16.msra.mxu0 %v10914_v11  ;;  %9895 = vmatpush3.bf16.msra.mxu1 %v10915_v15  ;;  %v10960_v11 = vld [vmem:[%s11794_s19 + $0xbf0] sm:$0xff]   ;;  %v10961_v15 = vld [vmem:[%s11794_s19 + $0xc68] sm:$0xff]  }
 0x475   : > { %9876 = vmatprep.subr.bf16.mxu0 %v10916_v50  ;;  %9896 = vmatprep.subr.bf16.mxu1 %v10917_v17 }
 0x478   : > { %9877 = vmatpush3.bf16.msra.mxu0 %v10918_v61  ;;  %9897 = vmatpush3.bf16.msra.mxu1 %v10919_v38 }
 0x479   : > { %9878 = vmatprep.subr.bf16.mxu0 %v10920_v16  ;;  %9898 = vmatprep.subr.bf16.mxu1 %v10921_v59  ;;  %v10962_v16 = vld [vmem:[%s11794_s19 + $0xbb0] sm:$0xff]   ;;  %v10963_v59 = vld [vmem:[%s11794_s19 + $0xc28] sm:$0xff]  }
 0x47c   : > { %9879 = vmatpush3.bf16.msra.mxu0 %v10922_v44  ;;  %9899 = vmatpush3.bf16.msra.mxu1 %v10923_v9  ;;  %v10964_v9 = vld [vmem:[%s11794_s19 + $0xbf8] sm:$0xff]  }
 0x47d   : > { %9880 = vmatprep.subr.bf16.mxu0 %v10924_v2  ;;  %9900 = vmatprep.subr.bf16.mxu1 %v10925_v32  ;;  %v10965_v2 = vld [vmem:[%s11794_s19 + $0xc70] sm:$0xff]  }
 0x47e   : > { %v9578_v25 = vpop.f32.mrb[64].mxu0 }
 0x47f   : > { %v9579_v33 = vpop.f32.mrb[65].mxu0 }
 0x480   : > { %v9580_v24 = vadd.f32 %v9579_v33, %v9578_v25  ;;  %v9581_v23 = vpop.f32.mrb[66].mxu0  ;;  %9881 = vmatpush3.bf16.msra.mxu0 %v10926_v62  ;;  %9901 = vmatpush3.bf16.msra.mxu1 %v10927_v14  ;;  %v10966_v25 = vld [vmem:[%s11794_s19 + $0xbb8] sm:$0xff]   ;;  %v10967_v33 = vld [vmem:[%s11794_s19 + $0xc30] sm:$0xff]  }
 0x481   : > { %v9582_v51 = vpop.f32.mrb[67].mxu0  ;;  %9882 = vmatprep.subr.bf16.mxu0 %v10928_v18  ;;  %9902 = vmatprep.subr.bf16.mxu1 %v10929_v53  ;;  %v10968_v23 = vld [vmem:[%s11794_s19 + $0xc78] sm:$0xff]  }
 0x482   : > { %v7793_v43 = vadd.f32 %v9580_v24, %v12829_v40  ;;  %v9600_v13 = vpop.f32.mrb[64].mxu1  ;;  %v10945_v40 = vld [vmem:[%s11794_s19 + $0xc48] sm:$0xff]   ;;  %v4274_v51 = vpack.c.bf16 %v12646_v47, %v12646_v47 }
 0x483   : > { %v9601_v41 = vpop.f32.mrb[65].mxu1 }
 0x484   : > { %v9602_v19 = vadd.f32 %v9601_v41, %v9600_v13  ;;  %v9603_v20 = vpop.f32.mrb[66].mxu1  ;;  %9883 = vmatpush3.bf16.msra.mxu0 %v10930_v45  ;;  %9903 = vmatpush3.bf16.msra.mxu1 %v10931_v8  ;;  %v10969_v8 = vld [vmem:[%s11794_s19 + $0xc38] sm:$0xff]  }
 0x485   : > { %v9604_v27 = vpop.f32.mrb[67].mxu1  ;;  %9884 = vmatprep.subr.bf16.mxu0 %v10932_v4  ;;  %9904 = vmatprep.subr.bf16.mxu1 %v10933_v49  ;;  %v4276_v4 = vpack.c.bf16 %v12688_v48, %v12688_v48 }
 0x486   : > { %v12872_v60 = vadd.f32 %v9602_v19, %v7793_v43 }
 0x488   : > { %9885 = vmatpush3.bf16.msra.mxu0 %v10934_v1  ;;  %9905 = vmatpush3.bf16.msra.mxu1 %v10935_v58 }
 0x489   : > { %9906 = vmatprep.subr.bf16.mxu1 %v10936_v21  ;;  %9914 = vmatprep.subr.bf16.mxu0 %v10937_v46 }
 0x48b   : > { %8351 = vmatmul.mubr.bf16.vlgmr.msra.gmra.mrb[92].mxu0 %v4270_v42 }
 0x48c   : > { %9907 = vmatpush3.bf16.msra.mxu1 %v10938_v22  ;;  %9915 = vmatpush3.bf16.msra.mxu0 %v10939_v29 }
 0x48d   : > { %8430 = vmatprep.mubr.bf16.mxu0 %v4275_v26  ;;  %9916 = vmatprep.subr.bf16.mxu0 %v10940_v30 }
 0x48e   : > { %9936 = vmatprep.subr.bf16.mxu1 %v10941_v31 }
 0x48f   : > { %8391 = vmatmul.mubr.bf16.vlgmr.msra.gmra.mrb[92].mxu1 %v4272_v35 }
 0x490   : > { %9917 = vmatpush3.bf16.msra.mxu0 %v10942_v7  ;;  %9937 = vmatpush3.bf16.msra.mxu1 %v10943_v36 }
 0x491   : > { %8470 = vmatprep.mubr.bf16.mxu1 %v4277_v39  ;;  %9918 = vmatprep.subr.bf16.mxu0 %v10944_v37 }
 0x492   : > { %9938 = vmatprep.subr.bf16.mxu1 %v10945_v40 }
 0x494   : > { %9919 = vmatpush3.bf16.msra.mxu0 %v10946_v6  ;;  %9939 = vmatpush3.bf16.msra.mxu1 %v10947_v55 }
 0x495   : > { %9920 = vmatprep.subr.bf16.mxu0 %v10948_v34  ;;  %9940 = vmatprep.subr.bf16.mxu1 %v10949_v56 }
 0x498   : > { %9921 = vmatpush3.bf16.msra.mxu0 %v10950_v57  ;;  %9941 = vmatpush3.bf16.msra.mxu1 %v10951_v28 }
 0x499   : > { %9922 = vmatprep.subr.bf16.mxu0 %v10952_v0  ;;  %9942 = vmatprep.subr.bf16.mxu1 %v10953_v3 }
 0x49c   : > { %9923 = vmatpush3.bf16.msra.mxu0 %v10954_v5  ;;  %9943 = vmatpush3.bf16.msra.mxu1 %v10955_v10 }
 0x49d   : > { %9924 = vmatprep.subr.bf16.mxu0 %v10956_v63  ;;  %9944 = vmatprep.subr.bf16.mxu1 %v10957_v52 }
 0x49e   : > { %v9622_v50 = vpop.f32.mrb[68].mxu0 }
 0x49f   : > { %v9623_v17 = vpop.f32.mrb[69].mxu0 }
 0x4a0   : > { %v9624_v61 = vadd.f32 %v9623_v17, %v9622_v50  ;;  %v9625_v38 = vpop.f32.mrb[70].mxu0  ;;  %9925 = vmatpush3.bf16.msra.mxu0 %v10958_v12  ;;  %9945 = vmatpush3.bf16.msra.mxu1 %v10959_v54 }
 0x4a1   : > { %v9626_v44 = vpop.f32.mrb[71].mxu0  ;;  %9926 = vmatprep.subr.bf16.mxu0 %v10960_v11  ;;  %9946 = vmatprep.subr.bf16.mxu1 %v10961_v15 }
 0x4a2   : > { %v7873_v32 = vadd.f32 %v9624_v61, %v12872_v60  ;;  %v9644_v62 = vpop.f32.mrb[68].mxu1 }
 0x4a3   : > { %v9645_v14 = vpop.f32.mrb[69].mxu1 }
 0x4a4   : > { %v9646_v18 = vadd.f32 %v9645_v14, %v9644_v62  ;;  %v9647_v53 = vpop.f32.mrb[70].mxu1  ;;  %9927 = vmatpush3.bf16.msra.mxu0 %v10962_v16  ;;  %9947 = vmatpush3.bf16.msra.mxu1 %v10963_v59 }
 0x4a5   : > { %v9648_v24 = vpop.f32.mrb[71].mxu1  ;;  %9928 = vmatprep.subr.bf16.mxu0 %v10964_v9  ;;  %9948 = vmatprep.subr.bf16.mxu1 %v10965_v2 }
 0x4a6   : > { %v7913_v45 = vadd.f32 %v9646_v18, %v7873_v32 }
 0x4a8   : > { %9929 = vmatpush3.bf16.msra.mxu0 %v10966_v25  ;;  %9949 = vmatpush3.bf16.msra.mxu1 %v10967_v33 }
 0x4a9   : > { %9950 = vmatprep.subr.bf16.mxu1 %v10968_v23 }
 0x4ab   : > { %8431 = vmatmul.mubr.bf16.vlgmr.msra.gmra.mrb[96].mxu0 %v4274_v51 }
 0x4ac   : > { %9951 = vmatpush3.bf16.msra.mxu1 %v10969_v8 }
 0x4af   : > { %8471 = vmatmul.mubr.bf16.vlgmr.msra.gmra.mrb[96].mxu1 %v4276_v4 }
 0x4be   : > { %v9666_v49 = vpop.f32.mrb[72].mxu0 }
 0x4bf   : > { %v9667_v43 = vpop.f32.mrb[73].mxu0 }
 0x4c0   : > { %v9668_v13 = vadd.f32 %v9667_v43, %v9666_v49  ;;  %v9669_v41 = vpop.f32.mrb[74].mxu0 }
 0x4c1   : > { %v9670_v19 = vpop.f32.mrb[75].mxu0 }
 0x4c2   : > { %v7953_v20 = vadd.f32 %v9668_v13, %v7913_v45  ;;  %v9688_v1 = vpop.f32.mrb[72].mxu1 }
 0x4c3   : > { %v9689_v58 = vpop.f32.mrb[73].mxu1 }
 0x4c4   : > { %v9690_v27 = vadd.f32 %v9689_v58, %v9688_v1  ;;  %v9691_v21 = vpop.f32.mrb[74].mxu1 }
 0x4c5   : > { %v9692_v46 = vpop.f32.mrb[75].mxu1 }
 0x4c6   : > { %v7993_v60 = vadd.f32 %v9690_v27, %v7953_v20 }
 0x4de   : > { %v9710_v47 = vpop.f32.mrb[76].mxu0 }
 0x4df   : > { %v9711_v22 = vpop.f32.mrb[77].mxu0 }
 0x4e0   : > { %v9712_v29 = vadd.f32 %v9711_v22, %v9710_v47  ;;  %v9713_v42 = vpop.f32.mrb[78].mxu0 }
 0x4e1   : > { %v9714_v30 = vpop.f32.mrb[79].mxu0 }
 0x4e2   : > { %v8033_v31 = vadd.f32 %v9712_v29, %v7993_v60  ;;  %v9732_v48 = vpop.f32.mrb[76].mxu1 }
 0x4e3   : > { %v9733_v26 = vpop.f32.mrb[77].mxu1 }
 0x4e4   : > { %v9734_v7 = vadd.f32 %v9733_v26, %v9732_v48  ;;  %v9735_v36 = vpop.f32.mrb[78].mxu1  ;;  %v4227_v48 = vld [vmem:[#allocation3] sm:$0x3] }
 0x4e5   : > { %v9736_v35 = vpop.f32.mrb[79].mxu1 }
 0x4e6   : > { %v8073_v37 = vadd.f32 %v9734_v7, %v8033_v31 }
 0x4fe   : > { %v9754_v40 = vpop.f32.mrb[80].mxu0 }
 0x4ff   : > { %v9755_v39 = vpop.f32.mrb[81].mxu0 }
 0x500   : > { %v9756_v6 = vadd.f32 %v9755_v39, %v9754_v40  ;;  %v9757_v55 = vpop.f32.mrb[82].mxu0 }
 0x501   : > { %v9758_v34 = vpop.f32.mrb[83].mxu0 }
 0x502   : > { %v8113_v56 = vadd.f32 %v9756_v6, %v8073_v37  ;;  %v9776_v57 = vpop.f32.mrb[80].mxu1 }
 0x503   : > { %v9777_v28 = vpop.f32.mrb[81].mxu1 }
 0x504   : > { %v9778_v0 = vadd.f32 %v9777_v28, %v9776_v57  ;;  %v9779_v3 = vpop.f32.mrb[82].mxu1 }
 0x505   : > { %v9780_v5 = vpop.f32.mrb[83].mxu1 }
 0x506   : > { %v8153_v10 = vadd.f32 %v9778_v0, %v8113_v56 }
 0x51e   : > { %v9798_v63 = vpop.f32.mrb[84].mxu0 }
 0x51f   : > { %v9799_v52 = vpop.f32.mrb[85].mxu0 }
 0x520   : > { %v9800_v12 = vadd.f32 %v9799_v52, %v9798_v63  ;;  %v9801_v54 = vpop.f32.mrb[86].mxu0 }
 0x521   : > { %v9802_v11 = vpop.f32.mrb[87].mxu0 }
 0x522   : > { %v8193_v15 = vadd.f32 %v9800_v12, %v8153_v10  ;;  %v9820_v50 = vpop.f32.mrb[84].mxu1 }
 0x523   : > { %v9821_v17 = vpop.f32.mrb[85].mxu1 }
 0x524   : > { %v9822_v61 = vadd.f32 %v9821_v17, %v9820_v50  ;;  %v9823_v38 = vpop.f32.mrb[86].mxu1 }
 0x525   : > { %v9824_v16 = vpop.f32.mrb[87].mxu1 }
 0x526   : > { %v8233_v59 = vadd.f32 %v9822_v61, %v8193_v15 }
 0x53e   : > { %v9842_v44 = vpop.f32.mrb[88].mxu0 }
 0x53f   : > { %v9843_v9 = vpop.f32.mrb[89].mxu0 }
 0x540   : > { %v9844_v2 = vadd.f32 %v9843_v9, %v9842_v44  ;;  %v9845_v32 = vpop.f32.mrb[90].mxu0 }
 0x541   : > { %v9846_v62 = vpop.f32.mrb[91].mxu0 }
 0x542   : > { %v8273_v14 = vadd.f32 %v9844_v2, %v8233_v59  ;;  %v9864_v18 = vpop.f32.mrb[88].mxu1 }
 0x543   : > { %v9865_v53 = vpop.f32.mrb[89].mxu1 }
 0x544   : > { %v9866_v25 = vadd.f32 %v9865_v53, %v9864_v18  ;;  %v9867_v33 = vpop.f32.mrb[90].mxu1 }
 0x545   : > { %v9868_v24 = vpop.f32.mrb[91].mxu1 }
 0x546   : > { %v8313_v23 = vadd.f32 %v9866_v25, %v8273_v14 }
 0x55e   : > { %v9886_v45 = vpop.f32.mrb[92].mxu0 }
 0x55f   : > { %v9887_v8 = vpop.f32.mrb[93].mxu0 }
 0x560   : > { %v9888_v51 = vadd.f32 %v9887_v8, %v9886_v45  ;;  %v9889_v4 = vpop.f32.mrb[94].mxu0 }
 0x561   : > { %v9890_v49 = vpop.f32.mrb[95].mxu0 }
 0x562   : > { %v8353_v43 = vadd.f32 %v9888_v51, %v8313_v23  ;;  %v9908_v13 = vpop.f32.mrb[92].mxu1 }
 0x563   : > { %v9909_v41 = vpop.f32.mrb[93].mxu1 }
 0x564   : > { %v9910_v19 = vadd.f32 %v9909_v41, %v9908_v13  ;;  %v9911_v20 = vpop.f32.mrb[94].mxu1 }
 0x565   : > { %v9912_v1 = vpop.f32.mrb[95].mxu1 }
 0x566   : > { %v8393_v58 = vadd.f32 %v9910_v19, %v8353_v43 }
 0x57e   : > { %v9930_v27 = vpop.f32.mrb[96].mxu0 }
 0x57f   : > { %v9931_v21 = vpop.f32.mrb[97].mxu0 }
 0x580   : > { %v9932_v46 = vadd.f32 %v9931_v21, %v9930_v27  ;;  %v9933_v60 = vpop.f32.mrb[98].mxu0 }
 0x581   : > { %v9934_v47 = vpop.f32.mrb[99].mxu0 }
 0x582   : > { %v8433_v22 = vadd.f32 %v9932_v46, %v8393_v58  ;;  %v9952_v29 = vpop.f32.mrb[96].mxu1 }
 0x583   : > { %v9953_v42 = vpop.f32.mrb[97].mxu1 }
 0x584   : > { %v9954_v30 = vadd.f32 %v9953_v42, %v9952_v29  ;;  %v9955_v31 = vpop.f32.mrb[98].mxu1  ;;  %8484 = sbr.rel (%p9390_p0) target bundleno = 1427 (0x593), region = 75 }
 0x585   : > { %v9956_v26 = vpop.f32.mrb[99].mxu1 }
 0x586   : > { %v8473_v7 = vadd.f32 %v9954_v30, %v8433_v22 }
 0x588   : > { %v8478_v36 = vadd.f32 %v8473_v7, %v4227_v48 }
 0x58a   : > { %8480 = vst.msk [vmem:[#allocation3] sm:$0x3] %vm8479_vm7, %v8478_v36 }
 0x591   : > { %v8485_v35 = vld [vmem:[#allocation3] sm:$0x3] }
 0x592   : > { %8486 = vst.msk [vmem:[%s11789_s16] sm:$0x3] %vm8479_vm7, %v8485_v35 }
 0x593 PF: > { %s16_s27 = sadd.s32 1, %s11026_s27   ;;  %s12949_s21 = smov %s11006_s22 }
 0x594   : > { %p13_p1 = scmp.ge.s32.totalorder %s16_s27, 6   ;;  %s12950_s22 = smov %s11118_s12 }
 0x595   : > { %s12951_s23 = smov %s11018_s25  ;;  %s12952_s24 = smov %s11022_s26 }
 0x596   : > { %s12953_s25 = smov %s12956_s28  ;;  %s12954_s26 = smov %s12960_s29 }
 0x597   :  { %15 = sbr.rel (!%p13_p1) target bundleno = 4 (0x4), region = 113 }

</bundles_post_ra>
